<compile_context>
chip_gen: v7x
topology: tpu7x:2x2x1
jax: 0.10.0
libtpu: 0.0.40
codegen_flags: <defaults>
</compile_context>

<pallas_src>
import functools

import numpy as np
import jax
import jax.numpy as jnp
from jax import lax
from jax.experimental import pallas as pl
from jax.experimental.pallas import tpu as pltpu


_F32 = jnp.float32
_CONTRACT_D0 = (((0,), (0,)), ((), ()))      # contract dim0 with dim0 == lhs^T @ rhs


# ----------------------------- in-kernel helpers ----------------------------

def _iota_f32(shape, dim):
    return lax.broadcasted_iota(jnp.int32, shape, dim).astype(_F32)


def _pair_selectors(groups):
    """0/1 selection matrices (P, G) for ordered pairs (i, j), i != j, in the
    reference double-loop order, built from iota (no HBM input)."""
    p = groups * (groups - 1)
    pf = _iota_f32((p, groups), 0)
    gf = _iota_f32((p, groups), 1)
    i_f = jnp.floor((pf + 0.5) * (1.0 / (groups - 1)))   # exact for these sizes
    jr = pf - i_f * (groups - 1)
    j_f = jnp.where(jr < i_f, jr, jr + 1.0)
    si = jnp.where(jnp.abs(gf - i_f) < 0.5, 1.0, 0.0).astype(_F32)
    sj = jnp.where(jnp.abs(gf - j_f) < 0.5, 1.0, 0.0).astype(_F32)
    return si, sj


def _sparsemax3(u):
    """Sparsemax over the last dim (size 3), closed form (no sort)."""
    z = u - jnp.max(u, axis=-1, keepdims=True)
    z_max = jnp.max(z, axis=-1, keepdims=True)            # == 0 after the shift
    z_min = jnp.min(z, axis=-1, keepdims=True)
    z_mid = jnp.sum(z, axis=-1, keepdims=True) - z_max - z_min
    gt2 = (1.0 + 2.0 * z_mid) > (z_max + z_mid)
    gt3 = (1.0 + 3.0 * z_min) > (z_max + z_mid + z_min)
    k = jnp.where(gt3, 3.0, jnp.where(gt2, 2.0, 1.0))
    zs_sparse = z_max + jnp.where(gt2, z_mid, 0.0) + jnp.where(gt3, z_min, 0.0)
    taus = (zs_sparse - 1.0) / k
    return jnp.maximum(z - taus, 0.0)


def _node_model_col(pre3, b3_row, w4_row, b4_scalar):
    """NodeModel tail in lane-dense (L=edge_h, C) layout.

    pre3 = edge_attr^T @ conv3_w^T.  Returns the single distinct edge2node
    output row as an (L, 1) column:
      col = (1 + sigmoid(conv4(relu(conv3)))) * rowsum(relu(conv3)) / L.
    conv4 (a 1-column matmul) is done on the VPU + XLU lane reduce instead of
    the MXU; the epilogue is algebraically simplified (r is constant over C).
    """
    h = jnp.maximum(pre3 + b3_row, 0.0)                                  # (L, C)
    s = jnp.sum(h, axis=-1, keepdims=True)                               # (L, 1)
    r = jax.nn.sigmoid(jnp.sum(h * w4_row, axis=-1, keepdims=True) + b4_scalar)
    return (1.0 + r) * s * (1.0 / pre3.shape[0])                         # (L, 1)


# ------------------------------- fused kernel -------------------------------

def _lgnn_fused_kernel(w_ref, xm_ref, ehm_ref, gw3tm_ref, ww3tm_ref,
                       u_ref, xl_ref, ehl_ref, gw3tl_ref, ww3tl_ref,
                       einf_ref, bias_ref, b4_ref,
                       out_ref, *, batch_main, groups_main, groups_lg):
    feat = (einf_ref.shape[0] - 1) // 2
    einf = einf_ref[...].astype(_F32)                 # (2F+1, H)
    w_i = einf[:feat]                                  # (F, H)
    w_j = einf[feat:2 * feat]                          # (F, H)
    b_e = einf[2 * feat:2 * feat + 1]                  # (1, H)

    def branch(w_mix, xs, gw3t, b3_g, w4_g, b4_g, eh, ww3t, b3_w, w4_w, b4_w,
               groups):
        si, sj = _pair_selectors(groups)
        gebs = []
        for xb in xs:                                  # static loop, <= 2 graphs
            gxb = lax.dot_general(w_mix, xb, _CONTRACT_D0,
                                  preferred_element_type=_F32)            # (G, F)
            gi = jnp.dot(si, gxb, preferred_element_type=_F32)            # (P, F)
            gj = jnp.dot(sj, gxb, preferred_element_type=_F32)            # (P, F)
            gebs.append(jnp.maximum(
                jnp.dot(gi, w_i, preferred_element_type=_F32) +
                jnp.dot(gj, w_j, preferred_element_type=_F32) + b_e, 0.0))  # (P, H)
        geb_all = gebs[0] if len(gebs) == 1 else jnp.concatenate(gebs, axis=0)
        # group NodeModel conv3: ONE contraction over all B*P edge rows
        pre_grp = lax.dot_general(geb_all, gw3t, _CONTRACT_D0,
                                  preferred_element_type=_F32)             # (H, C)
        col_grp = _node_model_col(pre_grp, b3_g, w4_g, b4_g)
        # global NodeModel conv3 on the graph's edge features e_h
        pre_glb = lax.dot_general(eh, ww3t, _CONTRACT_D0,
                                  preferred_element_type=_F32)             # (H, C)
        col_glb = _node_model_col(pre_glb, b3_w, w4_w, b4_w)
        return col_glb, col_grp

    # ----- main graph branch: mixing weights = F.softmax(self.w, dim=1) -----
    w = w_ref[...].astype(_F32)
    w = jnp.exp(w - jnp.max(w, axis=-1, keepdims=True))
    w = w / jnp.sum(w, axis=-1, keepdims=True)
    xs_main = [xm_ref[b].astype(_F32) for b in range(batch_main)]
    glb_m, grp_m = branch(
        w, xs_main, gw3tm_ref[...].astype(_F32),
        bias_ref[0:1, :], bias_ref[4:5, :], b4_ref[0],
        ehm_ref[...].astype(_F32), ww3tm_ref[...].astype(_F32),
        bias_ref[1:2, :], bias_ref[5:6, :], b4_ref[1],
        groups_main)

    # ----- line-graph branch: mixing weights = sparsemax(U), in-kernel -----
    w_lg = _sparsemax3(u_ref[...].astype(_F32))
    glb_l, grp_l = branch(
        w_lg, [xl_ref[...].astype(_F32)], gw3tl_ref[...].astype(_F32),
        bias_ref[2:3, :], bias_ref[6:7, :], b4_ref[2],
        ehl_ref[...].astype(_F32), ww3tl_ref[...].astype(_F32),
        bias_ref[3:4, :], bias_ref[7:8, :], b4_ref[3],
        groups_lg)

    # ----- single lane-dense store: (4, H) = [new_x row, next_lg_x row,
    #       group-row(main), group-row(lg)]; tiny transpose via identity matmul
    cols = jnp.concatenate([glb_m, glb_l, grp_m, grp_l], axis=-1)        # (H, 4)
    h_dim = cols.shape[0]
    eye = jnp.where(lax.broadcasted_iota(jnp.int32, (h_dim, h_dim), 0) ==
                    lax.broadcasted_iota(jnp.int32, (h_dim, h_dim), 1),
                    1.0, 0.0).astype(_F32)
    out_ref[...] = lax.dot_general(cols, eye, _CONTRACT_D0,
                                   preferred_element_type=_F32).astype(out_ref.dtype)


# --------------------------------- wrapper ----------------------------------

def lgnn_layer_forward(g_h, g_eh, lg_h, lg_eh, w_param, u_lg,
                       edge_inf_w, edge_inf_b,
                       group_layers_main, global_layers_main,
                       group_layers_lg, global_layers_lg,
                       *, num_ents, group_num, lgroup_num):
    """Fused LGNNLayer.forward: returns (new_x, next_lg_x, grp_main, grp_lg)."""
    f_x = g_h.shape[-1]
    h_dim = g_eh.shape[-1]
    b = g_h.shape[0] // num_ents
    g_num_lg = lg_h.shape[0]
    assert lgroup_num == 3, "in-kernel sparsemax is specialized to lgroup_num == 3"
    # TODO(synk): generalize the closed-form sparsemax for lgroup_num != 3.

    x_main = g_h.reshape(b, num_ents, f_x)

    # Only the LAST NodeModel of each stack affects the output (earlier layers
    # are overwritten in the reference loops) -> dead layers dropped.
    gw3_m, gb3_m, gw4_m, gb4_m = group_layers_main[-1]
    ww3_m, wb3_m, ww4_m, wb4_m = global_layers_main[-1]
    gw3_l, gb3_l, gw4_l, gb4_l = group_layers_lg[-1]
    ww3_l, wb3_l, ww4_l, wb4_l = global_layers_lg[-1]
    c_dim = gw3_m.shape[0]

    # packed parameter slabs (cuts DMA count)
    einf_slab = jnp.concatenate([edge_inf_w, edge_inf_b.reshape(1, -1)], axis=0)
    bias_slab = jnp.concatenate(
        [gb3_m.reshape(1, c_dim), wb3_m.reshape(1, c_dim),
         gb3_l.reshape(1, c_dim), wb3_l.reshape(1, c_dim),
         gw4_m.reshape(1, c_dim), ww4_m.reshape(1, c_dim),
         gw4_l.reshape(1, c_dim), ww4_l.reshape(1, c_dim)], axis=0)      # (8, C)
    b4_smem = jnp.stack([gb4_m.reshape(()), wb4_m.reshape(()),
                         gb4_l.reshape(()), wb4_l.reshape(())])          # (4,)

    gw3t_m = jnp.transpose(gw3_m)      # (B*P, C)
    ww3t_m = jnp.transpose(ww3_m)      # (E_g, C)
    gw3t_l = jnp.transpose(gw3_l)      # (P_lg, C)
    ww3t_l = jnp.transpose(ww3_l)      # (E_lg, C)

    args = (w_param, x_main, g_eh, gw3t_m, ww3t_m,
            u_lg, lg_h, lg_eh, gw3t_l, ww3t_l,
            einf_slab, bias_slab, b4_smem)

    vmem = pl.BlockSpec(memory_space=pltpu.MemorySpace.VMEM)
    smem = pl.BlockSpec(memory_space=pltpu.MemorySpace.SMEM)

    # advisory cost hint so XLA schedules the call against the SVD chain
    p_m = group_num * (group_num - 1)
    p_l = lgroup_num * (lgroup_num - 1)
    flops = 2 * (b * (group_num * num_ents * f_x + 2 * p_m * group_num * f_x
                      + 2 * p_m * f_x * h_dim)
                 + (b * p_m) * h_dim * c_dim + g_eh.shape[0] * h_dim * c_dim
                 + (lgroup_num * g_num_lg * f_x + 2 * p_l * lgroup_num * f_x
                    + 2 * p_l * f_x * h_dim)
                 + p_l * h_dim * c_dim + lg_eh.shape[0] * h_dim * c_dim
                 + 8 * h_dim * c_dim)
    bytes_accessed = sum(int(np.prod(a.shape)) * 4 for a in args) + 4 * 4 * h_dim
    cost = pl.CostEstimate(flops=int(flops),
                           transcendentals=int(num_ents * group_num + 4 * h_dim),
                           bytes_accessed=int(bytes_accessed))

    kernel = functools.partial(_lgnn_fused_kernel, batch_main=b,
                               groups_main=group_num, groups_lg=lgroup_num)
    out = pl.pallas_call(
        kernel,
        out_shape=jax.ShapeDtypeStruct((4, h_dim), jnp.float32),
        in_specs=[vmem] * 12 + [smem],
        out_specs=vmem,
        cost_estimate=cost,
    )(*args)

    # Every edge2node output row is identical (all-ones aggregation), so the
    # kernel emits one lane-dense row per NodeModel; broadcast here.
    new_x = jnp.broadcast_to(out[0:1], (b * num_ents, h_dim))
    next_lg_x = jnp.broadcast_to(out[1:2], (g_num_lg, h_dim))
    return new_x, next_lg_x, out[2:3], out[3:4]


# ----------------------------- plain-JAX glue -------------------------------

def sparsemax(z):
    """Sort/cumsum-based sparsemax (validation reference only)."""
    z = z - jnp.max(z, axis=-1, keepdims=True)
    zs = -jnp.sort(-z, axis=-1)                                 # descending
    rng = jnp.arange(1, z.shape[-1] + 1, dtype=z.dtype)
    bound = 1.0 + rng * zs
    cum = jnp.cumsum(zs, axis=-1)
    is_gt = (bound > cum).astype(z.dtype)
    k = jnp.max(is_gt * rng, axis=-1, keepdims=True)
    taus = (jnp.sum(is_gt * zs, axis=-1, keepdims=True) - 1.0) / k
    return jnp.maximum(z - taus, 0.0)


# ------------------- plain-JAX reference (validation only) ------------------

def _node_model_ref(edge_attr, w3, b3, w4, b4, node_num):
    hi = jax.lax.Precision.HIGHEST
    h = jnp.maximum(jnp.dot(w3, edge_attr, precision=hi) + b3, 0.0)      # (C, L)
    r = jax.nn.sigmoid(jnp.dot(w4, h, precision=hi) + b4)                # (1, L)
    h2 = h + h * r
    inc = jnp.dot(jnp.ones((node_num, h2.shape[0]), jnp.float32), h2,
                  precision=hi)
    return inc / h2.shape[1]


def _branch_ref(x_nodes, e_h, w_mix, nodes_per_batch, groups,
                edge_inf_w, edge_inf_b, group_layers, global_layers):
    hi = jax.lax.Precision.HIGHEST
    f_x = x_nodes.shape[-1]
    bb = x_nodes.shape[0] // nodes_per_batch
    x3 = x_nodes.reshape(bb, nodes_per_batch, f_x)
    gx = jnp.einsum('ng,bnf->bgf', w_mix, x3, precision=hi)
    rows = [jnp.concatenate([gx[:, i], gx[:, j]], axis=-1)
            for i in range(groups) for j in range(groups) if i != j]
    e_in = jnp.transpose(jnp.stack(rows, axis=0), (1, 0, 2)).reshape(-1, 2 * f_x)
    gew = jnp.maximum(jnp.dot(e_in, edge_inf_w, precision=hi) + edge_inf_b, 0.0)
    grp = _node_model_ref(gew, *group_layers[-1], bb * groups)
    glb = _node_model_ref(e_h, *global_layers[-1], bb * nodes_per_batch)
    return glb, grp


# ---------------------------------- driver ----------------------------------

if __name__ == "__main__":
    # ---- configuration (small, consistent with the module) ----
    x_em = 8
    edge_h = 8
    group_num = 4
    lgroup_num = 3
    num_ents = 16          # city_num
    B = 2                  # batch of graphs packed into g.ndata['h']
    E_g = 10               # edges of g
    g_num_lg = 12          # lg.num_nodes()
    E_lg = 8               # edges of lg
    gnn_layer = 2
    channel_dim = 120
    time_reduce = 1
    C = channel_dim * time_reduce * 2   # conv3/conv4 channel count = 240
    F_x = 2 * x_em                      # node feat dim; edge_inf expects 4*x_em

    key = jax.random.PRNGKey(0)
    keys = iter(jax.random.split(key, 64))

    # ---- inputs (graph tensors) ----
    g_h = jax.random.normal(next(keys), (B * num_ents, F_x), jnp.float32)
    g_eh = jax.random.normal(next(keys), (E_g, edge_h), jnp.float32)
    lg_h = jax.random.normal(next(keys), (g_num_lg, F_x), jnp.float32)
    lg_eh = jax.random.normal(next(keys), (E_lg, edge_h), jnp.float32)

    # ---- parameters (deterministic synthetic init; the reference re-randomizes
    #      conv3 / lg_w every forward, here they are explicit inputs) ----
    w_param = jax.random.normal(next(keys), (num_ents, group_num), jnp.float32)
    lg_w_param = jax.random.normal(next(keys), (g_num_lg, lgroup_num), jnp.float32)
    edge_inf_w = 0.1 * jax.random.normal(next(keys), (4 * x_em, edge_h), jnp.float32)
    edge_inf_b = 0.1 * jax.random.normal(next(keys), (edge_h,), jnp.float32)

    def conv_weights(k, e_in):
        k1, k2, k3, k4 = jax.random.split(k, 4)
        w3 = 0.1 * jax.random.normal(k1, (C, e_in), jnp.float32)    # conv3
        b3 = 0.1 * jax.random.normal(k2, (C, 1), jnp.float32)
        w4 = 0.1 * jax.random.normal(k3, (1, C), jnp.float32)       # conv4
        b4 = 0.1 * jax.random.normal(k4, (1, 1), jnp.float32)
        return (w3, b3, w4, b4)

    P = group_num * (group_num - 1)
    P_lg = lgroup_num * (lgroup_num - 1)
    # gnn_layer weight stacks mirror the module; only [-1] is live.
    group_layers_main = [conv_weights(next(keys), B * P) for _ in range(gnn_layer)]
    global_layers_main = [conv_weights(next(keys), E_g) for _ in range(gnn_layer)]
    group_layers_lg = [conv_weights(next(keys), 1 * P_lg) for _ in range(gnn_layer)]
    global_layers_lg = [conv_weights(next(keys), E_lg) for _ in range(gnn_layer)]

    @jax.jit
    def forward(g_h, g_eh, lg_h, lg_eh, w_param, lg_w_param,
                edge_inf_w, edge_inf_b,
                group_layers_main, global_layers_main,
                group_layers_lg, global_layers_lg):
        # TODO(synk): torch.svd_lowrank (randomized) replaced by exact
        # jnp.linalg.svd; sign/column order of U may differ from PyTorch's
        # randomized SVD.  Sparsemax over U happens inside the fused kernel.
        U, _, _ = jnp.linalg.svd(lg_w_param, full_matrices=False)
        U = U[:, :lgroup_num]
        new_x, next_lg_x, grp_main, grp_lg = lgnn_layer_forward(
            g_h, g_eh, lg_h, lg_eh, w_param, U, edge_inf_w, edge_inf_b,
            group_layers_main, global_layers_main,
            group_layers_lg, global_layers_lg,
            num_ents=num_ents, group_num=group_num, lgroup_num=lgroup_num)
        # (new_x, next_lg_x) are the module outputs; (grp_main, grp_lg, U) are
        # returned only to validate the fused group-mixing / sparsemax path.
        return (new_x, next_lg_x), (grp_main, grp_lg, U)

    (new_x, next_lg_x), (grp_main, grp_lg, U) = forward(
        g_h, g_eh, lg_h, lg_eh, w_param, lg_w_param,
        edge_inf_w, edge_inf_b,
        group_layers_main, global_layers_main,
        group_layers_lg, global_layers_lg)
    jax.block_until_ready((new_x, next_lg_x, grp_main, grp_lg, U))

    assert new_x.shape == (B * num_ents, edge_h)
    assert next_lg_x.shape == (g_num_lg, edge_h)

    # ---- validate the fused kernel against a plain-JAX reference ----
    w_sm = jax.nn.softmax(w_param, axis=1)
    w_lg_ref = sparsemax(U)
    ref_glb_m, ref_grp_m = _branch_ref(g_h, g_eh, w_sm, num_ents, group_num,
                                       edge_inf_w, edge_inf_b,
                                       group_layers_main, global_layers_main)
    ref_glb_l, ref_grp_l = _branch_ref(lg_h, lg_eh, w_lg_ref, g_num_lg, lgroup_num,
                                       edge_inf_w, edge_inf_b,
                                       group_layers_lg, global_layers_lg)
    np.testing.assert_allclose(np.asarray(new_x), np.asarray(ref_glb_m),
                               rtol=2e-2, atol=2e-2)
    np.testing.assert_allclose(np.asarray(next_lg_x), np.asarray(ref_glb_l),
                               rtol=2e-2, atol=2e-2)
    np.testing.assert_allclose(np.asarray(grp_main), np.asarray(ref_grp_m[:1]),
                               rtol=2e-2, atol=2e-2)
    np.testing.assert_allclose(np.asarray(grp_lg), np.asarray(ref_grp_l[:1]),
                               rtol=2e-2, atol=2e-2)

    print("KERNEL_OK")
</pallas_src>

<mosaic_0001>
module attributes {stable_mosaic.version = 11 : i64} {
  func.func @_lgnn_fused_kernel(%arg0: memref<16x4xf32, #tpu.memory_space<vmem>>, %arg1: memref<2x16x16xf32, #tpu.memory_space<vmem>>, %arg2: memref<10x8xf32, #tpu.memory_space<vmem>>, %arg3: memref<24x240xf32, #tpu.memory_space<vmem>>, %arg4: memref<10x240xf32, #tpu.memory_space<vmem>>, %arg5: memref<12x3xf32, #tpu.memory_space<vmem>>, %arg6: memref<12x16xf32, #tpu.memory_space<vmem>>, %arg7: memref<8x8xf32, #tpu.memory_space<vmem>>, %arg8: memref<6x240xf32, #tpu.memory_space<vmem>>, %arg9: memref<8x240xf32, #tpu.memory_space<vmem>>, %arg10: memref<33x8xf32, #tpu.memory_space<vmem>>, %arg11: memref<8x240xf32, #tpu.memory_space<vmem>>, %arg12: memref<4xf32, #tpu.memory_space<smem>>, %arg13: memref<4x8xf32, #tpu.memory_space<vmem>>) attributes {dimension_semantics = [], scalar_prefetch = 0 : i64, scratch_operands = 0 : i64, tpu.core_type = #tpu.core_type<tc>} {
    %c0 = arith.constant 0 : index
    %c0_0 = arith.constant 0 : index
    %0 = vector.load %arg10[%c0, %c0_0] : memref<33x8xf32, #tpu.memory_space<vmem>>, vector<33x8xf32>
    %1 = vector.extract_strided_slice %0 {offsets = [0, 0], sizes = [16, 8], strides = [1, 1]} : vector<33x8xf32> to vector<16x8xf32>
    %2 = vector.extract_strided_slice %0 {offsets = [16, 0], sizes = [16, 8], strides = [1, 1]} : vector<33x8xf32> to vector<16x8xf32>
    %3 = vector.extract_strided_slice %0 {offsets = [32, 0], sizes = [1, 8], strides = [1, 1]} : vector<33x8xf32> to vector<1x8xf32>
    %c0_1 = arith.constant 0 : index
    %c0_2 = arith.constant 0 : index
    %4 = vector.load %arg0[%c0_1, %c0_2] : memref<16x4xf32, #tpu.memory_space<vmem>>, vector<16x4xf32>
    %cst = arith.constant dense<0xFF800000> : vector<16xf32>
    %5 = vector.multi_reduction <maximumf>, %4, %cst [1] : vector<16x4xf32> to vector<16xf32>
    %6 = vector.shape_cast %5 : vector<16xf32> to vector<16x1xf32>
    %7 = vector.broadcast %6 : vector<16x1xf32> to vector<16x4xf32>
    %8 = arith.subf %4, %7 : vector<16x4xf32>
    %9 = math.exp %8 : vector<16x4xf32>
    %cst_3 = arith.constant dense<0.000000e+00> : vector<16xf32>
    %10 = vector.multi_reduction <add>, %9, %cst_3 [1] : vector<16x4xf32> to vector<16xf32>
    %11 = vector.shape_cast %10 : vector<16xf32> to vector<16x1xf32>
    %12 = vector.broadcast %11 : vector<16x1xf32> to vector<16x4xf32>
    %13 = arith.divf %9, %12 : vector<16x4xf32>
    %c0_4 = arith.constant 0 : index
    %c0_5 = arith.constant 0 : index
    %c0_6 = arith.constant 0 : index
    %14 = vector.load %arg1[%c0_4, %c0_5, %c0_6] : memref<2x16x16xf32, #tpu.memory_space<vmem>>, vector<1x16x16xf32>
    %15 = vector.shape_cast %14 : vector<1x16x16xf32> to vector<16x16xf32>
    %c1 = arith.constant 1 : index
    %c0_7 = arith.constant 0 : index
    %c0_8 = arith.constant 0 : index
    %16 = vector.load %arg1[%c1, %c0_7, %c0_8] : memref<2x16x16xf32, #tpu.memory_space<vmem>>, vector<1x16x16xf32>
    %17 = vector.shape_cast %16 : vector<1x16x16xf32> to vector<16x16xf32>
    %c0_9 = arith.constant 0 : index
    %c0_10 = arith.constant 0 : index
    %18 = vector.load %arg3[%c0_9, %c0_10] : memref<24x240xf32, #tpu.memory_space<vmem>>, vector<24x240xf32>
    %c0_11 = arith.constant 0 : index
    %c0_12 = arith.constant 0 : index
    %19 = vector.load %arg11[%c0_11, %c0_12] : memref<8x240xf32, #tpu.memory_space<vmem>>, vector<1x240xf32>
    %c4 = arith.constant 4 : index
    %c0_13 = arith.constant 0 : index
    %20 = vector.load %arg11[%c4, %c0_13] : memref<8x240xf32, #tpu.memory_space<vmem>>, vector<1x240xf32>
    %c0_14 = arith.constant 0 : index
    %21 = memref.load %arg12[%c0_14] : memref<4xf32, #tpu.memory_space<smem>>
    %c0_15 = arith.constant 0 : index
    %c0_16 = arith.constant 0 : index
    %22 = vector.load %arg2[%c0_15, %c0_16] : memref<10x8xf32, #tpu.memory_space<vmem>>, vector<10x8xf32>
    %c0_17 = arith.constant 0 : index
    %c0_18 = arith.constant 0 : index
    %23 = vector.load %arg4[%c0_17, %c0_18] : memref<10x240xf32, #tpu.memory_space<vmem>>, vector<10x240xf32>
    %c1_19 = arith.constant 1 : index
    %c0_20 = arith.constant 0 : index
    %24 = vector.load %arg11[%c1_19, %c0_20] : memref<8x240xf32, #tpu.memory_space<vmem>>, vector<1x240xf32>
    %c5 = arith.constant 5 : index
    %c0_21 = arith.constant 0 : index
    %25 = vector.load %arg11[%c5, %c0_21] : memref<8x240xf32, #tpu.memory_space<vmem>>, vector<1x240xf32>
    %c1_22 = arith.constant 1 : index
    %26 = memref.load %arg12[%c1_22] : memref<4xf32, #tpu.memory_space<smem>>
    %27 = tpu.iota {dimensions = array<i32: 0>} : vector<12x4xi32>
    %28 = arith.sitofp %27 : vector<12x4xi32> to vector<12x4xf32>
    %29 = tpu.iota {dimensions = array<i32: 1>} : vector<12x4xi32>
    %30 = arith.sitofp %29 : vector<12x4xi32> to vector<12x4xf32>
    %cst_23 = arith.constant 5.000000e-01 : f32
    %31 = vector.broadcast %cst_23 : f32 to vector<12x4xf32>
    %32 = arith.addf %28, %31 : vector<12x4xf32>
    %cst_24 = arith.constant 0.333333343 : f32
    %33 = vector.broadcast %cst_24 : f32 to vector<12x4xf32>
    %34 = arith.mulf %32, %33 : vector<12x4xf32>
    %35 = math.floor %34 : vector<12x4xf32>
    %cst_25 = arith.constant 3.000000e+00 : f32
    %36 = vector.broadcast %cst_25 : f32 to vector<12x4xf32>
    %37 = arith.mulf %35, %36 : vector<12x4xf32>
    %38 = arith.subf %28, %37 : vector<12x4xf32>
    %39 = arith.cmpf olt, %38, %35 : vector<12x4xf32>
    %cst_26 = arith.constant 1.000000e+00 : f32
    %40 = vector.broadcast %cst_26 : f32 to vector<12x4xf32>
    %41 = arith.addf %38, %40 : vector<12x4xf32>
    %42 = arith.select %39, %38, %41 : vector<12x4xi1>, vector<12x4xf32>
    %43 = arith.subf %30, %35 : vector<12x4xf32>
    %44 = math.absf %43 : vector<12x4xf32>
    %cst_27 = arith.constant 5.000000e-01 : f32
    %45 = vector.broadcast %cst_27 : f32 to vector<12x4xf32>
    %46 = arith.cmpf olt, %44, %45 : vector<12x4xf32>
    %cst_28 = arith.constant 1.000000e+00 : f32
    %cst_29 = arith.constant 0.000000e+00 : f32
    %47 = vector.broadcast %cst_28 : f32 to vector<12x4xf32>
    %48 = vector.broadcast %cst_29 : f32 to vector<12x4xf32>
    %49 = arith.select %46, %47, %48 : vector<12x4xi1>, vector<12x4xf32>
    %50 = arith.subf %30, %42 : vector<12x4xf32>
    %51 = math.absf %50 : vector<12x4xf32>
    %cst_30 = arith.constant 5.000000e-01 : f32
    %52 = vector.broadcast %cst_30 : f32 to vector<12x4xf32>
    %53 = arith.cmpf olt, %51, %52 : vector<12x4xf32>
    %cst_31 = arith.constant 1.000000e+00 : f32
    %cst_32 = arith.constant 0.000000e+00 : f32
    %54 = vector.broadcast %cst_31 : f32 to vector<12x4xf32>
    %55 = vector.broadcast %cst_32 : f32 to vector<12x4xf32>
    %56 = arith.select %53, %54, %55 : vector<12x4xi1>, vector<12x4xf32>
    %cst_33 = arith.constant dense<0.000000e+00> : vector<4x16xf32>
    %57 = tpu.matmul %13, %15, %cst_33 {dimension_numbers = #tpu.dot_dimension_numbers<[0], [0], [1], [1], [0, 1, 1, 1], [], []>} : vector<16x4xf32>, vector<16x16xf32>, vector<4x16xf32> -> vector<4x16xf32>
    %cst_34 = arith.constant dense<0.000000e+00> : vector<12x16xf32>
    %58 = tpu.matmul %49, %57, %cst_34 {dimension_numbers = #tpu.dot_dimension_numbers<[1], [0], [0], [1], [0, 0, 1, 1], [], []>} : vector<12x4xf32>, vector<4x16xf32>, vector<12x16xf32> -> vector<12x16xf32>
    %cst_35 = arith.constant dense<0.000000e+00> : vector<12x16xf32>
    %59 = tpu.matmul %56, %57, %cst_35 {dimension_numbers = #tpu.dot_dimension_numbers<[1], [0], [0], [1], [0, 0, 1, 1], [], []>} : vector<12x4xf32>, vector<4x16xf32>, vector<12x16xf32> -> vector<12x16xf32>
    %cst_36 = arith.constant dense<0.000000e+00> : vector<12x8xf32>
    %60 = tpu.matmul %58, %1, %cst_36 {dimension_numbers = #tpu.dot_dimension_numbers<[1], [0], [0], [1], [0, 0, 1, 1], [], []>} : vector<12x16xf32>, vector<16x8xf32>, vector<12x8xf32> -> vector<12x8xf32>
    %cst_37 = arith.constant dense<0.000000e+00> : vector<12x8xf32>
    %61 = tpu.matmul %59, %2, %cst_37 {dimension_numbers = #tpu.dot_dimension_numbers<[1], [0], [0], [1], [0, 0, 1, 1], [], []>} : vector<12x16xf32>, vector<16x8xf32>, vector<12x8xf32> -> vector<12x8xf32>
    %62 = arith.addf %60, %61 : vector<12x8xf32>
    %63 = vector.broadcast %3 : vector<1x8xf32> to vector<12x8xf32>
    %64 = arith.addf %62, %63 : vector<12x8xf32>
    %cst_38 = arith.constant 0.000000e+00 : f32
    %65 = vector.broadcast %cst_38 : f32 to vector<12x8xf32>
    %66 = arith.maximumf %64, %65 : vector<12x8xf32>
    %cst_39 = arith.constant dense<0.000000e+00> : vector<4x16xf32>
    %67 = tpu.matmul %13, %17, %cst_39 {dimension_numbers = #tpu.dot_dimension_numbers<[0], [0], [1], [1], [0, 1, 1, 1], [], []>} : vector<16x4xf32>, vector<16x16xf32>, vector<4x16xf32> -> vector<4x16xf32>
    %cst_40 = arith.constant dense<0.000000e+00> : vector<12x16xf32>
    %68 = tpu.matmul %49, %67, %cst_40 {dimension_numbers = #tpu.dot_dimension_numbers<[1], [0], [0], [1], [0, 0, 1, 1], [], []>} : vector<12x4xf32>, vector<4x16xf32>, vector<12x16xf32> -> vector<12x16xf32>
    %cst_41 = arith.constant dense<0.000000e+00> : vector<12x16xf32>
    %69 = tpu.matmul %56, %67, %cst_41 {dimension_numbers = #tpu.dot_dimension_numbers<[1], [0], [0], [1], [0, 0, 1, 1], [], []>} : vector<12x4xf32>, vector<4x16xf32>, vector<12x16xf32> -> vector<12x16xf32>
    %cst_42 = arith.constant dense<0.000000e+00> : vector<12x8xf32>
    %70 = tpu.matmul %68, %1, %cst_42 {dimension_numbers = #tpu.dot_dimension_numbers<[1], [0], [0], [1], [0, 0, 1, 1], [], []>} : vector<12x16xf32>, vector<16x8xf32>, vector<12x8xf32> -> vector<12x8xf32>
    %cst_43 = arith.constant dense<0.000000e+00> : vector<12x8xf32>
    %71 = tpu.matmul %69, %2, %cst_43 {dimension_numbers = #tpu.dot_dimension_numbers<[1], [0], [0], [1], [0, 0, 1, 1], [], []>} : vector<12x16xf32>, vector<16x8xf32>, vector<12x8xf32> -> vector<12x8xf32>
    %72 = arith.addf %70, %71 : vector<12x8xf32>
    %73 = vector.broadcast %3 : vector<1x8xf32> to vector<12x8xf32>
    %74 = arith.addf %72, %73 : vector<12x8xf32>
    %cst_44 = arith.constant 0.000000e+00 : f32
    %75 = vector.broadcast %cst_44 : f32 to vector<12x8xf32>
    %76 = arith.maximumf %74, %75 : vector<12x8xf32>
    %77 = tpu.concatenate %66, %76 in 0 : vector<12x8xf32>, vector<12x8xf32> -> vector<24x8xf32>
    %cst_45 = arith.constant dense<0.000000e+00> : vector<8x240xf32>
    %78 = tpu.matmul %77, %18, %cst_45 {dimension_numbers = #tpu.dot_dimension_numbers<[0], [0], [1], [1], [0, 1, 1, 1], [], []>} : vector<24x8xf32>, vector<24x240xf32>, vector<8x240xf32> -> vector<8x240xf32>
    %79 = vector.broadcast %19 : vector<1x240xf32> to vector<8x240xf32>
    %80 = arith.addf %78, %79 : vector<8x240xf32>
    %cst_46 = arith.constant 0.000000e+00 : f32
    %81 = vector.broadcast %cst_46 : f32 to vector<8x240xf32>
    %82 = arith.maximumf %80, %81 : vector<8x240xf32>
    %cst_47 = arith.constant dense<0.000000e+00> : vector<8xf32>
    %83 = vector.multi_reduction <add>, %82, %cst_47 [1] : vector<8x240xf32> to vector<8xf32>
    %84 = vector.shape_cast %83 : vector<8xf32> to vector<8x1xf32>
    %85 = vector.broadcast %20 : vector<1x240xf32> to vector<8x240xf32>
    %86 = arith.mulf %82, %85 : vector<8x240xf32>
    %cst_48 = arith.constant dense<0.000000e+00> : vector<8xf32>
    %87 = vector.multi_reduction <add>, %86, %cst_48 [1] : vector<8x240xf32> to vector<8xf32>
    %88 = vector.shape_cast %87 : vector<8xf32> to vector<8x1xf32>
    %89 = vector.broadcast %21 : f32 to vector<8x1xf32>
    %90 = arith.addf %88, %89 : vector<8x1xf32>
    %91 = arith.negf %90 : vector<8x1xf32>
    %92 = math.exp %91 : vector<8x1xf32>
    %cst_49 = arith.constant 1.000000e+00 : f32
    %93 = vector.broadcast %cst_49 : f32 to vector<8x1xf32>
    %94 = arith.addf %93, %92 : vector<8x1xf32>
    %95 = arith.divf %93, %94 : vector<8x1xf32>
    %cst_50 = arith.constant 1.000000e+00 : f32
    %96 = vector.broadcast %cst_50 : f32 to vector<8x1xf32>
    %97 = arith.addf %96, %95 : vector<8x1xf32>
    %98 = arith.mulf %97, %84 : vector<8x1xf32>
    %cst_51 = arith.constant 1.250000e-01 : f32
    %99 = vector.broadcast %cst_51 : f32 to vector<8x1xf32>
    %100 = arith.mulf %98, %99 : vector<8x1xf32>
    %cst_52 = arith.constant dense<0.000000e+00> : vector<8x240xf32>
    %101 = tpu.matmul %22, %23, %cst_52 {dimension_numbers = #tpu.dot_dimension_numbers<[0], [0], [1], [1], [0, 1, 1, 1], [], []>} : vector<10x8xf32>, vector<10x240xf32>, vector<8x240xf32> -> vector<8x240xf32>
    %102 = vector.broadcast %24 : vector<1x240xf32> to vector<8x240xf32>
    %103 = arith.addf %101, %102 : vector<8x240xf32>
    %cst_53 = arith.constant 0.000000e+00 : f32
    %104 = vector.broadcast %cst_53 : f32 to vector<8x240xf32>
    %105 = arith.maximumf %103, %104 : vector<8x240xf32>
    %cst_54 = arith.constant dense<0.000000e+00> : vector<8xf32>
    %106 = vector.multi_reduction <add>, %105, %cst_54 [1] : vector<8x240xf32> to vector<8xf32>
    %107 = vector.shape_cast %106 : vector<8xf32> to vector<8x1xf32>
    %108 = vector.broadcast %25 : vector<1x240xf32> to vector<8x240xf32>
    %109 = arith.mulf %105, %108 : vector<8x240xf32>
    %cst_55 = arith.constant dense<0.000000e+00> : vector<8xf32>
    %110 = vector.multi_reduction <add>, %109, %cst_55 [1] : vector<8x240xf32> to vector<8xf32>
    %111 = vector.shape_cast %110 : vector<8xf32> to vector<8x1xf32>
    %112 = vector.broadcast %26 : f32 to vector<8x1xf32>
    %113 = arith.addf %111, %112 : vector<8x1xf32>
    %114 = arith.negf %113 : vector<8x1xf32>
    %115 = math.exp %114 : vector<8x1xf32>
    %cst_56 = arith.constant 1.000000e+00 : f32
    %116 = vector.broadcast %cst_56 : f32 to vector<8x1xf32>
    %117 = arith.addf %116, %115 : vector<8x1xf32>
    %118 = arith.divf %116, %117 : vector<8x1xf32>
    %cst_57 = arith.constant 1.000000e+00 : f32
    %119 = vector.broadcast %cst_57 : f32 to vector<8x1xf32>
    %120 = arith.addf %119, %118 : vector<8x1xf32>
    %121 = arith.mulf %120, %107 : vector<8x1xf32>
    %cst_58 = arith.constant 1.250000e-01 : f32
    %122 = vector.broadcast %cst_58 : f32 to vector<8x1xf32>
    %123 = arith.mulf %121, %122 : vector<8x1xf32>
    %c0_59 = arith.constant 0 : index
    %c0_60 = arith.constant 0 : index
    %124 = vector.load %arg5[%c0_59, %c0_60] : memref<12x3xf32, #tpu.memory_space<vmem>>, vector<12x3xf32>
    %cst_61 = arith.constant dense<0xFF800000> : vector<12xf32>
    %125 = vector.multi_reduction <maximumf>, %124, %cst_61 [1] : vector<12x3xf32> to vector<12xf32>
    %126 = vector.shape_cast %125 : vector<12xf32> to vector<12x1xf32>
    %127 = vector.broadcast %126 : vector<12x1xf32> to vector<12x3xf32>
    %128 = arith.subf %124, %127 : vector<12x3xf32>
    %cst_62 = arith.constant dense<0xFF800000> : vector<12xf32>
    %129 = vector.multi_reduction <maximumf>, %128, %cst_62 [1] : vector<12x3xf32> to vector<12xf32>
    %130 = vector.shape_cast %129 : vector<12xf32> to vector<12x1xf32>
    %cst_63 = arith.constant dense<0x7F800000> : vector<12xf32>
    %131 = vector.multi_reduction <minimumf>, %128, %cst_63 [1] : vector<12x3xf32> to vector<12xf32>
    %132 = vector.shape_cast %131 : vector<12xf32> to vector<12x1xf32>
    %cst_64 = arith.constant dense<0.000000e+00> : vector<12xf32>
    %133 = vector.multi_reduction <add>, %128, %cst_64 [1] : vector<12x3xf32> to vector<12xf32>
    %134 = vector.shape_cast %133 : vector<12xf32> to vector<12x1xf32>
    %135 = arith.subf %134, %130 : vector<12x1xf32>
    %136 = arith.subf %135, %132 : vector<12x1xf32>
    %cst_65 = arith.constant 2.000000e+00 : f32
    %137 = vector.broadcast %cst_65 : f32 to vector<12x1xf32>
    %138 = arith.mulf %137, %136 : vector<12x1xf32>
    %cst_66 = arith.constant 1.000000e+00 : f32
    %139 = vector.broadcast %cst_66 : f32 to vector<12x1xf32>
    %140 = arith.addf %139, %138 : vector<12x1xf32>
    %141 = arith.addf %130, %136 : vector<12x1xf32>
    %142 = arith.cmpf ogt, %140, %141 : vector<12x1xf32>
    %cst_67 = arith.constant 3.000000e+00 : f32
    %143 = vector.broadcast %cst_67 : f32 to vector<12x1xf32>
    %144 = arith.mulf %143, %132 : vector<12x1xf32>
    %cst_68 = arith.constant 1.000000e+00 : f32
    %145 = vector.broadcast %cst_68 : f32 to vector<12x1xf32>
    %146 = arith.addf %145, %144 : vector<12x1xf32>
    %147 = arith.addf %130, %136 : vector<12x1xf32>
    %148 = arith.addf %147, %132 : vector<12x1xf32>
    %149 = arith.cmpf ogt, %146, %148 : vector<12x1xf32>
    %cst_69 = arith.constant 2.000000e+00 : f32
    %cst_70 = arith.constant 1.000000e+00 : f32
    %150 = vector.broadcast %cst_69 : f32 to vector<12x1xf32>
    %151 = vector.broadcast %cst_70 : f32 to vector<12x1xf32>
    %152 = arith.select %142, %150, %151 : vector<12x1xi1>, vector<12x1xf32>
    %cst_71 = arith.constant 3.000000e+00 : f32
    %153 = vector.broadcast %cst_71 : f32 to vector<12x1xf32>
    %154 = arith.select %149, %153, %152 : vector<12x1xi1>, vector<12x1xf32>
    %cst_72 = arith.constant 0.000000e+00 : f32
    %155 = vector.broadcast %cst_72 : f32 to vector<12x1xf32>
    %156 = arith.select %142, %136, %155 : vector<12x1xi1>, vector<12x1xf32>
    %157 = arith.addf %130, %156 : vector<12x1xf32>
    %cst_73 = arith.constant 0.000000e+00 : f32
    %158 = vector.broadcast %cst_73 : f32 to vector<12x1xf32>
    %159 = arith.select %149, %132, %158 : vector<12x1xi1>, vector<12x1xf32>
    %160 = arith.addf %157, %159 : vector<12x1xf32>
    %cst_74 = arith.constant 1.000000e+00 : f32
    %161 = vector.broadcast %cst_74 : f32 to vector<12x1xf32>
    %162 = arith.subf %160, %161 : vector<12x1xf32>
    %163 = arith.divf %162, %154 : vector<12x1xf32>
    %164 = vector.broadcast %163 : vector<12x1xf32> to vector<12x3xf32>
    %165 = arith.subf %128, %164 : vector<12x3xf32>
    %cst_75 = arith.constant 0.000000e+00 : f32
    %166 = vector.broadcast %cst_75 : f32 to vector<12x3xf32>
    %167 = arith.maximumf %165, %166 : vector<12x3xf32>
    %c0_76 = arith.constant 0 : index
    %c0_77 = arith.constant 0 : index
    %168 = vector.load %arg6[%c0_76, %c0_77] : memref<12x16xf32, #tpu.memory_space<vmem>>, vector<12x16xf32>
    %c0_78 = arith.constant 0 : index
    %c0_79 = arith.constant 0 : index
    %169 = vector.load %arg8[%c0_78, %c0_79] : memref<6x240xf32, #tpu.memory_space<vmem>>, vector<6x240xf32>
    %c2 = arith.constant 2 : index
    %c0_80 = arith.constant 0 : index
    %170 = vector.load %arg11[%c2, %c0_80] : memref<8x240xf32, #tpu.memory_space<vmem>>, vector<1x240xf32>
    %c6 = arith.constant 6 : index
    %c0_81 = arith.constant 0 : index
    %171 = vector.load %arg11[%c6, %c0_81] : memref<8x240xf32, #tpu.memory_space<vmem>>, vector<1x240xf32>
    %c2_82 = arith.constant 2 : index
    %172 = memref.load %arg12[%c2_82] : memref<4xf32, #tpu.memory_space<smem>>
    %c0_83 = arith.constant 0 : index
    %c0_84 = arith.constant 0 : index
    %173 = vector.load %arg7[%c0_83, %c0_84] : memref<8x8xf32, #tpu.memory_space<vmem>>, vector<8x8xf32>
    %c0_85 = arith.constant 0 : index
    %c0_86 = arith.constant 0 : index
    %174 = vector.load %arg9[%c0_85, %c0_86] : memref<8x240xf32, #tpu.memory_space<vmem>>, vector<8x240xf32>
    %c3 = arith.constant 3 : index
    %c0_87 = arith.constant 0 : index
    %175 = vector.load %arg11[%c3, %c0_87] : memref<8x240xf32, #tpu.memory_space<vmem>>, vector<1x240xf32>
    %c7 = arith.constant 7 : index
    %c0_88 = arith.constant 0 : index
    %176 = vector.load %arg11[%c7, %c0_88] : memref<8x240xf32, #tpu.memory_space<vmem>>, vector<1x240xf32>
    %c3_89 = arith.constant 3 : index
    %177 = memref.load %arg12[%c3_89] : memref<4xf32, #tpu.memory_space<smem>>
    %178 = tpu.iota {dimensions = array<i32: 0>} : vector<6x3xi32>
    %179 = arith.sitofp %178 : vector<6x3xi32> to vector<6x3xf32>
    %180 = tpu.iota {dimensions = array<i32: 1>} : vector<6x3xi32>
    %181 = arith.sitofp %180 : vector<6x3xi32> to vector<6x3xf32>
    %cst_90 = arith.constant 5.000000e-01 : f32
    %182 = vector.broadcast %cst_90 : f32 to vector<6x3xf32>
    %183 = arith.addf %179, %182 : vector<6x3xf32>
    %cst_91 = arith.constant 5.000000e-01 : f32
    %184 = vector.broadcast %cst_91 : f32 to vector<6x3xf32>
    %185 = arith.mulf %183, %184 : vector<6x3xf32>
    %186 = math.floor %185 : vector<6x3xf32>
    %cst_92 = arith.constant 2.000000e+00 : f32
    %187 = vector.broadcast %cst_92 : f32 to vector<6x3xf32>
    %188 = arith.mulf %186, %187 : vector<6x3xf32>
    %189 = arith.subf %179, %188 : vector<6x3xf32>
    %190 = arith.cmpf olt, %189, %186 : vector<6x3xf32>
    %cst_93 = arith.constant 1.000000e+00 : f32
    %191 = vector.broadcast %cst_93 : f32 to vector<6x3xf32>
    %192 = arith.addf %189, %191 : vector<6x3xf32>
    %193 = arith.select %190, %189, %192 : vector<6x3xi1>, vector<6x3xf32>
    %194 = arith.subf %181, %186 : vector<6x3xf32>
    %195 = math.absf %194 : vector<6x3xf32>
    %cst_94 = arith.constant 5.000000e-01 : f32
    %196 = vector.broadcast %cst_94 : f32 to vector<6x3xf32>
    %197 = arith.cmpf olt, %195, %196 : vector<6x3xf32>
    %cst_95 = arith.constant 1.000000e+00 : f32
    %cst_96 = arith.constant 0.000000e+00 : f32
    %198 = vector.broadcast %cst_95 : f32 to vector<6x3xf32>
    %199 = vector.broadcast %cst_96 : f32 to vector<6x3xf32>
    %200 = arith.select %197, %198, %199 : vector<6x3xi1>, vector<6x3xf32>
    %201 = arith.subf %181, %193 : vector<6x3xf32>
    %202 = math.absf %201 : vector<6x3xf32>
    %cst_97 = arith.constant 5.000000e-01 : f32
    %203 = vector.broadcast %cst_97 : f32 to vector<6x3xf32>
    %204 = arith.cmpf olt, %202, %203 : vector<6x3xf32>
    %cst_98 = arith.constant 1.000000e+00 : f32
    %cst_99 = arith.constant 0.000000e+00 : f32
    %205 = vector.broadcast %cst_98 : f32 to vector<6x3xf32>
    %206 = vector.broadcast %cst_99 : f32 to vector<6x3xf32>
    %207 = arith.select %204, %205, %206 : vector<6x3xi1>, vector<6x3xf32>
    %cst_100 = arith.constant dense<0.000000e+00> : vector<3x16xf32>
    %208 = tpu.matmul %167, %168, %cst_100 {dimension_numbers = #tpu.dot_dimension_numbers<[0], [0], [1], [1], [0, 1, 1, 1], [], []>} : vector<12x3xf32>, vector<12x16xf32>, vector<3x16xf32> -> vector<3x16xf32>
    %cst_101 = arith.constant dense<0.000000e+00> : vector<6x16xf32>
    %209 = tpu.matmul %200, %208, %cst_101 {dimension_numbers = #tpu.dot_dimension_numbers<[1], [0], [0], [1], [0, 0, 1, 1], [], []>} : vector<6x3xf32>, vector<3x16xf32>, vector<6x16xf32> -> vector<6x16xf32>
    %cst_102 = arith.constant dense<0.000000e+00> : vector<6x16xf32>
    %210 = tpu.matmul %207, %208, %cst_102 {dimension_numbers = #tpu.dot_dimension_numbers<[1], [0], [0], [1], [0, 0, 1, 1], [], []>} : vector<6x3xf32>, vector<3x16xf32>, vector<6x16xf32> -> vector<6x16xf32>
    %cst_103 = arith.constant dense<0.000000e+00> : vector<6x8xf32>
    %211 = tpu.matmul %209, %1, %cst_103 {dimension_numbers = #tpu.dot_dimension_numbers<[1], [0], [0], [1], [0, 0, 1, 1], [], []>} : vector<6x16xf32>, vector<16x8xf32>, vector<6x8xf32> -> vector<6x8xf32>
    %cst_104 = arith.constant dense<0.000000e+00> : vector<6x8xf32>
    %212 = tpu.matmul %210, %2, %cst_104 {dimension_numbers = #tpu.dot_dimension_numbers<[1], [0], [0], [1], [0, 0, 1, 1], [], []>} : vector<6x16xf32>, vector<16x8xf32>, vector<6x8xf32> -> vector<6x8xf32>
    %213 = arith.addf %211, %212 : vector<6x8xf32>
    %214 = vector.broadcast %3 : vector<1x8xf32> to vector<6x8xf32>
    %215 = arith.addf %213, %214 : vector<6x8xf32>
    %cst_105 = arith.constant 0.000000e+00 : f32
    %216 = vector.broadcast %cst_105 : f32 to vector<6x8xf32>
    %217 = arith.maximumf %215, %216 : vector<6x8xf32>
    %cst_106 = arith.constant dense<0.000000e+00> : vector<8x240xf32>
    %218 = tpu.matmul %217, %169, %cst_106 {dimension_numbers = #tpu.dot_dimension_numbers<[0], [0], [1], [1], [0, 1, 1, 1], [], []>} : vector<6x8xf32>, vector<6x240xf32>, vector<8x240xf32> -> vector<8x240xf32>
    %219 = vector.broadcast %170 : vector<1x240xf32> to vector<8x240xf32>
    %220 = arith.addf %218, %219 : vector<8x240xf32>
    %cst_107 = arith.constant 0.000000e+00 : f32
    %221 = vector.broadcast %cst_107 : f32 to vector<8x240xf32>
    %222 = arith.maximumf %220, %221 : vector<8x240xf32>
    %cst_108 = arith.constant dense<0.000000e+00> : vector<8xf32>
    %223 = vector.multi_reduction <add>, %222, %cst_108 [1] : vector<8x240xf32> to vector<8xf32>
    %224 = vector.shape_cast %223 : vector<8xf32> to vector<8x1xf32>
    %225 = vector.broadcast %171 : vector<1x240xf32> to vector<8x240xf32>
    %226 = arith.mulf %222, %225 : vector<8x240xf32>
    %cst_109 = arith.constant dense<0.000000e+00> : vector<8xf32>
    %227 = vector.multi_reduction <add>, %226, %cst_109 [1] : vector<8x240xf32> to vector<8xf32>
    %228 = vector.shape_cast %227 : vector<8xf32> to vector<8x1xf32>
    %229 = vector.broadcast %172 : f32 to vector<8x1xf32>
    %230 = arith.addf %228, %229 : vector<8x1xf32>
    %231 = arith.negf %230 : vector<8x1xf32>
    %232 = math.exp %231 : vector<8x1xf32>
    %cst_110 = arith.constant 1.000000e+00 : f32
    %233 = vector.broadcast %cst_110 : f32 to vector<8x1xf32>
    %234 = arith.addf %233, %232 : vector<8x1xf32>
    %235 = arith.divf %233, %234 : vector<8x1xf32>
    %cst_111 = arith.constant 1.000000e+00 : f32
    %236 = vector.broadcast %cst_111 : f32 to vector<8x1xf32>
    %237 = arith.addf %236, %235 : vector<8x1xf32>
    %238 = arith.mulf %237, %224 : vector<8x1xf32>
    %cst_112 = arith.constant 1.250000e-01 : f32
    %239 = vector.broadcast %cst_112 : f32 to vector<8x1xf32>
    %240 = arith.mulf %238, %239 : vector<8x1xf32>
    %cst_113 = arith.constant dense<0.000000e+00> : vector<8x240xf32>
    %241 = tpu.matmul %173, %174, %cst_113 {dimension_numbers = #tpu.dot_dimension_numbers<[0], [0], [1], [1], [0, 1, 1, 1], [], []>} : vector<8x8xf32>, vector<8x240xf32>, vector<8x240xf32> -> vector<8x240xf32>
    %242 = vector.broadcast %175 : vector<1x240xf32> to vector<8x240xf32>
    %243 = arith.addf %241, %242 : vector<8x240xf32>
    %cst_114 = arith.constant 0.000000e+00 : f32
    %244 = vector.broadcast %cst_114 : f32 to vector<8x240xf32>
    %245 = arith.maximumf %243, %244 : vector<8x240xf32>
    %cst_115 = arith.constant dense<0.000000e+00> : vector<8xf32>
    %246 = vector.multi_reduction <add>, %245, %cst_115 [1] : vector<8x240xf32> to vector<8xf32>
    %247 = vector.shape_cast %246 : vector<8xf32> to vector<8x1xf32>
    %248 = vector.broadcast %176 : vector<1x240xf32> to vector<8x240xf32>
    %249 = arith.mulf %245, %248 : vector<8x240xf32>
    %cst_116 = arith.constant dense<0.000000e+00> : vector<8xf32>
    %250 = vector.multi_reduction <add>, %249, %cst_116 [1] : vector<8x240xf32> to vector<8xf32>
    %251 = vector.shape_cast %250 : vector<8xf32> to vector<8x1xf32>
    %252 = vector.broadcast %177 : f32 to vector<8x1xf32>
    %253 = arith.addf %251, %252 : vector<8x1xf32>
    %254 = arith.negf %253 : vector<8x1xf32>
    %255 = math.exp %254 : vector<8x1xf32>
    %cst_117 = arith.constant 1.000000e+00 : f32
    %256 = vector.broadcast %cst_117 : f32 to vector<8x1xf32>
    %257 = arith.addf %256, %255 : vector<8x1xf32>
    %258 = arith.divf %256, %257 : vector<8x1xf32>
    %cst_118 = arith.constant 1.000000e+00 : f32
    %259 = vector.broadcast %cst_118 : f32 to vector<8x1xf32>
    %260 = arith.addf %259, %258 : vector<8x1xf32>
    %261 = arith.mulf %260, %247 : vector<8x1xf32>
    %cst_119 = arith.constant 1.250000e-01 : f32
    %262 = vector.broadcast %cst_119 : f32 to vector<8x1xf32>
    %263 = arith.mulf %261, %262 : vector<8x1xf32>
    %264 = tpu.concatenate %123, %263, %100, %240 in 1 : vector<8x1xf32>, vector<8x1xf32>, vector<8x1xf32>, vector<8x1xf32> -> vector<8x4xf32>
    %265 = tpu.iota {dimensions = array<i32: 0>} : vector<8x8xi32>
    %266 = tpu.iota {dimensions = array<i32: 1>} : vector<8x8xi32>
    %267 = arith.cmpi eq, %265, %266 : vector<8x8xi32>
    %cst_120 = arith.constant 1.000000e+00 : f32
    %cst_121 = arith.constant 0.000000e+00 : f32
    %268 = vector.broadcast %cst_120 : f32 to vector<8x8xf32>
    %269 = vector.broadcast %cst_121 : f32 to vector<8x8xf32>
    %270 = arith.select %267, %268, %269 : vector<8x8xi1>, vector<8x8xf32>
    %cst_122 = arith.constant dense<0.000000e+00> : vector<4x8xf32>
    %271 = tpu.matmul %264, %270, %cst_122 {dimension_numbers = #tpu.dot_dimension_numbers<[0], [0], [1], [1], [0, 1, 1, 1], [], []>} : vector<8x4xf32>, vector<8x8xf32>, vector<4x8xf32> -> vector<4x8xf32>
    %c0_123 = arith.constant 0 : index
    %c0_124 = arith.constant 0 : index
    %272 = vector.load %arg13[%c0_123, %c0_124] : memref<4x8xf32, #tpu.memory_space<vmem>>, vector<4x8xf32>
    tpu.vector_store %arg13[%c0_123, %c0_124], %271 {strides = array<i32>} : memref<4x8xf32, #tpu.memory_space<vmem>>, vector<4x8xf32>,
    return
  }
}

</mosaic_0001>

<bundles_post_ra>
// kernel: custom-call.31
= control target key start
LH: loop header
LB: loop body
LE: loop exit
PB: predicated region body
PF: predicated region fallthrough
CT: control target
= control target key end

     0   :  { %v395_v2 = vmov 0.0   ;;  %s418_s13 = smov 0   ;;  %s502_s0 = inlined_call_operand.vmem [shape: f32[12,3], index: 0, kind: input, shape index: {}]   ;;  %s503_s1 = inlined_call_operand.vmem [shape: f32[12,3], index: 1, kind: output, shape index: {0}]   ;;  %s504_s2 = inlined_call_operand.vmem [shape: f32[3], index: 2, kind: output, shape index: {1}]  }
   0x1   :  { %v33_v0 = vld [vmem:[%s502_s0] sm:$0xff]  ;;  %v35_v1 = vld [vmem:[%s502_s0 + $0x8] sm:$0xff]  ;;  %46 = vst [vmem:[#allocation2] sm:$0x1] %v395_v2 }
   0x2   :  { %41 = vst [vmem:[#allocation1] sm:$0xff] %v33_v0  ;;  %45 = vst [vmem:[#allocation1 + $0x8] sm:$0xff] %v35_v1 }
   0x3 LB: > { %v54_v3 = vlaneseq  ;;  %v427_v6 = vstv %s393_s13  ;;  %s91_s0 = scalar_lea.vmem [#allocation1], %s393_s13  ;;  %s127_s14 = smov [#allocation1]  ;;  %s393_s13 = sphi %s418_s13, %s52_s13  }
   0x4   : > { %s167_s15 = scalar_lea.vmem [#allocation4], %s393_s13  ;;  %s183_s16 = smov [#allocation1] }
   0x5   : > { %v424_v5 = vshrl.u32 %v54_v3, 7  ;;  %v453_v54 = vand.u32 127, %v54_v3  ;;  %s184_s17 = smov [#allocation4] }
   0x7   : > { %vm58_vm0 = vcmp.gt.s32.totalorder %v424_v5, %v427_v6  ;;  %v65_v7 = vadd.s32 8, %v424_v5  ;;  %v130_v5 = vmov %v424_v5  ;;  %vm457_vm14 = vcmp.eq.s32.totalorder %v453_v54, %v427_v6 }
   0x8   : > { %v149_v50 = vadd.s32 8, %v130_v5  ;;  %vm134_vm12 = vcmp.gt.s32.totalorder %v130_v5, %v427_v6  ;;  %v187_v5 = vmov %v424_v5 }
   0x9   : > { %v53_v4 = vld [vmem:[#allocation1] sm:$0xff]  ;;  %v62_v9 = vld [vmem:[#allocation1 + $0x8] sm:$0xff]  ;;  %vm67_vm1 = vcmp.gt.s32.totalorder %v65_v7, %v427_v6  ;;  %vm68_vm2 = vcmp.lt.s32.totalorder %v65_v7, 12  ;;  %v180_v7 = vld [vmem:[#allocation2] ss:$0 sm:$0xff] }
   0xa   : > { %v59_v8 = vsel %vm58_vm0, %v53_v4, 0.0  ;;  %vm69_vm3 = vmand %vm67_vm1, %vm68_vm2  ;;  %v92_v20 = vld [vmem:[%s91_s0] ss:$0 sm:$0xff]  ;;  %vm151_vm10 = vcmp.gt.s32.totalorder %v149_v50, %v427_v6  ;;  %vm152_vm11 = vcmp.lt.s32.totalorder %v149_v50, 12  ;;  %v361_v53 = vld [vmem:[%s127_s14 + $0x8] sm:$0xff]  ;;  %vm220_vm2 = vcmp.gt.s32.totalorder %v453_v54, %v427_v6 }
   0xb   : > { %v60_v10 = vmul.f32 %v59_v8, %v59_v8  ;;  %v70_v11 = vsel %vm69_vm3, %v62_v9, 0.0  ;;  %v93_v21 = vand.u32 2147483647, %v92_v20  ;;  %vm118_vm9 = vcmp.lt.f32.partialorder %v92_v20, 0.0  ;;  %v131_v52 = vld [vmem:[%s127_s14] sm:$0xff]  ;;  %vm153_vm13 = vmand %vm151_vm10, %vm152_vm11 }
   0xc   : > { %v71_v12 = vmul.f32 %v70_v11, %v70_v11  ;;  %v135_v56 = vsel %vm134_vm12, %v131_v52, 0.0  ;;  %v154_v57 = vsel %vm153_vm13, %v361_v53, 0.0 }
   0xd   : > { %v94_v26 = vmax.f32 %v93_v21, 0.0 }
   0xe   : > { %v72_v13 = vadd.f32 %v71_v12, %v60_v10  ;;  %v396_v12 = vmov 1.0  }
  0x10   : > { %v73_v14 = vrot.slane %v72_v13, 4 }
  0x12   : > { %v74_v15 = vadd.f32 %v73_v14, %v72_v13  ;;  %v192_v13 = vadd.s32 8, %v187_v5  ;;  %v190_v14 = vld [vmem:[%s183_s16] sm:$0xff]  ;;  %v211_v5 = vmov %v424_v5 }
  0x13   : > { %vm228_vm0 = vcmp.ge.s32.totalorder %v211_v5, %v427_v6 }
  0x14   : > { %v75_v16 = vrot.slane %v74_v15, 2  ;;  %vm198_vm15 = vcmp.lt.s32.totalorder %v192_v13, 12  ;;  %vm229_vm3 = vmand %vm457_vm14, %vm228_vm0 }
  0x16   : > { %v76_v17 = vadd.f32 %v75_v16, %v74_v15  ;;  %v363_v15 = vld [vmem:[%s183_s16 + $0x8] sm:$0xff]  ;;  %s207_s16 = smov %s183_s16 }
  0x17   : > { %s253_s18 = scalar_lea.vmem %s207_s16, %s393_s13  ;;  %s52_s13 = sadd.s32 1, %s393_s13  }
  0x18   : > { %v77_v18 = vrot.slane %v76_v17, 1  ;;  %p49_p0 = scmp.ge.s32.totalorder %s52_s13, 3  }
  0x1a   : > { %v433_v19 = vadd.f32 %v77_v18, %v76_v17 }
  0x1c   : > { %377 = vrsqrt.f32 %v433_v19  ;;  %vm81_vm4 = vcmp.eq.f32.partialorder %v433_v19, inf  ;;  %v84_v23 = vand.u32 2147483648, %v433_v19  ;;  %vm83_vm5 = vcmp.eq.f32.partialorder %v433_v19, 0.0 }
  0x26   : > { %v378_v22 = vpop.eup %377 }
  0x27   : > { %v80_v24 = vmul.f32 %v378_v22, %v433_v19 }
  0x29   : > { %v82_v25 = vsel %vm81_vm4, %v433_v19, %v80_v24 }
  0x2a   : > { %v85_v27 = vsel %vm83_vm5, %v84_v23, %v82_v25 }
  0x2b   : > { %v95_v28 = vand.u32 2147483647, %v85_v27  ;;  %v232_v27 = vadd.s32 8, %v211_v5 }
  0x2d   : > { %v96_v29 = vmax.f32 %v94_v26, %v95_v28  ;;  %vm249_vm1 = vcmp.ge.s32.totalorder %v232_v27, %v427_v6 }
  0x2e   : > { %vm250_vm4 = vmand %vm457_vm14, %vm249_vm1 }
  0x2f   : > { %379 = vrcp.f32 %v96_v29  ;;  %vm108_vm8 = vcmp.eq.f32.partialorder %v96_v29, 0.0 }
  0x39   : > { %v380_v30 = vpop.eup %379 }
  0x3a   : > { %v98_v31 = vmul.f32 %v380_v30, %v93_v21  ;;  %v101_v32 = vmul.f32 0.0, %v380_v30  ;;  %v105_v33 = vmul.f32 %v380_v30, %v95_v28 }
  0x3c   : > { %v99_v34 = vmul.f32 %v98_v31, %v98_v31  ;;  %v102_v35 = vmul.f32 %v101_v32, %v101_v32  ;;  %v106_v36 = vmul.f32 %v105_v33, %v105_v33  ;;  %v365_v33 = vld [vmem:[%s207_s16 + $0x8] sm:$0xff] }
  0x3e   : > { %v103_v37 = vadd.f32 %v102_v35, %v99_v34 }
  0x40   : > { %v107_v38 = vadd.f32 %v106_v36, %v103_v37 }
  0x42   : > { %381 = vrsqrt.f32 %v107_v38  ;;  %vm111_vm6 = vcmp.eq.f32.partialorder %v107_v38, inf  ;;  %v114_v40 = vand.u32 2147483648, %v107_v38  ;;  %vm113_vm7 = vcmp.eq.f32.partialorder %v107_v38, 0.0 }
  0x4c   : > { %v382_v39 = vpop.eup %381 }
  0x4d   : > { %v110_v41 = vmul.f32 %v382_v39, %v107_v38 }
  0x4f   : > { %v112_v42 = vsel %vm111_vm6, %v107_v38, %v110_v41 }
  0x50   : > { %v115_v43 = vsel %vm113_vm7, %v114_v40, %v112_v42 }
  0x51   : > { %v116_v44 = vmul.f32 %v115_v43, %v96_v29  ;;  %v218_v29 = vld [vmem:[%s207_s16] sm:$0xff] }
  0x53   : > { %v117_v45 = vsel %vm108_vm8, 0.0, %v116_v44 }
  0x54   : > { %v119_v46 = vxor.u32 2147483648, %v117_v45 }
  0x56   : > { %v120_v47 = vsel %vm118_vm9, %v117_v45, %v119_v46 }
  0x57   : > { %v447_v48 = vsel %vm83_vm5, %v92_v20, %v120_v47  ;;  %383 = vrcp.f32 %v120_v47  ;;  %v121_v51 = vsub.f32 %v120_v47, %v92_v20 }
  0x58   : > { %v126_v49 = vsub.f32 %v92_v20, %v447_v48 }
  0x5a   : > { %385 = vrcp.f32 %v126_v49 }
  0x61   : > { %v384_v55 = vpop.eup %383 }
  0x62   : > { %v123_v58 = vmul.f32 %v384_v55, %v121_v51 }
  0x64   : > { %v386_v59 = vpop.eup %385  ;;  %v125_v61 = vsel %vm83_vm5, 0.0, %v123_v58 }
  0x65   : > { %v137_v62 = vmul.f32 %v386_v59, %v135_v56  ;;  %v156_v63 = vmul.f32 %v386_v59, %v154_v57  ;;  %v173_v0 = vsel %vm457_vm14, %v125_v61, 0.0 }
  0x66   : > { %174 = vadd.xlane.f32.xlu1 %v173_v0 }
  0x67   : > { %v138_v1 = vsel %vm83_vm5, 0.0, %v137_v62  ;;  %v157_v2 = vsel %vm83_vm5, 0.0, %v156_v63 }
  0x68   : > { %v143_v3 = vsel %vm457_vm14, %v138_v1, 0.0  ;;  %v162_v4 = vsel %vm457_vm14, %v157_v2, 0.0 }
  0x69   : > { %144 = vadd.xlane.f32.xlu0 %v143_v3 }
  0x6d   : > { %163 = vadd.xlane.f32.xlu0 %v162_v4 }
  0xf3   : > { %v175_v8 = vpop.xlane.xlu1 %174 }
  0xf4   : > { %v181_v9 = vsel %vm457_vm14, %v175_v8, %v180_v7 }
  0xf5   : > { %182 = vst [vmem:[#allocation2] sm:$0x1] %v181_v9 }
  0xf6   : > { %v145_v10 = vpop.xlane.xlu0 %144 }
  0xf7   : > { %146 = vst [vmem:[#allocation4] sm:$0xff] %v145_v10 }
  0xfa   : > { %v164_v11 = vpop.xlane.xlu0 %163 }
  0xfb   : > { %166 = vst [vmem:[#allocation4 + $0x8] sm:$0xff] %v164_v11 }
  0xfc   : > { %168 = vst [vmem:[%s167_s15] sm:$0x1] %v396_v12  ;;  %v264_v42 = vld [vmem:[#allocation2] sm:$0x1] (%p49_p0) }
  0xfd   :  { %266 = vst [vmem:[#allocation3] sm:$0x1] (%p49_p0), %v264_v42 }
 0x103   : > { %v189_v16 = vld [vmem:[%s184_s17] sm:$0xff]  ;;  %v362_v17 = vld [vmem:[%s184_s17 + $0x8] sm:$0xff]  ;;  %s208_s17 = smov %s184_s17 }
 0x104   : > { %v191_v18 = vmul.f32 %v190_v14, %v189_v16  ;;  %v197_v19 = vmul.f32 %v363_v15, %v362_v17  ;;  %v216_v31 = vld [vmem:[%s208_s17] sm:$0xff]  ;;  %v364_v32 = vld [vmem:[%s208_s17 + $0x8] sm:$0xff]  ;;  %v320_v45 = vld [vmem:[#allocation3] sm:$0x1] (%p49_p0) }
 0x105   :  { %321 = vst [vmem:[%s504_s2] sm:$0x1] (%p49_p0), %v320_v45 }
 0x106   : > { %v199_v20 = vsel %vm198_vm15, %v197_v19, 0.0 }
 0x107   : > { %v200_v21 = vadd.f32 %v199_v20, %v191_v18 }
 0x109   : > { %v201_v22 = vrot.slane %v200_v21, 4 }
 0x10b   : > { %v202_v23 = vadd.f32 %v201_v22, %v200_v21 }
 0x10d   : > { %v203_v24 = vrot.slane %v202_v23, 2 }
 0x10f   : > { %v204_v25 = vadd.f32 %v203_v24, %v202_v23 }
 0x111   : > { %v205_v26 = vrot.slane %v204_v25, 1 }
 0x113   : > { %v206_v28 = vadd.f32 %v205_v26, %v204_v25 }
 0x115   : > { %v212_v30 = vmul.f32 %v206_v28, %v175_v8 }
 0x117   : > { %v217_v34 = vmul.f32 %v216_v31, %v212_v30  ;;  %v237_v35 = vmul.f32 %v364_v32, %v212_v30 }
 0x119   : > { %v221_v36 = vsub.f32 %v218_v29, %v217_v34  ;;  %v242_v5 = vsub.f32 %v365_v33, %v237_v35 }
 0x11b   : > { %v222_v37 = vsel %vm220_vm2, %v221_v36, %v218_v29  ;;  %v243_v38 = vsel %vm220_vm2, %v242_v5, %v365_v33 }
 0x11c   : > { %v230_v39 = vsel %vm229_vm3, %v216_v31, %v222_v37  ;;  %v251_v40 = vsel %vm250_vm4, %v364_v32, %v243_v38 }
 0x11d   : > { %231 = vst [vmem:[%s207_s16] sm:$0xff] %v230_v39  ;;  %366 = vst [vmem:[%s207_s16 + $0x8] sm:$0xff] %v251_v40 }
 0x120   :  { %51 = sbr.rel (!%p49_p0) target bundleno = 3 (0x3), region = 148 }
 0x124   : > { %v254_v41 = vld [vmem:[%s253_s18] ss:$0 sm:$0xff] }
 0x125   : > { %v259_v6 = vsel %vm457_vm14, %v447_v48, %v254_v41 }
 0x126   : > { %260 = vst [vmem:[%s253_s18] sm:$0x1] %v259_v6 }
 0x12d   :  { %v296_v43 = vld [vmem:[#allocation1] sm:$0xff]  ;;  %v298_v44 = vld [vmem:[#allocation1 + $0x8] sm:$0xff] }
 0x12e   :  { %297 = vst [vmem:[%s503_s1] sm:$0xff] %v296_v43  ;;  %299 = vst [vmem:[%s503_s1 + $0x8] sm:$0xff] %v298_v44 }

// kernel: custom-call.72
= control target key start
LH: loop header
LB: loop body
LE: loop exit
PB: predicated region body
PF: predicated region fallthrough
CT: control target
= control target key end

     0   :  { %v321_v1 = vmov 0.0   ;;  %s341_s11 = smov 0   ;;  %s397_s0 = inlined_call_operand.vmem [shape: f32[6,3], index: 0, kind: input, shape index: {}]   ;;  %s398_s1 = inlined_call_operand.vmem [shape: f32[6,3], index: 1, kind: output, shape index: {0}]   ;;  %s399_s2 = inlined_call_operand.vmem [shape: f32[3], index: 2, kind: output, shape index: {1}]  }
   0x1   :  { %v31_v0 = vld [vmem:[%s397_s0] sm:$0xff]  ;;  %38 = vst [vmem:[#allocation2] sm:$0x1] %v321_v1 }
   0x2   :  { %37 = vst [vmem:[#allocation1] sm:$0xff] %v31_v0 }
   0x3 LB: > { %v46_v2 = vlaneseq  ;;  %v350_v4 = vstv %s319_s11  ;;  %s73_s0 = scalar_lea.vmem [#allocation1], %s319_s11  ;;  %s109_s12 = smov [#allocation1]  ;;  %v322_v58 = vmov 1.0   ;;  %s319_s11 = sphi %s341_s11, %s44_s11  }
   0x4   : > { %s131_s13 = scalar_lea.vmem [#allocation4], %s319_s11  ;;  %s147_s14 = smov [#allocation1] }
   0x5   : > { %v347_v3 = vshrl.u32 %v46_v2, 7  ;;  %v125_v47 = vand.u32 127, %v46_v2  ;;  %s148_s15 = smov [#allocation4] }
   0x7   : > { %vm50_vm0 = vcmp.gt.s32.totalorder %v347_v3, %v350_v4  ;;  %vm51_vm1 = vcmp.lt.s32.totalorder %v347_v3, 6  ;;  %v112_v3 = vmov %v347_v3  ;;  %vm365_vm12 = vcmp.eq.s32.totalorder %v125_v47, %v350_v4 }
   0x8   : > { %vm52_vm2 = vmand %vm50_vm0, %vm51_vm1  ;;  %vm116_vm9 = vcmp.gt.s32.totalorder %v112_v3, %v350_v4  ;;  %vm117_vm10 = vcmp.lt.s32.totalorder %v112_v3, 6  ;;  %v144_v59 = vld [vmem:[#allocation2] ss:$0 sm:$0xff]  ;;  %v151_v3 = vmov %v347_v3  ;;  %vm177_vm15 = vcmp.gt.s32.totalorder %v125_v47, %v350_v4 }
   0x9   : > { %v45_v5 = vld [vmem:[#allocation1] sm:$0xff]  ;;  %vm118_vm11 = vmand %vm116_vm9, %vm117_vm10  ;;  %vm156_vm13 = vcmp.lt.s32.totalorder %v151_v3, 6  ;;  %v168_v3 = vmov %v347_v3 }
   0xa   : > { %v53_v6 = vsel %vm52_vm2, %v45_v5, 0.0  ;;  %v74_v14 = vld [vmem:[%s73_s0] ss:$0 sm:$0xff]  ;;  %vm185_vm14 = vcmp.ge.s32.totalorder %v168_v3, %v350_v4 }
   0xb   : > { %v54_v7 = vmul.f32 %v53_v6, %v53_v6  ;;  %v75_v15 = vand.u32 2147483647, %v74_v14  ;;  %vm100_vm8 = vcmp.lt.f32.partialorder %v74_v14, 0.0  ;;  %v113_v44 = vld [vmem:[%s109_s12] sm:$0xff]  ;;  %vm186_vm0 = vmand %vm365_vm12, %vm185_vm14 }
   0xc   : > { %v119_v48 = vsel %vm118_vm11, %v113_v44, 0.0  ;;  %v154_v62 = vld [vmem:[%s147_s14] sm:$0xff]  ;;  %s164_s14 = smov %s147_s14 }
   0xd   : > { %v55_v8 = vrot.slane %v54_v7, 4  ;;  %v76_v20 = vmax.f32 %v75_v15, 0.0  ;;  %s189_s16 = scalar_lea.vmem %s164_s14, %s319_s11  ;;  %s44_s11 = sadd.s32 1, %s319_s11  }
   0xe   : > { %p41_p0 = scmp.ge.s32.totalorder %s44_s11, 3  }
   0xf   : > { %v56_v9 = vadd.f32 %v55_v8, %v54_v7 }
  0x11   : > { %v57_v10 = vrot.slane %v56_v9, 2 }
  0x13   : > { %v58_v11 = vadd.f32 %v57_v10, %v56_v9 }
  0x15   : > { %v59_v12 = vrot.slane %v58_v11, 1 }
  0x17   : > { %v60_v13 = vadd.f32 %v59_v12, %v58_v11  ;;  %v175_v12 = vld [vmem:[%s164_s14] sm:$0xff] }
  0x19   : > { %303 = vrsqrt.f32 %v60_v13  ;;  %vm63_vm3 = vcmp.eq.f32.partialorder %v60_v13, inf  ;;  %v66_v17 = vand.u32 2147483648, %v60_v13  ;;  %vm65_vm4 = vcmp.eq.f32.partialorder %v60_v13, 0.0 }
  0x23   : > { %v304_v16 = vpop.eup %303 }
  0x24   : > { %v62_v18 = vmul.f32 %v304_v16, %v60_v13 }
  0x26   : > { %v64_v19 = vsel %vm63_vm3, %v60_v13, %v62_v18 }
  0x27   : > { %v67_v21 = vsel %vm65_vm4, %v66_v17, %v64_v19 }
  0x28   : > { %v77_v22 = vand.u32 2147483647, %v67_v21 }
  0x2a   : > { %v78_v23 = vmax.f32 %v76_v20, %v77_v22 }
  0x2c   : > { %305 = vrcp.f32 %v78_v23  ;;  %vm90_vm7 = vcmp.eq.f32.partialorder %v78_v23, 0.0 }
  0x36   : > { %v306_v24 = vpop.eup %305 }
  0x37   : > { %v80_v25 = vmul.f32 %v306_v24, %v75_v15  ;;  %v83_v26 = vmul.f32 0.0, %v306_v24  ;;  %v87_v27 = vmul.f32 %v306_v24, %v77_v22 }
  0x39   : > { %v81_v28 = vmul.f32 %v80_v25, %v80_v25  ;;  %v84_v29 = vmul.f32 %v83_v26, %v83_v26  ;;  %v88_v30 = vmul.f32 %v87_v27, %v87_v27 }
  0x3b   : > { %v85_v31 = vadd.f32 %v84_v29, %v81_v28 }
  0x3d   : > { %v89_v32 = vadd.f32 %v88_v30, %v85_v31 }
  0x3f   : > { %307 = vrsqrt.f32 %v89_v32  ;;  %vm93_vm5 = vcmp.eq.f32.partialorder %v89_v32, inf  ;;  %v96_v34 = vand.u32 2147483648, %v89_v32  ;;  %vm95_vm6 = vcmp.eq.f32.partialorder %v89_v32, 0.0 }
  0x49   : > { %v308_v33 = vpop.eup %307 }
  0x4a   : > { %v92_v35 = vmul.f32 %v308_v33, %v89_v32 }
  0x4c   : > { %v94_v36 = vsel %vm93_vm5, %v89_v32, %v92_v35 }
  0x4d   : > { %v97_v37 = vsel %vm95_vm6, %v96_v34, %v94_v36 }
  0x4e   : > { %v98_v38 = vmul.f32 %v97_v37, %v78_v23 }
  0x50   : > { %v99_v39 = vsel %vm90_vm7, 0.0, %v98_v38 }
  0x51   : > { %v101_v40 = vxor.u32 2147483648, %v99_v39 }
  0x53   : > { %v102_v41 = vsel %vm100_vm8, %v99_v39, %v101_v40 }
  0x54   : > { %v358_v42 = vsel %vm65_vm4, %v74_v14, %v102_v41  ;;  %309 = vrcp.f32 %v102_v41  ;;  %v103_v45 = vsub.f32 %v102_v41, %v74_v14 }
  0x55   : > { %v108_v43 = vsub.f32 %v74_v14, %v358_v42 }
  0x57   : > { %311 = vrcp.f32 %v108_v43 }
  0x5e   : > { %v310_v46 = vpop.eup %309 }
  0x5f   : > { %v105_v49 = vmul.f32 %v310_v46, %v103_v45 }
  0x61   : > { %v312_v50 = vpop.eup %311  ;;  %v107_v54 = vsel %vm65_vm4, 0.0, %v105_v49 }
  0x62   : > { %v121_v51 = vmul.f32 %v312_v50, %v119_v48  ;;  %v137_v56 = vsel %vm365_vm12, %v107_v54, 0.0 }
  0x64   : > { %v122_v53 = vsel %vm65_vm4, 0.0, %v121_v51 }
  0x65   : > { %v127_v55 = vsel %vm365_vm12, %v122_v53, 0.0 }
  0x66   : > { %128 = vadd.xlane.f32.xlu0 %v127_v55 }
  0x6a   : > { %138 = vadd.xlane.f32.xlu0 %v137_v56 }
  0xf3   : > { %v129_v57 = vpop.xlane.xlu0 %128 }
  0xf4   : > { %130 = vst [vmem:[#allocation4] sm:$0xff] %v129_v57 }
  0xf5   : > { %132 = vst [vmem:[%s131_s13] sm:$0x1] %v322_v58 }
  0xf7   : > { %v139_v60 = vpop.xlane.xlu0 %138 }
  0xf8   : > { %v145_v61 = vsel %vm365_vm12, %v139_v60, %v144_v59 }
  0xf9   : > { %146 = vst [vmem:[#allocation2] sm:$0x1] %v145_v61 }
  0xfc   : > { %v153_v63 = vld [vmem:[%s148_s15] sm:$0xff]  ;;  %s165_s15 = smov %s148_s15 }
  0xfd   : > { %v155_v0 = vmul.f32 %v154_v62, %v153_v63  ;;  %v173_v11 = vld [vmem:[%s165_s15] sm:$0xff] }
  0xff   : > { %v157_v1 = vsel %vm156_vm13, %v155_v0, 0.0 }
 0x100   : > { %v158_v2 = vrot.slane %v157_v1, 4  ;;  %v200_v3 = vld [vmem:[#allocation2] sm:$0x1] (%p41_p0) }
 0x101   :  { %202 = vst [vmem:[#allocation3] sm:$0x1] (%p41_p0), %v200_v3 }
 0x102   : > { %v159_v5 = vadd.f32 %v158_v2, %v157_v1 }
 0x104   : > { %v160_v6 = vrot.slane %v159_v5, 2 }
 0x106   : > { %v161_v7 = vadd.f32 %v160_v6, %v159_v5 }
 0x108   : > { %v162_v8 = vrot.slane %v161_v7, 1  ;;  %v252_v19 = vld [vmem:[#allocation3] sm:$0x1] (%p41_p0) }
 0x109   :  { %253 = vst [vmem:[%s399_s2] sm:$0x1] (%p41_p0), %v252_v19 }
 0x10a   : > { %v163_v9 = vadd.f32 %v162_v8, %v161_v7 }
 0x10c   : > { %v169_v10 = vmul.f32 %v163_v9, %v139_v60 }
 0x10e   : > { %v174_v13 = vmul.f32 %v173_v11, %v169_v10 }
 0x110   : > { %v178_v14 = vsub.f32 %v175_v12, %v174_v13 }
 0x112   : > { %v179_v15 = vsel %vm177_vm15, %v178_v14, %v175_v12 }
 0x113   : > { %v187_v16 = vsel %vm186_vm0, %v173_v11, %v179_v15 }
 0x114   : > { %188 = vst [vmem:[%s164_s14] sm:$0xff] %v187_v16 }
 0x117   :  { %43 = sbr.rel (!%p41_p0) target bundleno = 3 (0x3), region = 139 }
 0x11b   : > { %v190_v17 = vld [vmem:[%s189_s16] ss:$0 sm:$0xff] }
 0x11c   : > { %v195_v18 = vsel %vm365_vm12, %v358_v42, %v190_v17 }
 0x11d   : > { %196 = vst [vmem:[%s189_s16] sm:$0x1] %v195_v18 }
 0x124   :  { %v230_v4 = vld [vmem:[#allocation1] sm:$0xff] }
 0x125   :  { %231 = vst [vmem:[%s398_s1] sm:$0xff] %v230_v4 }

// kernel: custom-call.73
= control target key start
LH: loop header
LB: loop body
LE: loop exit
PB: predicated region body
PF: predicated region fallthrough
CT: control target
= control target key end

     0   :  { %v68_v1 = vlaneseq  ;;  %vm82_vm1 = vcmask 23552   ;;  %s238_s0 = inlined_call_operand.vmem [shape: f32[3,3], index: 0, kind: input, shape index: {}]   ;;  %s239_s1 = inlined_call_operand.vmem [shape: f32[3,3], index: 1, kind: output, shape index: {}]  }
   0x1   :  { %v62_v0 = vld [vmem:[%s238_s0] sm:$0xf] }
   0x2   :  { %63 = vst [vmem:[#allocation1] sm:$0xf] %v62_v0  ;;  %v69_v3 = vand.u32 127, %v68_v1  ;;  %v71_v4 = vshrl.u32 %v68_v1, 7 }
   0x4   :  { %vm77_vm0 = vcmp.eq.s32.totalorder %v69_v3, 0  ;;  %vm73_vm2 = vcmp.eq.s32.totalorder %v69_v3, %v71_v4  ;;  %vm86_vm3 = vcmp.eq.s32.totalorder %v69_v3, 1  ;;  %vm97_vm4 = vcmp.eq.s32.totalorder %v69_v3, 2 }
   0x9   :  { %v66_v2 = vld [vmem:[#allocation1] sm:$0xf] }
   0xa   :  { %67 = vst [vmem:[#allocation0] sm:$0xf] %v66_v2 }
  0x11   :  { %v74_v5 = vld [vmem:[#allocation0] sm:$0xff] }
  0x12   :  { %v81_v6 = vld [vmem:[#allocation0 + $0x1] ss:$0 sm:$0xff]  ;;  %v78_v7 = vsel %vm77_vm0, %v74_v5, 1.0  ;;  %v92_v11 = vld [vmem:[#allocation0 + $0x2] ss:$0 sm:$0xff] }
  0x13   :  { %v83_v8 = vsel %vm82_vm1, %v81_v6, 0.0  ;;  %v79_v9 = vsel %vm73_vm2, %v78_v7, 0.0  ;;  %v94_v12 = vsel %vm82_vm1, %v92_v11, 0.0 }
  0x14   :  { %v87_v10 = vmul.f32 %v83_v8, %v79_v9 }
  0x16   :  { %88 = vadd.xlane.f32.xlu0 %v87_v10 }
  0xa3   :  { %v89_v13 = vpop.xlane.xlu0 %88 }
  0xa4   :  { %v90_v14 = vsel %vm86_vm3, %v89_v13, %v79_v9 }
  0xa5   :  { %v98_v15 = vmul.f32 %v94_v12, %v90_v14 }
  0xa7   :  { %99 = vadd.xlane.f32.xlu0 %v98_v15 }
 0x134   :  { %v100_v16 = vpop.xlane.xlu0 %99 }
 0x135   :  { %v101_v17 = vsel %vm97_vm4, %v100_v16, %v90_v14 }
 0x136   :  { %102 = vst [vmem:[#allocation2] sm:$0xff] %v101_v17 }
 0x13d   :  { %v106_v18 = vld [vmem:[#allocation2] sm:$0xf] }
 0x13e   :  { %108 = vst [vmem:[#allocation3] sm:$0xf] %v106_v18 }
 0x145   :  { %v169_v19 = vld [vmem:[#allocation3] sm:$0xf] }
 0x146   :  { %170 = vst [vmem:[%s239_s1] sm:$0xf] %v169_v19 }

// kernel: custom-call.70
= control target key start
LH: loop header
LB: loop body
LE: loop exit
PB: predicated region body
PF: predicated region fallthrough
CT: control target
= control target key end

     0   :  { %v152_v0 = vmov 0.0   ;;  %vm38_vm0 = vcmask 7168   ;;  %vm56_vm1 = vcmask 15368   ;;  %vm73_vm2 = vcmask 1047553   ;;  %s169_s0 = inlined_call_operand.vmem [shape: f32[3,3], index: 0, kind: input, shape index: {}]   ;;  %s170_s1 = inlined_call_operand.vmem [shape: f32[3,3], index: 1, kind: output, shape index: {}]  }
   0x1   :  { %37 = vst [vmem:[#allocation2] sm:$0xff] %v152_v0  ;;  %v17_v2 = vld [vmem:[%s169_s0] sm:$0xf]  ;;  %vm74_vm3 = vmand %vm56_vm1, %vm73_vm2  ;;  %vm78_vm4 = vcmask 23568   ;;  %vm95_vm5 = vcmask 1047554  }
   0x2   :  { %18 = vst [vmem:[#allocation1] sm:$0xf] %v17_v2  ;;  %vm96_vm6 = vmand %vm78_vm4, %vm95_vm5 }
   0x8   :  { %v39_v1 = vld [vmem:[#allocation2] ss:$0 sm:$0xff] }
   0x9   :  { %v41_v3 = vmul.f32 %v39_v1, %v39_v1  ;;  %v48_v4 = vmul.f32 0.0, %v39_v1  ;;  %v35_v5 = vld [vmem:[#allocation1] sm:$0xf] }
   0xa   :  { %36 = vst [vmem:[#allocation0] sm:$0xf] %v35_v5 }
   0xb   :  { %42 = vadd.xlane.f32.xlu0 %v41_v3 }
   0xf   :  { %49 = vadd.xlane.f32.xlu0 %v48_v4 }
  0x11   :  { %v40_v6 = vld [vmem:[#allocation0] ss:$0 sm:$0xff]  ;;  %v60_v18 = vld [vmem:[#allocation0 + $0x1] ss:$0 sm:$0xff]  ;;  %v82_v30 = vld [vmem:[#allocation0 + $0x2] ss:$0 sm:$0xff] }
  0x12   :  { %v46_v10 = vld [vmem:[#allocation0] sm:$0xff] }
  0x98   :  { %v43_v7 = vpop.xlane.xlu0 %42 }
  0x99   :  { %v44_v8 = vsub.f32 %v40_v6, %v43_v7 }
  0x9b   :  { %146 = vrsqrt.f32 %v44_v8 }
  0x9c   :  { %v50_v9 = vpop.xlane.xlu0 %49 }
  0x9d   :  { %v51_v11 = vsub.f32 %v46_v10, %v50_v9 }
  0xa5   :  { %v147_v12 = vpop.eup %146 }
  0xa6   :  { %v52_v13 = vmul.f32 %v147_v12, %v51_v11 }
  0xa8   :  { %v53_v14 = vsel %vm38_vm0, %v52_v13, 0.0 }
  0xa9   :  { %55 = vst [vmem:[#allocation2] sm:$0xff] %v53_v14 }
  0xb0   :  { %v58_v15 = vld [vmem:[#allocation2 + $0x1] ss:$0 sm:$0xff] }
  0xb1   :  { %v61_v16 = vmul.f32 %v58_v15, %v58_v15  ;;  %v68_v17 = vmul.f32 %v58_v15, %v53_v14 }
  0xb3   :  { %62 = vadd.xlane.f32.xlu1 %v61_v16 }
  0xb7   :  { %69 = vadd.xlane.f32.xlu1 %v68_v17 }
 0x140   :  { %v63_v19 = vpop.xlane.xlu1 %62 }
 0x141   :  { %v64_v20 = vsub.f32 %v60_v18, %v63_v19 }
 0x143   :  { %148 = vrsqrt.f32 %v64_v20 }
 0x144   :  { %v70_v21 = vpop.xlane.xlu1 %69 }
 0x145   :  { %v71_v22 = vsub.f32 %v46_v10, %v70_v21 }
 0x14d   :  { %v149_v23 = vpop.eup %148 }
 0x14e   :  { %v72_v24 = vmul.f32 %v149_v23, %v71_v22 }
 0x150   :  { %v75_v25 = vsel %vm74_vm3, %v72_v24, 0.0 }
 0x151   :  { %v76_v26 = vadd.f32 %v75_v25, %v53_v14 }
 0x153   :  { %77 = vst [vmem:[#allocation2] sm:$0xff] %v76_v26 }
 0x15a   :  { %v80_v27 = vld [vmem:[#allocation2 + $0x2] ss:$0 sm:$0xff] }
 0x15b   :  { %v90_v28 = vmul.f32 %v80_v27, %v76_v26  ;;  %v83_v29 = vmul.f32 %v80_v27, %v80_v27 }
 0x15d   :  { %91 = vadd.xlane.f32.xlu1 %v90_v28  ;;  %84 = vadd.xlane.f32.xlu0 %v83_v29 }
 0x1ea   :  { %v85_v31 = vpop.xlane.xlu0 %84  ;;  %v92_v33 = vpop.xlane.xlu1 %91 }
 0x1eb   :  { %v86_v32 = vsub.f32 %v82_v30, %v85_v31  ;;  %v93_v34 = vsub.f32 %v46_v10, %v92_v33 }
 0x1ed   :  { %150 = vrsqrt.f32 %v86_v32 }
 0x1f7   :  { %v151_v35 = vpop.eup %150 }
 0x1f8   :  { %v94_v36 = vmul.f32 %v151_v35, %v93_v34 }
 0x1fa   :  { %v97_v37 = vsel %vm96_vm6, %v94_v36, 0.0 }
 0x1fb   :  { %v98_v38 = vadd.f32 %v97_v37, %v76_v26 }
 0x1fd   :  { %99 = vst [vmem:[#allocation2] sm:$0xff] %v98_v38 }
 0x204   :  { %v103_v39 = vld [vmem:[#allocation2] sm:$0xf] }
 0x205   :  { %105 = vst [vmem:[#allocation3] sm:$0xf] %v103_v39 }
 0x20c   :  { %v121_v40 = vld [vmem:[#allocation3] sm:$0xf] }
 0x20d   :  { %122 = vst [vmem:[%s170_s1] sm:$0xf] %v121_v40 }

// kernel: custom-call.71
= control target key start
LH: loop header
LB: loop body
LE: loop exit
PB: predicated region body
PF: predicated region fallthrough
CT: control target
= control target key end

     0   :  { %v37_v1 = vlaneseq  ;;  %v138_v11 = vmov -1.0   ;;  %s155_s0 = inlined_call_operand.vmem [shape: f32[1,3,3], index: 0, kind: input, shape index: {}]   ;;  %s156_s1 = inlined_call_operand.vmem [shape: f32[1,3,3], index: 1, kind: output, shape index: {}]  }
   0x1   :  { %v17_v0 = vld [vmem:[%s155_s0] sm:$0xf] }
   0x2   :  { %18 = vst [vmem:[#allocation1] sm:$0xf] %v17_v0  ;;  %v38_v3 = vand.u32 127, %v37_v1  ;;  %v41_v4 = vshrl.u32 %v37_v1, 7 }
   0x4   :  { %vm39_vm0 = vcmp.lt.s32.totalorder %v38_v3, 3  ;;  %vm48_vm1 = vcmp.ge.s32.totalorder %v41_v4, %v38_v3  ;;  %vm43_vm2 = vcmp.eq.s32.totalorder %v41_v4, %v38_v3  ;;  %vm62_vm4 = vcmp.eq.s32.totalorder %v38_v3, 0 }
   0x5   :  { %vm49_vm3 = vmand %vm48_vm1, %vm39_vm0  ;;  %vm59_vm5 = vcmp.eq.s32.totalorder %v38_v3, %v41_v4  ;;  %v63_v12 = vsel %vm62_vm4, 1.0, %v138_v11  ;;  %vm70_vm6 = vcmp.eq.s32.totalorder %v38_v3, 1  ;;  %vm80_vm7 = vcmp.eq.s32.totalorder %v38_v3, 2 }
   0x6   :  { %v64_v13 = vsel %vm59_vm5, %v63_v12, 0.0 }
   0x9   :  { %v35_v2 = vld [vmem:[#allocation1] sm:$0xf] }
   0xa   :  { %36 = vst [vmem:[#allocation0] sm:$0xf] %v35_v2 }
  0x11   :  { %v44_v5 = vld [vmem:[#allocation0] sm:$0xff] }
  0x12   :  { %v45_v6 = vsel %vm43_vm2, %v44_v5, 0.0  ;;  %v50_v7 = vsel %vm49_vm3, %v44_v5, 0.0 }
  0x13   :  { %46 = vadd.xlane.f32.xlu0 %v45_v6 }
  0xa0   :  { %v47_v8 = vpop.xlane.xlu0 %46 }
  0xa1   :  { %136 = vrcp.f32 %v47_v8  ;;  %vm87_vm8 = vweird.f32 %v47_v8 }
  0xab   :  { %v137_v9 = vpop.eup %136 }
  0xac   :  { %v52_v10 = vmul.f32 %v137_v9, %v50_v7 }
  0xae   :  { %53 = vst [vmem:[#allocation4] sm:$0xff] %v52_v10 }
  0xb5   :  { %v66_v14 = vld [vmem:[#allocation4 + $0x1] ss:$0 sm:$0xff]  ;;  %v76_v17 = vld [vmem:[#allocation4 + $0x2] ss:$0 sm:$0xff] }
  0xb6   :  { %v67_v15 = vxor.u32 2147483648, %v66_v14  ;;  %v77_v19 = vxor.u32 2147483648, %v76_v17 }
  0xb8   :  { %v71_v16 = vmul.f32 %v67_v15, %v64_v13 }
  0xba   :  { %72 = vadd.xlane.f32.xlu0 %v71_v16 }
 0x147   :  { %v73_v18 = vpop.xlane.xlu0 %72 }
 0x148   :  { %v74_v20 = vsel %vm70_vm6, %v73_v18, %v64_v13 }
 0x149   :  { %v81_v21 = vmul.f32 %v77_v19, %v74_v20 }
 0x14b   :  { %82 = vadd.xlane.f32.xlu1 %v81_v21 }
 0x1d8   :  { %v83_v22 = vpop.xlane.xlu1 %82 }
 0x1d9   :  { %v84_v23 = vsel %vm80_vm7, %v83_v22, %v74_v20 }
 0x1da   :  { %v86_v24 = vmul.f32 %v137_v9, %v84_v23 }
 0x1dc   :  { %v88_v25 = vsel %vm87_vm8, %v84_v23, %v86_v24 }
 0x1dd   :  { %89 = vst [vmem:[#allocation2] sm:$0xff] %v88_v25 }
 0x1e4   :  { %v93_v26 = vld [vmem:[#allocation2] sm:$0xf] }
 0x1e5   :  { %95 = vst [vmem:[#allocation3] sm:$0xf] %v93_v26 }
 0x1ec   :  { %v111_v27 = vld [vmem:[#allocation3] sm:$0xf] }
 0x1ed   :  { %112 = vst [vmem:[%s156_s1] sm:$0xf] %v111_v27 }

// kernel: reverse
= control target key start
LH: loop header
LB: loop body
LE: loop exit
PB: predicated region body
PF: predicated region fallthrough
CT: control target
= control target key end

     0   :  { %v2_v0 = vlaneseq  ;;  %s123_s0 = inlined_call_operand.vmem [shape: f32[3], index: 0, kind: input, shape index: {}]   ;;  %s124_s1 = inlined_call_operand.vmem [shape: f32[3], index: 1, kind: output, shape index: {}]  }
   0x2   :  { %v3_v1 = vsub.s32 2, %v2_v0 }
   0x4   :  { %4 = vset.pattern.permute.xlu0 %v3_v1 }
   0x5   :  { %v43_v2 = vld [vmem:[#allocation1] sm:$0x1]  ;;  %v21_v3 = vld [vmem:[%s123_s0] sm:$0x1]  ;;  %v58_v10 = vshrl.u32 %v2_v0, 7 }
   0x6   :  { %44 = vst [vmem:[#allocation0] sm:$0x1] %v43_v2  ;;  %22 = vst [vmem:[#allocation1 + $0x1] sm:$0x1] %v21_v3 }
   0x7   :  { %vm59_vm0 = vcmp.lt.s32.totalorder %v58_v10, 1 }
   0xd   :  { %v46_v4 = vld [vmem:[#allocation0 + $0x7] ss:$-1 sm:$0xff]  ;;  %v40_v5 = vld [vmem:[#allocation1 + $0x1] sm:$0x1] }
   0xe   :  { %v47_v6 = vrot.slane %v46_v4, 7  ;;  %42 = vst [vmem:[#allocation0 + $0x8] sm:$0x1] %v40_v5 }
  0x10   :  { %48 = vperm.xlu0 %4, %v47_v6  }
  0x15   :  { %v53_v7 = vld [vmem:[#allocation0 + $0xf] ss:$-1 sm:$0xff] }
  0x16   :  { %v54_v8 = vrot.slane %v53_v7, 7 }
  0x18   :  { %55 = vperm.xlu0 %4, %v54_v8  }
  0x8f   :  { %v49_v9 = vpop.permute.xlu0 %48 }
  0x90   :  { %50 = vst [vmem:[#allocation2] sm:$0xff] %v49_v9 }
  0x97   :  { %v56_v11 = vpop.permute.xlu0 %55 }
  0x98   :  { %60 = vst.msk [vmem:[#allocation2] sm:$0xff] %vm59_vm0, %v56_v11 }
  0x9f   :  { %v64_v12 = vld [vmem:[#allocation2] sm:$0x1] }
  0xa0   :  { %66 = vst [vmem:[#allocation3] sm:$0x1] %v64_v12 }
  0xa7   :  { %v82_v13 = vld [vmem:[#allocation3] sm:$0x1] }
  0xa8   :  { %83 = vst [vmem:[%s124_s1] sm:$0x1] %v82_v13 }

// kernel: custom-call.34
= control target key start
LH: loop header
LB: loop body
LE: loop exit
PB: predicated region body
PF: predicated region fallthrough
CT: control target
= control target key end

     0   :  { %v292_v3 = vlaneseq  ;;  %v1743_v5 = vmov 0.0   ;;  %s281_s17 = smov [#allocation22]  ;;  %s284_s18 = smov [#allocation23]  ;;  %s2025_s0 = inlined_call_operand.vmem [shape: f32[2,2], index: 0, kind: input, shape index: {}]   ;;  %s2026_s1 = inlined_call_operand.vmem [shape: f32[2,2], index: 1, kind: input, shape index: {}]   ;;  %s2027_s2 = inlined_call_operand.vmem [shape: f32[2,2], index: 2, kind: input, shape index: {}]   ;;  %s2028_s3 = inlined_call_operand.vmem [shape: f32[2,2], index: 3, kind: input, shape index: {}]   ;;  %s2029_s4 = inlined_call_operand.vmem [shape: f32[2], index: 4, kind: output, shape index: {0}]   ;;  %s2030_s5 = inlined_call_operand.vmem [shape: f32[2], index: 5, kind: output, shape index: {1}]   ;;  %s2031_s6 = inlined_call_operand.vmem [shape: f32[2,2], index: 6, kind: output, shape index: {2}]   ;;  %s2032_s7 = inlined_call_operand.vmem [shape: f32[2,2], index: 7, kind: output, shape index: {3}]   ;;  %s2033_s8 = inlined_call_operand.vmem [shape: f32[2,2], index: 8, kind: output, shape index: {4}]   ;;  %s2034_s9 = inlined_call_operand.vmem [shape: f32[2,2], index: 9, kind: output, shape index: {5}]  }
   0x1   :  { %v71_v0 = vld [vmem:[%s2025_s0] sm:$0x3]  ;;  %287 = vst [vmem:[#allocation12] sm:$0xff] %v1743_v5  ;;  %288 = vst [vmem:[#allocation14] sm:$0xff] %v1743_v5  ;;  %s291_s0 = smov [#allocation12]  ;;  %s1441_s19 = smov [#allocation20] }
   0x2   :  { %v133_v1 = vld [vmem:[%s2026_s1] sm:$0x3]  ;;  %72 = vst [vmem:[#allocation1] sm:$0x3] %v71_v0  ;;  %289 = vst [vmem:[#allocation16] sm:$0xff] %v1743_v5  ;;  %v1808_v6 = vand.u32 127, %v292_v3 }
   0x3   :  { %v195_v2 = vld [vmem:[%s2027_s2] sm:$0x3]  ;;  %134 = vst [vmem:[#allocation3] sm:$0x3] %v133_v1  ;;  %290 = vst [vmem:[#allocation18] sm:$0xff] %v1743_v5  ;;  %v1810_v7 = vshrl.u32 %v292_v3, 7 }
   0x4   :  { %196 = vst [vmem:[#allocation5] sm:$0x3] %v195_v2  ;;  %v257_v4 = vld [vmem:[%s2028_s3] sm:$0x3]  ;;  %v294_v6 = vmov %v1808_v6  ;;  %s304_s1 = smov [#allocation18]  ;;  %s275_s2 = smov [#allocation20] }
   0x5   :  { %258 = vst [vmem:[#allocation7] sm:$0x3] %v257_v4  ;;  %v297_v7 = vmov %v1810_v7  ;;  %v307_v6 = vmov %v1808_v6  ;;  %s278_s3 = smov [#allocation21]  ;;  %vm1445_vm2 = vcmp.lt.s32.totalorder %v1808_v6, 2  ;;  %s1458_s20 = smov [#allocation21] }
   0x6   :  { %v310_v7 = vmov %v1810_v7  ;;  %vm301_vm0 = vcmp.eq.s32.totalorder %v297_v7, %v294_v6  ;;  %s1475_s21 = smov [#allocation22]  ;;  %s1492_s22 = smov [#allocation23] }
   0x7   :  { %vm314_vm1 = vcmp.eq.s32.totalorder %v310_v7, %v307_v6  ;;  %v1437_v6 = vmov %v1808_v6  ;;  %v1440_v7 = vmov %v1810_v7 }
   0x8   :  { %v298_v12 = vld [vmem:[%s291_s0] sm:$0x3]  ;;  %vm1450_vm3 = vcmp.eq.s32.totalorder %v1440_v7, %v1437_v6  ;;  %v1488_v6 = vmov %v1808_v6  ;;  %v1457_v7 = vmov %v1810_v7 }
   0x9   :  { %v261_v8 = vld [vmem:[#allocation1] sm:$0x3]  ;;  %v302_v14 = vsel %vm301_vm0, 1.0, %v298_v12  ;;  %v1454_v6 = vmov %v1808_v6  ;;  %v1491_v7 = vmov %v1810_v7 }
   0xa   :  { %v265_v9 = vld [vmem:[#allocation3] sm:$0x3]  ;;  %262 = vst [vmem:[#allocation0] sm:$0x3] %v261_v8  ;;  %v311_v13 = vld [vmem:[%s304_s1] sm:$0x3]  ;;  %v1471_v6 = vmov %v1808_v6  ;;  %v1474_v7 = vmov %v1810_v7  ;;  %vm1501_vm4 = vcmp.eq.s32.totalorder %v1491_v7, %v1488_v6 }
   0xb   :  { %v269_v10 = vld [vmem:[#allocation5] sm:$0x3]  ;;  %266 = vst [vmem:[#allocation2] sm:$0x3] %v265_v9  ;;  %v315_v15 = vsel %vm314_vm1, 1.0, %v311_v13  ;;  %303 = vst [vmem:[%s291_s0] sm:$0x3] %v302_v14 }
   0xc   :  { %270 = vst [vmem:[#allocation4] sm:$0x3] %v269_v10  ;;  %v273_v11 = vld [vmem:[#allocation7] sm:$0x3]  ;;  %316 = vst [vmem:[%s304_s1] sm:$0x3] %v315_v15 }
   0xd   :  { %274 = vst [vmem:[#allocation6] sm:$0x3] %v273_v11 }
  0x11   :  { %v276_v16 = vld [vmem:[#allocation0] sm:$0xff] }
  0x12   :  { %v279_v17 = vld [vmem:[#allocation2] sm:$0xff]  ;;  %277 = vst [vmem:[%s275_s2] sm:$0xff] %v276_v16 }
  0x13   :  { %v282_v18 = vld [vmem:[#allocation4] sm:$0xff]  ;;  %280 = vst [vmem:[%s278_s3] sm:$0xff] %v279_v17 }
  0x14   :  { %283 = vst [vmem:[%s281_s17] sm:$0xff] %v282_v18  ;;  %v285_v19 = vld [vmem:[#allocation6] sm:$0xff] }
  0x15   :  { %286 = vst [vmem:[%s284_s18] sm:$0xff] %v285_v19 }
  0x19   :  { %v1447_v20 = vld [vmem:[%s1441_s19] sm:$0x3] }
  0x1a   :  { %v1464_v21 = vld [vmem:[%s1458_s20] sm:$0x3]  ;;  %v1448_v22 = vsel %vm1445_vm2, %v1447_v20, 0.0 }
  0x1b   :  { %v1465_v23 = vsel %vm1445_vm2, %v1464_v21, 0.0  ;;  %v1481_v24 = vld [vmem:[%s1475_s21] sm:$0x3]  ;;  %v1449_v26 = vmul.f32 %v1448_v22, %v1448_v22 }
  0x1c   :  { %v1498_v25 = vld [vmem:[%s1492_s22] sm:$0x3]  ;;  %v1466_v27 = vmul.f32 %v1465_v23, %v1465_v23  ;;  %v1482_v28 = vsel %vm1445_vm2, %v1481_v24, 0.0 }
  0x1d   :  { %v1499_v29 = vsel %vm1445_vm2, %v1498_v25, 0.0  ;;  %v1483_v30 = vmul.f32 %v1482_v28, %v1482_v28  ;;  %v1451_v33 = vsel %vm1450_vm3, 0.0, %v1449_v26 }
  0x1e   :  { %v1468_v31 = vadd.f32 %v1466_v27, %v1449_v26  ;;  %v1500_v32 = vmul.f32 %v1499_v29, %v1499_v29  ;;  %v1467_v34 = vadd.f32 %v1466_v27, %v1451_v33 }
  0x20   :  { %v1485_v35 = vadd.f32 %v1483_v30, %v1468_v31  ;;  %v1484_v36 = vadd.f32 %v1483_v30, %v1467_v34  ;;  %v1502_v37 = vsel %vm1501_vm4, 0.0, %v1500_v32 }
  0x22   :  { %v1504_v38 = vadd.f32 %v1500_v32, %v1485_v35  ;;  %v1503_v39 = vadd.f32 %v1502_v37, %v1484_v36 }
  0x24   :  { %1505 = vadd.xlane.f32.xlu0 %v1504_v38 }
  0x28   :  { %1513 = vadd.xlane.f32.xlu0 %v1503_v39 }
  0xb1   :  { %v1506_v40 = vpop.xlane.xlu0 %1505 }
  0xb2   :  { %v1507_v41 = vrot.slane %v1506_v40, 4 }
  0xb4   :  { %v1508_v42 = vadd.f32 %v1507_v41, %v1506_v40 }
  0xb5   :  { %v1514_v43 = vpop.xlane.xlu0 %1513 }
  0xb6   :  { %v1509_v44 = vrot.slane %v1508_v42, 2  ;;  %v1515_v45 = vrot.slane %v1514_v43, 4 }
  0xb8   :  { %v1516_v46 = vadd.f32 %v1515_v45, %v1514_v43  ;;  %v1510_v47 = vadd.f32 %v1509_v44, %v1508_v42 }
  0xba   :  { %v1517_v48 = vrot.slane %v1516_v46, 2  ;;  %v1511_v50 = vrot.slane %v1510_v47, 1 }
  0xbc   :  { %v1518_v49 = vadd.f32 %v1517_v48, %v1516_v46  ;;  %v1512_v53 = vadd.f32 %v1511_v50, %v1510_v47 }
  0xbe   :  { %v1519_v51 = vrot.slane %v1518_v49, 1 }
  0xc0   :  { %v1520_v52 = vadd.f32 %v1519_v51, %v1518_v49 }
  0xc2   :  { %1692 = vpush %v1520_v52 }
  0xc3   :  { %1694 = vpush %v1512_v53 }
  0xf3   :  { %s1693_s23 = spop %1692 }
  0xf4   :  { %s1695_s24 = spop %1694 }
  0xf5   :  { %s1523_s25 = smul.f32 1e-10, %s1695_s24 }
  0xf7   :  { %p1524_p0 = scmp.le.f32.partialorder %s1693_s23, %s1523_s25 }
  0xf8   :  { %s1834_s26 = smov (!%p1524_p0), 0  }
  0xf9   :  { %1527 = sbr.rel (%p1524_p0) target bundleno = 931 (0x3a3), region = 440 }
 0x100 LB: > { %s1839_s27 = smov 0   ;;  %s1737_s26 = sphi %s1834_s26, %s2035_s26  }
 0x101 LB: >> { %s421_s28 = smov [#allocation20]  ;;  %v425_v6 = vmov %v1808_v6  ;;  %v428_v7 = vmov %v1810_v7  ;;  %s441_s29 = smov [#allocation21]  ;;  %vm744_vm14 = vcmp.eq.s32.totalorder %v1810_v7, 0  ;;  %vm756_vm15 = vcmp.eq.s32.totalorder %v1810_v7, 1  ;;  %s1741_s27 = sphi %s1839_s27, %s420_s27  }
 0x102   : >> { %v445_v6 = vmov %v1808_v6  ;;  %v448_v7 = vmov %v1810_v7  ;;  %v429_v54 = vld [vmem:[%s421_s28] sm:$0x3]  ;;  %vm432_vm5 = vcmp.eq.s32.totalorder %v428_v7, %v425_v6  ;;  %s461_s30 = smov [#allocation23]  ;;  %s422_s10 = smov [#allocation24] }
 0x103   : >> { %vm452_vm6 = vcmp.eq.s32.totalorder %v448_v7, %v445_v6  ;;  %v465_v6 = vmov %v1808_v6  ;;  %v468_v7 = vmov %v1810_v7  ;;  %v433_v55 = vsel %vm432_vm5, %v429_v54, 0.0  ;;  %v449_v56 = vld [vmem:[%s441_s29] sm:$0x3]  ;;  %s442_s11 = smov [#allocation25]  ;;  %s462_s12 = smov [#allocation26] }
 0x104   : >> { %vm472_vm7 = vcmp.eq.s32.totalorder %v468_v7, %v465_v6  ;;  %v434_v57 = vrot.slane %v433_v55, 4  ;;  %v453_v58 = vsel %vm452_vm6, %v449_v56, 0.0  ;;  %v469_v59 = vld [vmem:[%s461_s30] sm:$0x3]  ;;  %s485_s13 = smov [#allocation25]  ;;  %s483_s14 = smov [#allocation24]  ;;  %v534_v6 = vmov %v1808_v6 }
 0x105   : >> { %v454_v60 = vrot.slane %v453_v58, 4  ;;  %v473_v61 = vsel %vm472_vm7, %v469_v59, 0.0  ;;  %s487_s15 = smov [#allocation26]  ;;  %s522_s16 = smov [#allocation27]  ;;  %v537_v7 = vmov %v1810_v7  ;;  %v549_v6 = vmov %v1808_v6 }
 0x106   : >> { %v435_v62 = vadd.f32 %v434_v57, %v433_v55  ;;  %v474_v63 = vrot.slane %v473_v61, 4  ;;  %s524_s0 = smov [#allocation28]  ;;  %s481_s1 = smov [#allocation29]  ;;  %v552_v7 = vmov %v1810_v7  ;;  %vm539_vm12 = vcmp.eq.s32.totalorder %v537_v7, %v534_v6 }
 0x107   : >> { %v455_v0 = vadd.f32 %v454_v60, %v453_v58  ;;  %s482_s2 = smov [#allocation30]  ;;  %s526_s1 = smov %s481_s1  ;;  %vm554_vm13 = vcmp.eq.s32.totalorder %v552_v7, %v549_v6  ;;  %v647_v6 = vmov %v1808_v6  ;;  %v650_v7 = vmov %v1810_v7 }
 0x108   : >> { %v436_v1 = vrot.slane %v435_v62, 2  ;;  %v475_v2 = vadd.f32 %v474_v63, %v473_v61  ;;  %s528_s2 = smov %s482_s2  ;;  %s530_s3 = smov [#allocation29]  ;;  %v661_v6 = vmov %v1808_v6  ;;  %v664_v7 = vmov %v1810_v7 }
 0x109   : >> { %v456_v3 = vrot.slane %v455_v0, 2  ;;  %s545_s17 = smov [#allocation30]  ;;  %s543_s18 = smov [#allocation31]  ;;  %vm654_vm0 = vcmp.eq.s32.totalorder %v650_v7, %v647_v6  ;;  %v620_v6 = vmov %v1808_v6  ;;  %v623_v7 = vmov %v1810_v7 }
 0x10a   : >> { %v437_v4 = vadd.f32 %v436_v1, %v435_v62  ;;  %v476_v5 = vrot.slane %v475_v2, 2  ;;  %s560_s19 = smov [#allocation31]  ;;  %s1854_s20 = smov [#allocation20]  ;;  %v634_v6 = vmov %v1808_v6  ;;  %v637_v7 = vmov %v1810_v7 }
 0x10b   : >> { %v457_v8 = vadd.f32 %v456_v3, %v455_v0  ;;  %s558_s21 = smov [#allocation32]  ;;  %s1856_s22 = smov [#allocation21]  ;;  %v568_v53 = vld [vmem:[%s1854_s20] sm:$0x3]  ;;  %vm669_vm1 = vcmp.eq.s32.totalorder %v664_v7, %v661_v6  ;;  %vm628_vm3 = vcmp.eq.s32.totalorder %v623_v7, %v620_v6  ;;  %vm641_vm4 = vcmp.eq.s32.totalorder %v637_v7, %v634_v6 }
 0x10c   : >> { %v438_v9 = vrot.slane %v437_v4, 1  ;;  %v477_v10 = vadd.f32 %v476_v5, %v475_v2  ;;  %s1858_s23 = smov [#allocation22]  ;;  %s1860_s24 = smov [#allocation23]  ;;  %v569_v54 = vld [vmem:[%s1856_s22] sm:$0x3]  ;;  %vm683_vm5 = vcmp.eq.s32.totalorder %v1808_v6, 0 }
 0x10d   : >> { %v458_v11 = vrot.slane %v457_v8, 1  ;;  %s1862_s25 = smov [#allocation12]  ;;  %s1864_s28 = smov [#allocation14]  ;;  %v570_v55 = vld [vmem:[%s1858_s23] sm:$0x3]  ;;  %vm687_vm6 = vcmp.eq.s32.totalorder %v1808_v6, 1 }
 0x10e   : >> { %v439_v12 = vadd.f32 %v438_v9, %v437_v4  ;;  %v478_v13 = vrot.slane %v477_v10, 1  ;;  %s1866_s29 = smov [#allocation16]  ;;  %s784_s30 = smov [#allocation31]  ;;  %v571_v56 = vld [vmem:[%s1860_s24] sm:$0x3] }
 0x10f   : >> { %v459_v14 = vadd.f32 %v458_v11, %v457_v8  ;;  %v792_v57 = vld [vmem:[%s1862_s25] sm:$0x3]  ;;  %s420_s27 = sadd.s32 1, %s1741_s27  }
 0x110   : >> { %440 = vst [vmem:[%s422_s10] sm:$0x1] %v439_v12  ;;  %v479_v15 = vadd.f32 %v478_v13, %v477_v10  ;;  %s1870_s10 = smov [#allocation18]  ;;  %v793_v58 = vld [vmem:[%s1864_s28] sm:$0x3]  ;;  %p417_p1 = scmp.ge.s32.totalorder %s420_s27, 3  }
 0x111   : >> { %460 = vst [vmem:[%s442_s11] sm:$0x1] %v459_v14  ;;  %v794_v59 = vld [vmem:[%s1866_s29] sm:$0x3]  ;;  %s562_s11 = smov [#allocation32]  ;;  %v321_v6 = vmov (%p417_p1), %v1808_v6  ;;  %v324_v7 = vmov (%p417_p1), %v1810_v7 }
 0x112   : >> { %480 = vst [vmem:[%s462_s12] sm:$0x1] %v479_v15  ;;  %v795_v61 = vld [vmem:[%s1870_s10] sm:$0x3]  ;;  %s786_s12 = smov [#allocation32]  ;;  %v374_v6 = vmov (%p417_p1), %v1808_v6  ;;  %vm336_vm7 = vcmp.eq.s32.totalorder (%p417_p1), %v324_v7, %v321_v6  ;;  %v377_v7 = vmov (%p417_p1), %v1810_v7 }
 0x113   : > { %v340_v6 = vmov (%p417_p1), %v1808_v6  ;;  %v343_v7 = vmov (%p417_p1), %v1810_v7 }
 0x114   : > { %v357_v6 = vmov (%p417_p1), %v1808_v6  ;;  %v360_v7 = vmov (%p417_p1), %v1810_v7 }
 0x117   : >> { %v484_v18 = vld [vmem:[%s483_s14] sm:$0xff]  ;;  %s590_s14 = smov [#allocation30] }
 0x118   : >> { %v486_v16 = vld [vmem:[%s485_s13] sm:$0xff]  ;;  %v507_v31 = vand.u32 2147483647, %v484_v18  ;;  %s588_s13 = smov [#allocation29] }
 0x119   : >> { %v490_v17 = vmul.f32 2.0, %v486_v16  ;;  %v488_v19 = vld [vmem:[%s487_s15] sm:$0xff]  ;;  %v508_v36 = vand.u32 2147483647, %v486_v16  ;;  %s1886_s15 = smov [#allocation12] }
 0x11a   : >> { %v489_v20 = vsub.f32 %v488_v19, %v484_v18  ;;  %v509_v32 = vand.u32 2147483647, %v488_v19 }
 0x11b   : >> { %1719 = vrcp.f32 %v490_v17 }
 0x11c   : >> { %v510_v35 = vmin.f32 %v507_v31, %v509_v32 }
 0x11e   : >> { %v511_v37 = vmul.f32 1.1920929e-08, %v510_v35 }
 0x120   : >> { %vm512_vm11 = vcmp.le.f32.partialorder %v508_v36, %v511_v37 }
 0x125   : >> { %v1720_v21 = vpop.eup %1719 }
 0x126   : >> { %v492_v22 = vmul.f32 %v1720_v21, %v489_v20 }
 0x128   : >> { %v494_v23 = vmul.f32 %v492_v22, %v492_v22  ;;  %vm493_vm10 = vcmp.ge.f32.partialorder %v492_v22, 0.0 }
 0x12a   : >> { %v495_v24 = vadd.f32 1.0, %v494_v23 }
 0x12c   : >> { %1721 = vrsqrt.f32 %v495_v24  ;;  %vm498_vm8 = vcmp.eq.f32.partialorder %v495_v24, inf  ;;  %v501_v26 = vand.u32 2147483648, %v495_v24  ;;  %vm500_vm9 = vcmp.eq.f32.partialorder %v495_v24, 0.0 }
 0x136   : >> { %v1722_v25 = vpop.eup %1721 }
 0x137   : >> { %v497_v27 = vmul.f32 %v1722_v25, %v495_v24 }
 0x139   : >> { %v499_v28 = vsel %vm498_vm8, %v495_v24, %v497_v27  ;;  %vm389_vm8 = vcmp.eq.s32.totalorder (%p417_p1), %v377_v7, %v374_v6 }
 0x13a   : >> { %v502_v29 = vsel %vm500_vm9, %v501_v26, %v499_v28 }
 0x13b   : >> { %v503_v30 = vxor.u32 2147483648, %v502_v29 }
 0x13d   : >> { %v504_v33 = vsel %vm493_vm10, %v502_v29, %v503_v30 }
 0x13e   : >> { %v505_v34 = vadd.f32 %v504_v33, %v492_v22 }
 0x140   : >> { %1723 = vrcp.f32 %v505_v34 }
 0x14a   : >> { %v1724_v38 = vpop.eup %1723 }
 0x14b   : >> { %v513_v39 = vsel %vm512_vm11, 0.0, %v1724_v38 }
 0x14c   : >> { %v514_v40 = vmul.f32 %v513_v39, %v513_v39  ;;  %v518_v41 = vmul.f32 %v513_v39, %v486_v16 }
 0x14e   : >> { %v515_v42 = vadd.f32 1.0, %v514_v40  ;;  %v519_v43 = vsub.f32 %v484_v18, %v518_v41  ;;  %v521_v44 = vadd.f32 %v518_v41, %v488_v19 }
 0x150   : >> { %1725 = vrsqrt.f32 %v515_v42  ;;  %523 = vst [vmem:[%s522_s16] sm:$0xff] %v519_v43  ;;  %525 = vst [vmem:[%s524_s0] sm:$0xff] %v521_v44  ;;  %s1888_s16 = smov [#allocation22]  ;;  %s1890_s0 = smov [#allocation23] }
 0x15a   : >> { %v1726_v45 = vpop.eup %1725 }
 0x15b   : >> { %527 = vst [vmem:[%s526_s1] sm:$0xff] %v1726_v45  ;;  %v517_v46 = vmul.f32 %v1726_v45, %v513_v39  ;;  %s1892_s1 = smov [#allocation20] }
 0x15d   : >> { %529 = vst [vmem:[%s528_s2] sm:$0xff] %v517_v46  ;;  %s1894_s2 = smov [#allocation16] }
 0x162   : >> { %v531_v47 = vld [vmem:[%s530_s3] ss:$0 sm:$0xff]  ;;  %s1896_s3 = smov [#allocation14] }
 0x163   : >> { %v540_v48 = vsel %vm539_vm12, %v531_v47, 0.0  ;;  %v589_v27 = vld [vmem:[%s588_s13] ss:$0 sm:$0xff]  ;;  %s760_s13 = smov [#allocation21] }
 0x164   : >> { %541 = vadd.xlane.f32.xlu0 %v540_v48  ;;  %v546_v49 = vld [vmem:[%s545_s17] ss:$0 sm:$0xff]  ;;  %s1900_s17 = smov [#allocation18] }
 0x165   : >> { %v555_v50 = vsel %vm554_vm13, %v546_v49, 0.0  ;;  %v591_v28 = vld [vmem:[%s590_s14] ss:$0 sm:$0xff]  ;;  %s737_s14 = smov [#allocation22] }
 0x168   : >> { %556 = vadd.xlane.f32.xlu0 %v555_v50 }
 0x1f1   : >> { %v542_v51 = vpop.xlane.xlu0 %541 }
 0x1f2   : >> { %544 = vst [vmem:[%s543_s18] sm:$0xff] %v542_v51  ;;  %s1902_s18 = smov [#allocation21] }
 0x1f5   : >> { %v557_v52 = vpop.xlane.xlu0 %556 }
 0x1f6   : >> { %559 = vst [vmem:[%s558_s21] sm:$0xff] %v557_v52  ;;  %s657_s21 = smov [#allocation23] }
 0x1f9   : >> { %v561_v60 = vld [vmem:[%s560_s19] sm:$0xff]  ;;  %s658_s19 = smov [#allocation28] }
 0x1fa   : >> { %v785_v62 = vld [vmem:[%s784_s30] sm:$0xff]  ;;  %v572_v63 = vmul.f32 %v568_v53, %v561_v60  ;;  %v575_v0 = vmul.f32 %v569_v54, %v561_v60  ;;  %v579_v1 = vmul.f32 %v570_v55, %v561_v60  ;;  %v582_v2 = vmul.f32 %v571_v56, %v561_v60  ;;  %s673_s30 = smov [#allocation21] }
 0x1fb   : >> { %v796_v3 = vmul.f32 %v792_v57, %v785_v62  ;;  %v799_v4 = vmul.f32 %v793_v58, %v785_v62  ;;  %v803_v5 = vmul.f32 %v794_v59, %v785_v62  ;;  %v806_v8 = vmul.f32 %v795_v61, %v785_v62 }
 0x1fd   : >> { %v563_v9 = vld [vmem:[%s562_s11] sm:$0xff]  ;;  %s1947_s11 = smov [#allocation23] }
 0x1fe   : >> { %v787_v10 = vld [vmem:[%s786_s12] sm:$0xff]  ;;  %v573_v11 = vmul.f32 %v570_v55, %v563_v9  ;;  %v576_v12 = vmul.f32 %v571_v56, %v563_v9  ;;  %v578_v13 = vmul.f32 %v568_v53, %v563_v9  ;;  %v581_v14 = vmul.f32 %v569_v54, %v563_v9  ;;  %s736_s12 = smov [#allocation20] }
 0x1ff   : >> { %v797_v15 = vmul.f32 %v794_v59, %v787_v10  ;;  %v800_v16 = vmul.f32 %v795_v61, %v787_v10  ;;  %v802_v17 = vmul.f32 %v792_v57, %v787_v10  ;;  %v805_v18 = vmul.f32 %v793_v58, %v787_v10  ;;  %v665_v59 = vld [vmem:[%s658_s19] ss:$0 sm:$0xff] }
 0x200   : >> { %v574_v19 = vsub.f32 %v572_v63, %v573_v11  ;;  %v577_v20 = vsub.f32 %v575_v0, %v576_v12  ;;  %v580_v21 = vadd.f32 %v579_v1, %v578_v13  ;;  %v583_v22 = vadd.f32 %v582_v2, %v581_v14 }
 0x201   : >> { %v798_v23 = vsub.f32 %v796_v3, %v797_v15  ;;  %v801_v24 = vsub.f32 %v799_v4, %v800_v16  ;;  %v804_v25 = vadd.f32 %v803_v5, %v802_v17  ;;  %v807_v26 = vadd.f32 %v806_v8, %v805_v18 }
 0x202   : >> { %585 = vst [vmem:[%s1856_s22] sm:$0x3] %v577_v20  ;;  %587 = vst [vmem:[%s1860_s24] sm:$0x3] %v583_v22  ;;  %s617_s22 = smov [#allocation27]  ;;  %s631_s24 = smov [#allocation21] }
 0x203   : >> { %584 = vst [vmem:[%s1854_s20] sm:$0x3] %v574_v19  ;;  %586 = vst [vmem:[%s1858_s23] sm:$0x3] %v580_v21  ;;  %s644_s20 = smov [#allocation22]  ;;  %s616_s23 = smov [#allocation20]  ;;  %v624_v63 = vld [vmem:[%s617_s22] ss:$0 sm:$0xff] }
 0x204   : >> { %808 = vst [vmem:[%s1862_s25] sm:$0x3] %v798_v23  ;;  %809 = vst [vmem:[%s1864_s28] sm:$0x3] %v801_v24  ;;  %s1944_s25 = smov [#allocation22]  ;;  %s1744_s28 = smov 1  }
 0x205   : >> { %810 = vst [vmem:[%s1866_s29] sm:$0x3] %v804_v25  ;;  %811 = vst [vmem:[%s1870_s10] sm:$0x3] %v807_v26  ;;  %s672_s29 = smov [#allocation20]  ;;  %s1745_s10 = smov 127  }
 0x209   : >> { %v599_v30 = vld [vmem:[%s1890_s0] sm:$0x3] }
 0x20a   : >> { %v598_v29 = vld [vmem:[%s1888_s16] sm:$0x3]  ;;  %v607_v36 = vmul.f32 %v599_v30, %v591_v28  ;;  %v610_v42 = vmul.f32 %v599_v30, %v589_v27 }
 0x20b   : >> { %v596_v31 = vld [vmem:[%s1892_s1] sm:$0x3]  ;;  %v606_v35 = vmul.f32 %v598_v29, %v589_v27  ;;  %v609_v37 = vmul.f32 %v598_v29, %v591_v28 }
 0x20c   : >> { %v814_v32 = vld [vmem:[%s1886_s15] ss:$0 sm:$0xff]  ;;  %v1667_v34 = vld [vmem:[%s1886_s15 + $0x1] ss:$0 sm:$0xff]  ;;  %v600_v48 = vmul.f32 %v596_v31, %v589_v27  ;;  %v603_v49 = vmul.f32 %v596_v31, %v591_v28 }
 0x20d   : >> { %v1666_v33 = vld [vmem:[%s1886_s15 - $0x1] sm:$0x2]  ;;  %v1669_v40 = vld [vmem:[%s1894_s2 + $0x1] sm:$0x1]  ;;  %v608_v47 = vsub.f32 %v606_v35, %v607_v36  ;;  %v611_v53 = vadd.f32 %v610_v42, %v609_v37 }
 0x20e   : >> { %v821_v38 = vsel %vm744_vm14, %v814_v32, %v1666_v33  ;;  %v825_v39 = vld [vmem:[%s1894_s2] ss:$0 sm:$0xff]  ;;  %v833_v43 = vsel %vm756_vm15, %v1667_v34, %v1669_v40  ;;  %v1671_v45 = vld [vmem:[%s1896_s3 + $0x1] ss:$0 sm:$0xff] }
 0x20f   : >> { %v838_v41 = vld [vmem:[%s1896_s3] ss:$0 sm:$0xff]  ;;  %824 = vst [vmem:[%s1886_s15] sm:$0x3] %v821_v38  ;;  %835 = vst [vmem:[%s1894_s2] sm:$0x3] %v833_v43  ;;  %v1673_v51 = vld [vmem:[%s1900_s17 + $0x1] sm:$0x1] }
 0x210   : >> { %v1670_v44 = vld [vmem:[%s1896_s3 - $0x1] sm:$0x2]  ;;  %1668 = vst [vmem:[%s1886_s15 + $0x1] sm:$0x1] %v825_v39  ;;  %v857_v54 = vsel %vm756_vm15, %v1671_v45, %v1673_v51  ;;  %614 = vst [vmem:[%s1888_s16] sm:$0x3] %v608_v47  ;;  %s761_s15 = smov [#allocation23] }
 0x211   : >> { %v849_v46 = vld [vmem:[%s1900_s17] ss:$0 sm:$0xff]  ;;  %v845_v50 = vsel %vm744_vm14, %v838_v41, %v1670_v44  ;;  %615 = vst [vmem:[%s1890_s0] sm:$0x3] %v611_v53  ;;  %s860_s16 = sadd.s32 (%p417_p1), 1, %s1737_s26   ;;  %s325_s0 = smov (%p417_p1), [#allocation20] }
 0x212   : >> { %v597_v52 = vld [vmem:[%s1902_s18] sm:$0x3]  ;;  %848 = vst [vmem:[%s1896_s3] sm:$0x3] %v845_v50  ;;  %859 = vst [vmem:[%s1900_s17] sm:$0x3] %v857_v54  ;;  %s361_s2 = smov (%p417_p1), [#allocation22]  ;;  %p413_p2 = scmp.ge.s32.totalorder (%p417_p1), %s860_s16, 15 }
 0x213   : >> { %v601_v55 = vmul.f32 %v597_v52, %v591_v28  ;;  %v604_v56 = vmul.f32 %v597_v52, %v589_v27  ;;  %1672 = vst [vmem:[%s1896_s3 + $0x1] sm:$0x1] %v849_v46  ;;  %s378_s3 = smov (%p417_p1), [#allocation23]  ;;  %s2035_s26 = smov (%p417_p1), %s860_s16 }
 0x215   : >> { %v602_v57 = vsub.f32 %v600_v48, %v601_v55  ;;  %v605_v58 = vadd.f32 %v604_v56, %v603_v49 }
 0x217   : >> { %612 = vst [vmem:[%s1892_s1] sm:$0x3] %v602_v57  ;;  %613 = vst [vmem:[%s1902_s18] sm:$0x3] %v605_v58  ;;  %v651_v60 = vld [vmem:[%s644_s20] sm:$0x3]  ;;  %s344_s1 = smov (%p417_p1), [#allocation21] }
 0x218   : >> { %v655_v61 = vsel %vm654_vm0, 0.0, %v651_v60  ;;  %v666_v62 = vld [vmem:[%s657_s21] sm:$0x3] }
 0x219   : >> { %656 = vst [vmem:[%s644_s20] sm:$0x3] %v655_v61  ;;  %v670_v0 = vsel %vm669_vm1, %v665_v59, %v666_v62 }
 0x21a   : >> { %671 = vst [vmem:[%s657_s21] sm:$0x3] %v670_v0 }
 0x21e   : >> { %v625_v1 = vld [vmem:[%s616_s23] sm:$0x3] }
 0x21f   : >> { %v638_v2 = vld [vmem:[%s631_s24] sm:$0x3]  ;;  %v629_v3 = vsel %vm628_vm3, %v624_v63, %v625_v1 }
 0x220   : >> { %v642_v4 = vsel %vm641_vm4, 0.0, %v638_v2  ;;  %630 = vst [vmem:[%s616_s23] sm:$0x3] %v629_v3  ;;  %v710_v5 = vld [vmem:[%s1944_s25] sm:$0x3] }
 0x221   : >> { %643 = vst [vmem:[%s631_s24] sm:$0x3] %v642_v4  ;;  %711 = vrot.lane.b32.xlu0 %v710_v5, %s1744_s28  ;;  %v706_v11 = vld [vmem:[%s1947_s11] sm:$0x3] }
 0x222   : >> { %v727_v12 = vld [vmem:[%s1947_s11] sm:$0x3] }
 0x223   : >> { %v709_v30 = vld [vmem:[%s1944_s25] sm:$0x3] }
 0x227   : >> { %v678_v8 = vld [vmem:[%s672_s29] sm:$0x3] }
 0x228   : >> { %679 = vrot.lane.b32.xlu1 %v678_v8, %s1744_s28  ;;  %v674_v9 = vld [vmem:[%s673_s30] sm:$0x3] }
 0x229   : >> { %v695_v10 = vld [vmem:[%s673_s30] sm:$0x3] }
 0x22a   : >> { %v677_v18 = vld [vmem:[%s672_s29] sm:$0x3] }
 0x22c   : >> { %675 = vrot.lane.b32.xlu1 %v674_v9, %s1744_s28 }
 0x230   : >> { %696 = vrot.lane.b32.xlu1 %v695_v10, %s1745_s10 }
 0x234   : >> { %707 = vrot.lane.b32.xlu1 %v706_v11, %s1744_s28 }
 0x238   : >> { %728 = vrot.lane.b32.xlu1 %v727_v12, %s1745_s10 }
 0x293   : >> { %v712_v20 = vpop.permute.xlu0 %711 }
 0x294   : >> { %v716_v22 = vsel %vm683_vm5, %v710_v5, %v712_v20 }
 0x29a   : >> { %v680_v13 = vpop.permute.xlu1 %679 }
 0x29b   : >> { %v684_v14 = vsel %vm683_vm5, %v678_v8, %v680_v13 }
 0x29e   : >> { %v676_v15 = vpop.permute.xlu1 %675 }
 0x29f   : >> { %v688_v16 = vsel %vm687_vm6, %v676_v15, %v684_v14 }
 0x2a0   : >> { %v694_v17 = vsel %vm1445_vm2, %v688_v16, 0.0 }
 0x2a1   : >> { %702 = vst [vmem:[%s672_s29] sm:$0x3] %v694_v17 }
 0x2a2   : >> { %v697_v19 = vpop.permute.xlu1 %696 }
 0x2a3   : >> { %v701_v21 = vsel %vm687_vm6, %v677_v18, %v697_v19 }
 0x2a4   : >> { %703 = vst [vmem:[%s673_s30] sm:$0x3] %v701_v21 }
 0x2a6   : >> { %v708_v23 = vpop.permute.xlu1 %707 }
 0x2a7   : >> { %v720_v24 = vsel %vm687_vm6, %v708_v23, %v716_v22 }
 0x2a8   : >> { %v738_v25 = vld [vmem:[%s736_s12] ss:$0 sm:$0xff]  ;;  %v1659_v27 = vld [vmem:[%s736_s12 + $0x1] ss:$0 sm:$0xff]  ;;  %v726_v29 = vsel %vm1445_vm2, %v720_v24, 0.0 }
 0x2a9   : >> { %v1658_v26 = vld [vmem:[%s736_s12 - $0x1] sm:$0x2]  ;;  %734 = vst [vmem:[%s1944_s25] sm:$0x3] %v726_v29 }
 0x2aa   : >> { %v745_v28 = vsel %vm744_vm14, %v738_v25, %v1658_v26  ;;  %v729_v31 = vpop.permute.xlu1 %728 }
 0x2ab   : >> { %748 = vst [vmem:[%s736_s12] sm:$0x3] %v745_v28  ;;  %v762_v32 = vld [vmem:[%s760_s13] ss:$0 sm:$0xff]  ;;  %v1663_v34 = vld [vmem:[%s760_s13 + $0x1] ss:$0 sm:$0xff]  ;;  %v733_v35 = vsel %vm687_vm6, %v709_v30, %v729_v31 }
 0x2ac   : >> { %v1662_v33 = vld [vmem:[%s760_s13 - $0x1] sm:$0x2]  ;;  %735 = vst [vmem:[%s1947_s11] sm:$0x3] %v733_v35 }
 0x2ad   : >> { %v769_v36 = vsel %vm744_vm14, %v762_v32, %v1662_v33 }
 0x2ae   : >> { %772 = vst [vmem:[%s760_s13] sm:$0x3] %v769_v36 }
 0x2b0   : >> { %v749_v37 = vld [vmem:[%s737_s14] ss:$0 sm:$0xff]  ;;  %v1661_v38 = vld [vmem:[%s737_s14 + $0x1] sm:$0x1] }
 0x2b1   : >> { %1660 = vst [vmem:[%s736_s12 + $0x1] sm:$0x1] %v749_v37  ;;  %v757_v39 = vsel %vm756_vm15, %v1659_v27, %v1661_v38  ;;  %419 = sbr.rel (!%p417_p1) target bundleno = 257 (0x101), region = 435 }
 0x2b2   : >> { %759 = vst [vmem:[%s737_s14] sm:$0x3] %v757_v39 }
 0x2b3   : >> { %v773_v40 = vld [vmem:[%s761_s15] ss:$0 sm:$0xff]  ;;  %v1665_v41 = vld [vmem:[%s761_s15 + $0x1] sm:$0x1] }
 0x2b4   : >> { %1664 = vst [vmem:[%s760_s13 + $0x1] sm:$0x1] %v773_v40  ;;  %v781_v42 = vsel %vm756_vm15, %v1663_v34, %v1665_v41 }
 0x2b5   : >> { %783 = vst [vmem:[%s761_s15] sm:$0x3] %v781_v42 }
 0x2b8   : > { %v331_v43 = vld [vmem:[%s325_s0] sm:$0x3] }
 0x2b9   : > { %v332_v45 = vsel %vm1445_vm2, %v331_v43, 0.0  ;;  %v367_v47 = vld [vmem:[%s361_s2] sm:$0x3] }
 0x2ba   : > { %v333_v49 = vmul.f32 %v332_v45, %v332_v45  ;;  %v368_v51 = vsel %vm1445_vm2, %v367_v47, 0.0 }
 0x2bb   : > { %v350_v44 = vld [vmem:[%s344_s1] sm:$0x3]  ;;  %v369_v53 = vmul.f32 %v368_v51, %v368_v51 }
 0x2bc   : > { %v351_v46 = vsel %vm1445_vm2, %v350_v44, 0.0  ;;  %v384_v48 = vld [vmem:[%s378_s3] sm:$0x3]  ;;  %v337_v56 = vsel %vm336_vm7, 0.0, %v333_v49 }
 0x2bd   : > { %v352_v50 = vmul.f32 %v351_v46, %v351_v46  ;;  %v385_v52 = vsel %vm1445_vm2, %v384_v48, 0.0 }
 0x2be   : > { %v386_v55 = vmul.f32 %v385_v52, %v385_v52 }
 0x2bf   : > { %v354_v54 = vadd.f32 %v352_v50, %v333_v49  ;;  %v353_v57 = vadd.f32 %v352_v50, %v337_v56 }
 0x2c0   : > { %v390_v60 = vsel %vm389_vm8, 0.0, %v386_v55 }
 0x2c1   : > { %v371_v58 = vadd.f32 %v369_v53, %v354_v54  ;;  %v370_v59 = vadd.f32 %v369_v53, %v353_v57 }
 0x2c3   : > { %v392_v61 = vadd.f32 %v386_v55, %v371_v58  ;;  %v391_v62 = vadd.f32 %v390_v60, %v370_v59 }
 0x2c5   : > { %393 = vadd.xlane.f32.xlu0 %v392_v61 }
 0x2c9   : > { %401 = vadd.xlane.f32.xlu0 %v391_v62 }
 0x352   : > { %v394_v63 = vpop.xlane.xlu0 %393 }
 0x353   : > { %v395_v0 = vrot.slane %v394_v63, 4 }
 0x355   : > { %v396_v1 = vadd.f32 %v395_v0, %v394_v63 }
 0x356   : > { %v402_v2 = vpop.xlane.xlu0 %401 }
 0x357   : > { %v397_v3 = vrot.slane %v396_v1, 2  ;;  %v403_v4 = vrot.slane %v402_v2, 4 }
 0x359   : > { %v404_v5 = vadd.f32 %v403_v4, %v402_v2  ;;  %v398_v8 = vadd.f32 %v397_v3, %v396_v1 }
 0x35b   : > { %v405_v9 = vrot.slane %v404_v5, 2  ;;  %v399_v11 = vrot.slane %v398_v8, 1 }
 0x35d   : > { %v406_v10 = vadd.f32 %v405_v9, %v404_v5  ;;  %v400_v14 = vadd.f32 %v399_v11, %v398_v8 }
 0x35f   : > { %v407_v12 = vrot.slane %v406_v10, 1 }
 0x361   : > { %v408_v13 = vadd.f32 %v407_v12, %v406_v10 }
 0x363   : > { %1696 = vpush %v408_v13 }
 0x364   : > { %1698 = vpush %v400_v14 }
 0x394   : > { %s1697_s27 = spop %1696 }
 0x395   : > { %s1699_s17 = spop %1698 }
 0x396   : > { %s411_s18 = smul.f32 1e-10, %s1699_s17 }
 0x398   : > { %p412_p3 = scmp.le.f32.partialorder %s1697_s27, %s411_s18 }
 0x39a   : > { %p414_p4 = por %p413_p2, %p412_p3 }
 0x39c   :  { %862 = sbr.rel (!%p414_p4) target bundleno = 256 (0x100), region = 446 }
 0x3a3 PF:  { %s863_s19 = smov [#allocation20]  ;;  %v867_v6 = vmov %v1808_v6  ;;  %v870_v7 = vmov %v1810_v7  ;;  %v918_v15 = vld [vmem:[#allocation12] sm:$0x3]  ;;  %v924_v16 = vld [vmem:[#allocation14] sm:$0x3]  ;;  %s883_s20 = smov [#allocation23] }
 0x3a4   :  { %v887_v6 = vmov %v1808_v6  ;;  %v890_v7 = vmov %v1810_v7  ;;  %v871_v17 = vld [vmem:[%s863_s19] sm:$0x3]  ;;  %vm874_vm9 = vcmp.eq.s32.totalorder %v870_v7, %v867_v6  ;;  %920 = vst [vmem:[#allocation13] sm:$0x3] %v918_v15  ;;  %926 = vst [vmem:[#allocation15] sm:$0x3] %v924_v16 }
 0x3a5   :  { %vm894_vm10 = vcmp.eq.s32.totalorder %v890_v7, %v887_v6  ;;  %v930_v18 = vld [vmem:[#allocation16] sm:$0x3]  ;;  %v875_v19 = vsel %vm874_vm9, %v871_v17, 0.0  ;;  %v891_v20 = vld [vmem:[%s883_s20] sm:$0x3]  ;;  %s864_s30 = smov [#allocation8] }
 0x3a6   :  { %932 = vst [vmem:[#allocation17] sm:$0x3] %v930_v18  ;;  %v936_v21 = vld [vmem:[#allocation18] sm:$0x3]  ;;  %v876_v22 = vrot.slane %v875_v19, 4  ;;  %v895_v23 = vsel %vm894_vm10, %v891_v20, 0.0 }
 0x3a7   :  { %938 = vst [vmem:[#allocation19] sm:$0x3] %v936_v21  ;;  %v896_v24 = vrot.slane %v895_v23, 4 }
 0x3a8   :  { %v877_v25 = vadd.f32 %v876_v22, %v875_v19 }
 0x3a9   :  { %v897_v26 = vadd.f32 %v896_v24, %v895_v23 }
 0x3aa   :  { %v878_v27 = vrot.slane %v877_v25, 2 }
 0x3ab   :  { %v898_v28 = vrot.slane %v897_v26, 2  ;;  %v1127_v29 = vld [vmem:[#allocation13] sm:$0x3]  ;;  %v1189_v30 = vld [vmem:[#allocation15] sm:$0x3] }
 0x3ac   :  { %v879_v31 = vadd.f32 %v878_v27, %v877_v25  ;;  %1128 = vst [vmem:[%s2031_s6] sm:$0x3] %v1127_v29  ;;  %1190 = vst [vmem:[%s2032_s7] sm:$0x3] %v1189_v30  ;;  %s884_s6 = smov [#allocation10] }
 0x3ad   :  { %v1251_v6 = vld [vmem:[#allocation17] sm:$0x3]  ;;  %v899_v7 = vadd.f32 %v898_v28, %v897_v26 }
 0x3ae   :  { %1252 = vst [vmem:[%s2033_s8] sm:$0x3] %v1251_v6  ;;  %v1313_v32 = vld [vmem:[#allocation19] sm:$0x3]  ;;  %v880_v33 = vrot.slane %v879_v31, 1 }
 0x3af   :  { %1314 = vst [vmem:[%s2034_s9] sm:$0x3] %v1313_v32  ;;  %v900_v34 = vrot.slane %v899_v7, 1 }
 0x3b0   :  { %v881_v35 = vadd.f32 %v880_v33, %v879_v31 }
 0x3b1   :  { %v901_v36 = vadd.f32 %v900_v34, %v899_v7 }
 0x3b2   :  { %882 = vst [vmem:[%s864_s30] sm:$0x1] %v881_v35 }
 0x3b3   :  { %902 = vst [vmem:[%s884_s6] sm:$0x1] %v901_v36 }
 0x3b9   :  { %v906_v37 = vld [vmem:[#allocation8] sm:$0x1] }
 0x3ba   :  { %908 = vst [vmem:[#allocation9] sm:$0x1] %v906_v37  ;;  %v912_v38 = vld [vmem:[#allocation10] sm:$0x1] }
 0x3bb   :  { %914 = vst [vmem:[#allocation11] sm:$0x1] %v912_v38 }
 0x3c1   :  { %v1001_v39 = vld [vmem:[#allocation9] sm:$0x1] }
 0x3c2   :  { %1002 = vst [vmem:[%s2029_s4] sm:$0x1] %v1001_v39  ;;  %v1065_v40 = vld [vmem:[#allocation11] sm:$0x1] }
 0x3c3   :  { %1066 = vst [vmem:[%s2030_s5] sm:$0x1] %v1065_v40 }

// kernel: custom-call.19
= control target key start
LH: loop header
LB: loop body
LE: loop exit
PB: predicated region body
PF: predicated region fallthrough
CT: control target
= control target key end

     0   :  { %v329_v1 = vmov 0.0   ;;  %s349_s11 = smov 0   ;;  %s405_s0 = inlined_call_operand.vmem [shape: f32[3,3], index: 0, kind: input, shape index: {}]   ;;  %s406_s1 = inlined_call_operand.vmem [shape: f32[3,3], index: 1, kind: output, shape index: {0}]   ;;  %s407_s2 = inlined_call_operand.vmem [shape: f32[3], index: 2, kind: output, shape index: {1}]  }
   0x1   :  { %v19_v0 = vld [vmem:[%s405_s0] sm:$0xf]  ;;  %41 = vst [vmem:[#allocation4] sm:$0x1] %v329_v1 }
   0x2   :  { %20 = vst [vmem:[#allocation1] sm:$0xf] %v19_v0 }
   0x9   :  { %v37_v2 = vld [vmem:[#allocation1] sm:$0xf] }
   0xa   :  { %38 = vst [vmem:[#allocation0] sm:$0xf] %v37_v2 }
  0x11   :  { %v39_v3 = vld [vmem:[#allocation0] sm:$0xff] }
  0x12   :  { %40 = vst [vmem:[#allocation2] sm:$0xff] %v39_v3 }
  0x13 LB: > { %v49_v4 = vlaneseq  ;;  %v358_v6 = vstv %s327_s11  ;;  %s76_s0 = scalar_lea.vmem [#allocation2], %s327_s11  ;;  %s112_s12 = smov [#allocation2]  ;;  %v330_v60 = vmov 1.0   ;;  %v147_v61 = vld [vmem:[#allocation4] ss:$0 sm:$0xff]  ;;  %s327_s11 = sphi %s349_s11, %s47_s11  }
  0x14   : > { %s134_s13 = scalar_lea.vmem [#allocation6], %s327_s11  ;;  %s150_s14 = smov [#allocation2] }
  0x15   : > { %v355_v5 = vshrl.u32 %v49_v4, 7  ;;  %v128_v49 = vand.u32 127, %v49_v4  ;;  %s151_s15 = smov [#allocation6] }
  0x17   : > { %vm53_vm0 = vcmp.gt.s32.totalorder %v355_v5, %v358_v6  ;;  %vm54_vm1 = vcmp.lt.s32.totalorder %v355_v5, 3  ;;  %v115_v5 = vmov %v355_v5  ;;  %vm373_vm12 = vcmp.eq.s32.totalorder %v128_v49, %v358_v6 }
  0x18   : > { %vm55_vm2 = vmand %vm53_vm0, %vm54_vm1  ;;  %vm119_vm9 = vcmp.gt.s32.totalorder %v115_v5, %v358_v6  ;;  %vm120_vm10 = vcmp.lt.s32.totalorder %v115_v5, 3  ;;  %v154_v5 = vmov %v355_v5  ;;  %vm180_vm15 = vcmp.gt.s32.totalorder %v128_v49, %v358_v6 }
  0x19   : > { %v48_v7 = vld [vmem:[#allocation2] sm:$0xff]  ;;  %v77_v16 = vld [vmem:[%s76_s0] ss:$0 sm:$0xff]  ;;  %vm121_vm11 = vmand %vm119_vm9, %vm120_vm10  ;;  %vm159_vm13 = vcmp.lt.s32.totalorder %v154_v5, 3  ;;  %v171_v5 = vmov %v355_v5 }
  0x1a   : > { %v56_v8 = vsel %vm55_vm2, %v48_v7, 0.0  ;;  %v78_v17 = vand.u32 2147483647, %v77_v16  ;;  %vm103_vm8 = vcmp.lt.f32.partialorder %v77_v16, 0.0  ;;  %v116_v46 = vld [vmem:[%s112_s12] sm:$0xff]  ;;  %vm188_vm14 = vcmp.ge.s32.totalorder %v171_v5, %v358_v6 }
  0x1b   : > { %v57_v9 = vmul.f32 %v56_v8, %v56_v8  ;;  %v122_v50 = vsel %vm121_vm11, %v116_v46, 0.0  ;;  %v157_v0 = vld [vmem:[%s150_s14] sm:$0xff]  ;;  %s167_s14 = smov %s150_s14  ;;  %vm189_vm0 = vmand %vm373_vm12, %vm188_vm14 }
  0x1c   : > { %v79_v22 = vmax.f32 %v78_v17, 0.0  ;;  %s192_s16 = scalar_lea.vmem %s167_s14, %s327_s11  ;;  %s47_s11 = sadd.s32 1, %s327_s11  }
  0x1d   : > { %v58_v10 = vrot.slane %v57_v9, 4  ;;  %p44_p0 = scmp.ge.s32.totalorder %s47_s11, 3  }
  0x1f   : > { %v59_v11 = vadd.f32 %v58_v10, %v57_v9 }
  0x21   : > { %v60_v12 = vrot.slane %v59_v11, 2 }
  0x23   : > { %v61_v13 = vadd.f32 %v60_v12, %v59_v11 }
  0x25   : > { %v62_v14 = vrot.slane %v61_v13, 1 }
  0x27   : > { %v63_v15 = vadd.f32 %v62_v14, %v61_v13  ;;  %v178_v14 = vld [vmem:[%s167_s14] sm:$0xff] }
  0x29   : > { %311 = vrsqrt.f32 %v63_v15  ;;  %vm66_vm3 = vcmp.eq.f32.partialorder %v63_v15, inf  ;;  %v69_v19 = vand.u32 2147483648, %v63_v15  ;;  %vm68_vm4 = vcmp.eq.f32.partialorder %v63_v15, 0.0 }
  0x33   : > { %v312_v18 = vpop.eup %311 }
  0x34   : > { %v65_v20 = vmul.f32 %v312_v18, %v63_v15 }
  0x36   : > { %v67_v21 = vsel %vm66_vm3, %v63_v15, %v65_v20 }
  0x37   : > { %v70_v23 = vsel %vm68_vm4, %v69_v19, %v67_v21 }
  0x38   : > { %v80_v24 = vand.u32 2147483647, %v70_v23 }
  0x3a   : > { %v81_v25 = vmax.f32 %v79_v22, %v80_v24 }
  0x3c   : > { %313 = vrcp.f32 %v81_v25  ;;  %vm93_vm7 = vcmp.eq.f32.partialorder %v81_v25, 0.0 }
  0x46   : > { %v314_v26 = vpop.eup %313 }
  0x47   : > { %v83_v27 = vmul.f32 %v314_v26, %v78_v17  ;;  %v86_v28 = vmul.f32 0.0, %v314_v26  ;;  %v90_v29 = vmul.f32 %v314_v26, %v80_v24 }
  0x49   : > { %v84_v30 = vmul.f32 %v83_v27, %v83_v27  ;;  %v87_v31 = vmul.f32 %v86_v28, %v86_v28  ;;  %v91_v32 = vmul.f32 %v90_v29, %v90_v29 }
  0x4b   : > { %v88_v33 = vadd.f32 %v87_v31, %v84_v30 }
  0x4d   : > { %v92_v34 = vadd.f32 %v91_v32, %v88_v33 }
  0x4f   : > { %315 = vrsqrt.f32 %v92_v34  ;;  %vm96_vm5 = vcmp.eq.f32.partialorder %v92_v34, inf  ;;  %v99_v36 = vand.u32 2147483648, %v92_v34  ;;  %vm98_vm6 = vcmp.eq.f32.partialorder %v92_v34, 0.0 }
  0x59   : > { %v316_v35 = vpop.eup %315 }
  0x5a   : > { %v95_v37 = vmul.f32 %v316_v35, %v92_v34 }
  0x5c   : > { %v97_v38 = vsel %vm96_vm5, %v92_v34, %v95_v37 }
  0x5d   : > { %v100_v39 = vsel %vm98_vm6, %v99_v36, %v97_v38 }
  0x5e   : > { %v101_v40 = vmul.f32 %v100_v39, %v81_v25 }
  0x60   : > { %v102_v41 = vsel %vm93_vm7, 0.0, %v101_v40 }
  0x61   : > { %v104_v42 = vxor.u32 2147483648, %v102_v41 }
  0x63   : > { %v105_v43 = vsel %vm103_vm8, %v102_v41, %v104_v42 }
  0x64   : > { %v366_v44 = vsel %vm68_vm4, %v77_v16, %v105_v43  ;;  %317 = vrcp.f32 %v105_v43  ;;  %v106_v47 = vsub.f32 %v105_v43, %v77_v16 }
  0x65   : > { %v111_v45 = vsub.f32 %v77_v16, %v366_v44 }
  0x67   : > { %319 = vrcp.f32 %v111_v45 }
  0x6e   : > { %v318_v48 = vpop.eup %317 }
  0x6f   : > { %v108_v51 = vmul.f32 %v318_v48, %v106_v47 }
  0x71   : > { %v320_v52 = vpop.eup %319  ;;  %v110_v56 = vsel %vm68_vm4, 0.0, %v108_v51 }
  0x72   : > { %v124_v53 = vmul.f32 %v320_v52, %v122_v50  ;;  %v140_v58 = vsel %vm373_vm12, %v110_v56, 0.0 }
  0x74   : > { %v125_v55 = vsel %vm68_vm4, 0.0, %v124_v53 }
  0x75   : > { %v130_v57 = vsel %vm373_vm12, %v125_v55, 0.0 }
  0x76   : > { %131 = vadd.xlane.f32.xlu0 %v130_v57 }
  0x7a   : > { %141 = vadd.xlane.f32.xlu0 %v140_v58 }
 0x103   : > { %v132_v59 = vpop.xlane.xlu0 %131 }
 0x104   : > { %133 = vst [vmem:[#allocation6] sm:$0xff] %v132_v59 }
 0x105   : > { %135 = vst [vmem:[%s134_s13] sm:$0x1] %v330_v60 }
 0x107   : > { %v142_v62 = vpop.xlane.xlu0 %141 }
 0x108   : > { %v148_v63 = vsel %vm373_vm12, %v142_v62, %v147_v61 }
 0x109   : > { %149 = vst [vmem:[#allocation4] sm:$0x1] %v148_v63 }
 0x10c   : > { %v156_v1 = vld [vmem:[%s151_s15] sm:$0xff]  ;;  %s168_s15 = smov %s151_s15 }
 0x10d   : > { %v158_v2 = vmul.f32 %v157_v0, %v156_v1  ;;  %v176_v13 = vld [vmem:[%s168_s15] sm:$0xff] }
 0x10f   : > { %v160_v3 = vsel %vm159_vm13, %v158_v2, 0.0 }
 0x110   : > { %v161_v4 = vrot.slane %v160_v3, 4  ;;  %v209_v6 = vld [vmem:[#allocation4] sm:$0x1] (%p44_p0) }
 0x111   :  { %211 = vst [vmem:[#allocation5] sm:$0x1] (%p44_p0), %v209_v6 }
 0x112   : > { %v162_v7 = vadd.f32 %v161_v4, %v160_v3 }
 0x114   : > { %v163_v8 = vrot.slane %v162_v7, 2 }
 0x116   : > { %v164_v9 = vadd.f32 %v163_v8, %v162_v7 }
 0x118   : > { %v165_v10 = vrot.slane %v164_v9, 1  ;;  %v260_v22 = vld [vmem:[#allocation5] sm:$0x1] (%p44_p0) }
 0x119   :  { %261 = vst [vmem:[%s407_s2] sm:$0x1] (%p44_p0), %v260_v22 }
 0x11a   : > { %v166_v11 = vadd.f32 %v165_v10, %v164_v9 }
 0x11c   : > { %v172_v12 = vmul.f32 %v166_v11, %v142_v62 }
 0x11e   : > { %v177_v15 = vmul.f32 %v176_v13, %v172_v12 }
 0x120   : > { %v181_v16 = vsub.f32 %v178_v14, %v177_v15 }
 0x122   : > { %v182_v17 = vsel %vm180_vm15, %v181_v16, %v178_v14 }
 0x123   : > { %v190_v18 = vsel %vm189_vm0, %v176_v13, %v182_v17 }
 0x124   : > { %191 = vst [vmem:[%s167_s14] sm:$0xff] %v190_v18 }
 0x127   :  { %46 = sbr.rel (!%p44_p0) target bundleno = 19 (0x13), region = 131 }
 0x12b   : > { %v193_v19 = vld [vmem:[%s192_s16] ss:$0 sm:$0xff] }
 0x12c   : > { %v198_v20 = vsel %vm373_vm12, %v366_v44, %v193_v19 }
 0x12d   : > { %199 = vst [vmem:[%s192_s16] sm:$0x1] %v198_v20 }
 0x134   :  { %v203_v5 = vld [vmem:[#allocation2] sm:$0xf] }
 0x135   :  { %205 = vst [vmem:[#allocation3] sm:$0xf] %v203_v5 }
 0x13c   :  { %v227_v21 = vld [vmem:[#allocation3] sm:$0xf] }
 0x13d   :  { %228 = vst [vmem:[%s406_s1] sm:$0xf] %v227_v21 }

// kernel: forward.1
= control target key start
LH: loop header
LB: loop body
LE: loop exit
PB: predicated region body
PF: predicated region fallthrough
CT: control target
= control target key end

     0   :  { %18 = vsyncpa [#allocation3], 0  ;;  %s2949_s0 = inlined_call_operand.vmem [shape: f32[16,4], index: 0, kind: input, shape index: {}]   ;;  %s2950_s1 = inlined_call_operand.vmem [shape: f32[2,16,16], index: 1, kind: input, shape index: {}]   ;;  %s2951_s2 = inlined_call_operand.vmem [shape: f32[10,8], index: 2, kind: input, shape index: {}]   ;;  %s2952_s3 = inlined_call_operand.vmem [shape: f32[24,240], index: 3, kind: input, shape index: {}]   ;;  %s2953_s4 = inlined_call_operand.vmem [shape: f32[10,240], index: 4, kind: input, shape index: {}]   ;;  %s2954_s5 = inlined_call_operand.vmem [shape: f32[12,3], index: 5, kind: input, shape index: {}]   ;;  %s2955_s6 = inlined_call_operand.vmem [shape: f32[12,16], index: 6, kind: input, shape index: {}]   ;;  %s2956_s7 = inlined_call_operand.vmem [shape: f32[8,8], index: 7, kind: input, shape index: {}]   ;;  %s2957_s8 = inlined_call_operand.vmem [shape: f32[6,240], index: 8, kind: input, shape index: {}]   ;;  %s2958_s9 = inlined_call_operand.vmem [shape: f32[8,240], index: 9, kind: input, shape index: {}]   ;;  %s2959_s10 = inlined_call_operand.vmem [shape: f32[33,8], index: 10, kind: input, shape index: {}]   ;;  %s2960_s11 = inlined_call_operand.vmem [shape: f32[8,240], index: 11, kind: input, shape index: {}]   ;;  %s2961_s12 = inlined_call_operand.vmem [shape: f32[4], index: 12, kind: input, shape index: {}]   ;;  %s2962_s13 = inlined_call_operand.vmem [shape: f32[4,8], index: 13, kind: output, shape index: {}]  }
   0x1   :  { %s49_s27 = sshll.u32 %s2961_s12, 4  ;;  %s50_s27 = int_to_ptr.vmem [resolvable:$true] %s49_s27 }
   0x2   :  { %s2531_s28 = scalar_lea.vmem %s50_s27, 16  ;;  %p2536_p1 = scmp.lt.s32.totalorder %s50_s27, %s50_s27 }
   0x3   :  { %p2532_p0 = scmp.ne.s32.totalorder %s50_s27, %s2531_s28  ;;  %p2537_p2 = scmp.lt.s32.totalorder %s2531_s28, %s2531_s28 }
   0x5   :  { %p2538_p3 = por %p2537_p2, %p2536_p1 }
   0x7   :  { %p2539_p4 = pnand %p2538_p3, %p2532_p0 }
   0x9   :  { %2542 = shalt.err (!%p2539_p4)
}
   0xa   :  { %s2545_s29 = smov [#allocation2]  }
   0xb   :  { %52 = dma.vmem_to_smem %s50_s27, 16, %s2545_s29, [#allocation3]  }
   0xc   :  { %2543 = dma.done.wait [#allocation3], 16  }
   0xd   :  { %2544 = vsyncadd [#allocation3], 4294967280 }
   0xe   :  { %56 = sfence }
   0xf   :  { %v62_v0 = vld [vmem:[%s2949_s0] sm:$0xff]  ;;  %vm64_vm0 = vcmask 31744   ;;  %v63_v1 = vld [vmem:[%s2949_s0 + $0x8] sm:$0xff]  ;;  %v2546_v16 = vmov 0.0|0.0   ;;  %vm2547_vm1 = vmmov 0   ;;  %v2548_v18 = vmov 0.0  }
  0x10   :  { %v65_v2 = vsel %vm64_vm0, %v62_v0, -inf  ;;  %v68_v3 = vsel %vm64_vm0, %v63_v1, -inf  ;;  %v87_v14 = vld [vmem:[%s2950_s1] sm:$0xff]  ;;  %v88_v15 = vld [vmem:[%s2950_s1 + $0x8] sm:$0xff]  ;;  %2451 = vmatprep.subr.bf16.mxu0 %v2546_v16  ;;  %2357 = vmatprep.mubr.msk.f32.mxu0 %vm2547_vm1, %v2548_v18  ;;  %vm1306_vm2 = vcmask 23552   ;;  %vm1310_vm3 = vcmask 19456  }
  0x11   :  { %66 = vmax.xlane.f32.xlu0 %v65_v2  ;;  %v2452_v17 = vpack.c.bf16 %v88_v15, %v87_v14  ;;  %v1304_v24 = vld [vmem:[%s2954_s5] sm:$0xff]  ;;  %v1305_v25 = vld [vmem:[%s2954_s5 + $0x8] sm:$0xf]  ;;  %vm185_vm4 = vcmask 130048   ;;  %v113_v30 = vlaneseq  ;;  %vm265_vm9 = vcmask 1043456   ;;  %v59_v14 = vld [vmem:[%s2959_s10 + $0x10] sm:$0xff] }
  0x12   :  { %v1307_v27 = vsel %vm1306_vm2, %v1304_v24, -inf  ;;  %v1311_v28 = vsel %vm1310_vm3, %v1305_v25, -inf  ;;  %v60_v15 = vld [vmem:[%s2959_s10 + $0x18] sm:$0xff]  ;;  %s2250_s16 = sld [smem:[#allocation2 + $0x1]]  ;;  %s2284_s17 = sld [smem:[#allocation2 + $0x2]] }
  0x13   :  { %2453 = vmatpush3.bf16.msra.mxu0 %v2452_v17  ;;  %v2655_v31 = vshrl.u32 %v113_v30, 7  ;;  %v2664_v35 = vand.u32 127, %v113_v30  ;;  %v2730_v17 = vpack.c.bf16 %v60_v15, %v59_v14 }
  0x15   :  { %69 = vmax.xlane.f32.xlu0 %v68_v3  ;;  %v2658_v32 = vcvt.s32.f32 %v2655_v31  ;;  %v2667_v36 = vcvt.s32.f32 %v2664_v35  ;;  %v115_v51 = vadd.s32 8, %v2655_v31  ;;  %2455 = vmatprep.subr.bf16.mxu0 %v2730_v17 }
  0x17   :  { %v2661_v33 = vadd.f32 0.5, %v2658_v32  ;;  %v117_v52 = vcvt.s32.f32 %v115_v51 }
  0x19   :  { %v123_v34 = vmul.f32 0.33333334, %v2661_v33  ;;  %v122_v53 = vadd.f32 0.5, %v117_v52 }
  0x1b   :  { %v125_v37 = vfloor.f32 %v123_v34  ;;  %v124_v54 = vmul.f32 0.33333334, %v122_v53 }
  0x1d   :  { %v137_v38 = vsub.f32 %v2667_v36, %v125_v37  ;;  %v126_v55 = vfloor.f32 %v124_v54  ;;  %v127_v56 = vmul.f32 3.0, %v125_v37 }
  0x1f   :  { %v139_v39 = vand.u32 2147483647, %v137_v38  ;;  %v128_v57 = vmul.f32 3.0, %v126_v55  ;;  %v129_v58 = vsub.f32 %v2658_v32, %v127_v56  ;;  %v138_v63 = vsub.f32 %v2667_v36, %v126_v55 }
  0x21   :  { %vm141_vm5 = vcmp.lt.f32.partialorder %v139_v39, 0.5  ;;  %v130_v59 = vsub.f32 %v117_v52, %v128_v57  ;;  %v133_v60 = vadd.f32 1.0, %v129_v58  ;;  %vm131_vm6 = vcmp.lt.f32.partialorder %v129_v58, %v125_v37 }
  0x22   :  { %v143_v40 = vsel %vm141_vm5, 1.0, %v2548_v18  ;;  %v140_v2 = vand.u32 2147483647, %v138_v63  ;;  %vm1440_vm5 = vcmask 97280  }
  0x23   :  { %2362 = vmatprep.mubr.msk.f32.mxu1 %vm64_vm0, %v143_v40  ;;  %v134_v61 = vadd.f32 1.0, %v130_v59  ;;  %v135_v62 = vsel %vm131_vm6, %v129_v58, %v133_v60  ;;  %vm132_vm7 = vcmp.lt.f32.partialorder %v130_v59, %v126_v55  ;;  %vm1192_vm6 = vcmask 1041408  }
  0x24   :  { %vm142_vm8 = vcmp.lt.f32.partialorder %v140_v2, 0.5 }
  0x9e   :  { %v67_v4 = vpop.xlane.xlu0 %66 }
  0x9f   :  { %v71_v5 = vsub.f32 %v62_v0, %v67_v4  ;;  %v145_v0 = vsub.f32 %v2667_v36, %v135_v62 }
  0xa1   :  { %v73_v6 = vmul.f32 1.442695, %v71_v5  ;;  %v147_v4 = vand.u32 2147483647, %v145_v0 }
  0xa2   :  { %v70_v7 = vpop.xlane.xlu0 %69 }
  0xa3   :  { %2503 = vpow2.f32 %v73_v6  ;;  %v72_v8 = vsub.f32 %v63_v1, %v70_v7  ;;  %v136_v1 = vsel %vm132_vm7, %v130_v59, %v134_v61  ;;  %vm149_vm10 = vcmp.lt.f32.partialorder %v147_v4, 0.5 }
  0xa4   :  { %v146_v3 = vsub.f32 %v2667_v36, %v136_v1  ;;  %v2694_v7 = vsel %vm142_vm8, 1.0, %v2548_v18 }
  0xa5   :  { %v75_v9 = vmul.f32 1.442695, %v72_v8 }
  0xa6   :  { %v148_v5 = vand.u32 2147483647, %v146_v3 }
  0xa7   :  { %2505 = vpow2.f32 %v75_v9  ;;  %v2698_v9 = vsel %vm149_vm10, 1.0, %v2548_v18 }
  0xa8   :  { %vm150_vm11 = vcmp.lt.f32.partialorder %v148_v5, 0.5 }
  0xad   :  { %v2504_v10 = vpop.eup %2503 }
  0xae   :  { %v77_v11 = vsel %vm64_vm0, %v2504_v10, 0.0 }
  0xaf   :  { %78 = vadd.xlane.f32.xlu1 %v77_v11  ;;  %v2246_v11 = vld [vmem:[%s2950_s1 + $0x18] sm:$0xff] }
  0xb1   :  { %v2506_v12 = vpop.eup %2505 }
  0xb2   :  { %v80_v13 = vsel %vm64_vm0, %v2506_v12, 0.0 }
  0xb3   :  { %81 = vadd.xlane.f32.xlu1 %v80_v13 }
  0xb7   :  { %1308 = vmax.xlane.f32.xlu1 %v1307_v27 }
  0xbb   :  { %1312 = vmax.xlane.f32.xlu1 %v1311_v28 }
 0x13c   :  { %v79_v19 = vpop.xlane.xlu1 %78 }
 0x13d   :  { %2507 = vrcp.f32 %v79_v19  ;;  %v57_v19 = vld [vmem:[%s2959_s10] sm:$0xff] }
 0x140   :  { %v82_v20 = vpop.xlane.xlu1 %81 }
 0x141   :  { %2509 = vrcp.f32 %v82_v20  ;;  %v58_v20 = vld [vmem:[%s2959_s10 + $0x8] sm:$0xff] }
 0x144   :  { %v1309_v41 = vpop.xlane.xlu1 %1308 }
 0x145   :  { %v2672_v42 = vsub.f32 %v1304_v24, %v1309_v41  ;;  %v2549_v41 = vmov 1.0  }
 0x147   :  { %v2508_v21 = vpop.eup %2507  ;;  %v1316_v43 = vsel %vm1306_vm2, %v2672_v42, -inf  ;;  %v1328_v45 = vsel %vm1306_vm2, %v2672_v42, 0.0  ;;  %v1322_v48 = vsel %vm1306_vm2, %v2672_v42, inf }
 0x148   :  { %v84_v22 = vmul.f32 %v2508_v21, %v2504_v10  ;;  %1317 = vmax.xlane.f32.xlu1 %v1316_v43  ;;  %v1313_v44 = vpop.xlane.xlu1 %1312  ;;  %v2245_v10 = vld [vmem:[%s2950_s1 + $0x10] sm:$0xff]  ;;  %v2740_v21 = vpack.c.bf16 %v58_v20, %v57_v19 }
 0x149   :  { %v2678_v46 = vsub.f32 %v1305_v25, %v1313_v44  ;;  %v2463_v13 = vpack.c.bf16 %v2246_v11, %v2245_v10 }
 0x14a   :  { %153 = vxpose.xlu0.b32.start [1/2] (short) (narrow) %v84_v22, 8 }
 0x14b   :  { %v2510_v23 = vpop.eup %2509  ;;  %v1319_v47 = vsel %vm1310_vm3, %v2678_v46, -inf  ;;  %v1331_v49 = vsel %vm1310_vm3, %v2678_v46, 0.0  ;;  %v1325_v50 = vsel %vm1310_vm3, %v2678_v46, inf }
 0x14c   :  { %v86_v26 = vmul.f32 %v2510_v23, %v2506_v12  ;;  %1329 = vadd.xlane.f32.xlu1 %v1328_v45  ;;  %v2714_v12 = vsel %vm150_vm11, 1.0, %v2548_v18  ;;  %vm1035_vm11 = vcmask 195584  }
 0x14e   :  { %154 = vxpose.xlu0.b32.end [2/2] (short) (narrow) %v86_v26, 8 }
 0x150   :  { %1320 = vmax.xlane.f32.xlu1 %v1319_v47 }
 0x154   :  { %1323 = vmin.xlane.f32.xlu1 %v1322_v48 }
 0x158   :  { %1332 = vadd.xlane.f32.xlu1 %v1331_v49 }
 0x15c   :  { %1326 = vmin.xlane.f32.xlu1 %v1325_v50 }
 0x1ca   :  { %v2651_v29 = vpop.trf.xlu0 }
 0x1cb   :  { %2358 = vmatmul.mubr.msk.f32.vlgmr.msra.gmra.mrb[0].mxu0 %vm185_vm4, %v2651_v29 }
 0x1cc   :  { %2457 = vmatpush3.bf16.msra.mxu0 %v2730_v17 }
 0x1cd   :  { %2459 = vmatprep.subr.bf16.mxu0 %v2740_v21 }
 0x1d5   :  { %v1318_v22 = vpop.xlane.xlu1 %1317 }
 0x1d9   :  { %v1330_v23 = vpop.xlane.xlu1 %1329 }
 0x1da   :  { %v1334_v25 = vsub.f32 %v1330_v23, %v1318_v22 }
 0x1dd   :  { %v1321_v24 = vpop.xlane.xlu1 %1320 }
 0x1e1   :  { %v1324_v26 = vpop.xlane.xlu1 %1323 }
 0x1e2   :  { %v1336_v27 = vsub.f32 %v1334_v25, %v1324_v26  ;;  %v1346_v28 = vmul.f32 3.0, %v1324_v26 }
 0x1e4   :  { %v1342_v30 = vadd.f32 %v1336_v27, %v1318_v22  ;;  %v1348_v34 = vadd.f32 1.0, %v1346_v28 }
 0x1e5   :  { %v1333_v37 = vpop.xlane.xlu1 %1332 }
 0x1e6   :  { %v1350_v39 = vadd.f32 %v1342_v30, %v1324_v26 }
 0x1e8   :  { %vm1352_vm13 = vcmp.gt.f32.partialorder %v1348_v34, %v1350_v39  ;;  %v93_v34 = vld [vmem:[%s2952_s3 + $0x8] sm:$0xff] }
 0x1e9   :  { %v1327_v44 = vpop.xlane.xlu1 %1326  ;;  %v1362_v51 = vsel %vm1352_vm13, %v1324_v26, 0.0 }
 0x1ea   :  { %v1347_v49 = vmul.f32 3.0, %v1327_v44 }
 0x1ec   :  { %v1349_v54 = vadd.f32 1.0, %v1347_v49 }
 0x29e   :  { %v255_v6 = vpop.f32.mrb[0].mxu0 }
 0x29f   :  { %v2359_v8 = vpop.f32.mrb[1].mxu0  ;;  %2360 = vmatprep.subr.msk.mxu1 %vm265_vm9, %v255_v6 }
 0x2a0   :  { %2361 = vmatpush3.msk.msra.mxu1 %vm265_vm9, %v255_v6 }
 0x2a1   :  { %2363 = vmatmul.mubr.msk.f32.vlgmr.msra.gmra.mrb[0].mxu1 %vm64_vm0, %v2694_v7  ;;  %2365 = vmatprep.subr.msk.mxu1 %vm265_vm9, %v255_v6 }
 0x2a2   :  { %2366 = vmatpush3.msk.msra.mxu1 %vm265_vm9, %v255_v6  ;;  %2367 = vmatprep.mubr.msk.f32.mxu1 %vm64_vm0, %v2698_v9 }
 0x2a3   :  { %2462 = vmatprep.subr.bf16.mxu1 %v2546_v16 }
 0x2a5   :  { %2368 = vmatmul.mubr.msk.f32.vlgmr.msra.gmra.mrb[2].mxu1 %vm64_vm0, %v2714_v12 }
 0x2a6   :  { %2464 = vmatpush3.bf16.msra.mxu1 %v2463_v13  ;;  %2388 = vmatprep.mubr.msk.f32.mxu1 %vm2547_vm1, %v2548_v18 }
 0x2a9   :  { %2389 = vmatmul.mubr.msk.f32.vlgmr.msra.gmra.mrb[4].mxu1 %vm185_vm4, %v2651_v29  ;;  %v1338_v29 = vmul.f32 2.0, %v1336_v27 }
 0x2aa   :  { %2393 = vmatprep.mubr.msk.f32.mxu1 %vm64_vm0, %v143_v40  ;;  %v1335_v40 = vsub.f32 %v1333_v37, %v1321_v24  ;;  %v95_v37 = vld [vmem:[%s2952_s3 + $0x18] sm:$0xff] }
 0x2ab   :  { %v1340_v38 = vadd.f32 1.0, %v1338_v29  ;;  %v2473_v39 = vpack.c.bf16 %v95_v37, %v93_v34 }
 0x2ac   :  { %v1337_v48 = vsub.f32 %v1335_v40, %v1327_v44  ;;  %v94_v40 = vld [vmem:[%s2952_s3 + $0x10] sm:$0xff] }
 0x2ad   :  { %vm1344_vm12 = vcmp.gt.f32.partialorder %v1340_v38, %v1342_v30  ;;  %v92_v38 = vld [vmem:[%s2952_s3] sm:$0xff] }
 0x2ae   :  { %v1354_v43 = vsel %vm1344_vm12, 2.0, %v2549_v41  ;;  %v1358_v45 = vsel %vm1344_vm12, %v1336_v27, 0.0  ;;  %v1339_v52 = vmul.f32 2.0, %v1337_v48  ;;  %v1343_v53 = vadd.f32 %v1337_v48, %v1321_v24 }
 0x2af   :  { %v1356_v47 = vsel %vm1352_vm13, 3.0, %v1354_v43  ;;  %v1360_v50 = vadd.f32 %v1358_v45, %v1318_v22  ;;  %v2769_v22 = vld [vmem:[%s2959_s10 + $0x20] ss:$0 sm:$0xff]  ;;  %v2475_v43 = vpack.c.bf16 %v94_v40, %v92_v38  ;;  %vm1188_vm12 = vcmask 80896  }
 0x2b0   :  { %2511 = vrcp.f32 %v1356_v47  ;;  %v1341_v55 = vadd.f32 1.0, %v1339_v52  ;;  %v1351_v56 = vadd.f32 %v1343_v53, %v1327_v44  ;;  %v96_v45 = vld [vmem:[%s2952_s3 + $0x20] sm:$0xff] }
 0x2b1   :  { %v1364_v57 = vadd.f32 %v1362_v51, %v1360_v50 }
 0x2b2   :  { %vm1345_vm14 = vcmp.gt.f32.partialorder %v1341_v55, %v1343_v53  ;;  %vm1353_vm15 = vcmp.gt.f32.partialorder %v1349_v54, %v1351_v56 }
 0x2b3   :  { %v1355_v58 = vsel %vm1345_vm14, 2.0, %v2549_v41  ;;  %v1359_v59 = vsel %vm1345_vm14, %v1337_v48, 0.0  ;;  %v2280_v62 = vadd.f32 -1.0, %v1364_v57  ;;  %v1363_v63 = vsel %vm1353_vm15, %v1327_v44, 0.0  ;;  %v97_v44 = vld [vmem:[%s2952_s3 + $0x28] sm:$0xff] }
 0x2b4   :  { %v1357_v60 = vsel %vm1353_vm15, 3.0, %v1355_v58  ;;  %v1361_v61 = vadd.f32 %v1359_v59, %v1321_v24  ;;  %v1393_v48 = vmul.f32 0.5, %v2661_v33  ;;  %v105_v59 = vld [vmem:[%s2953_s4 + $0x8] sm:$0xff]  ;;  %v107_v33 = vld [vmem:[%s2953_s4 + $0x18] sm:$0x3]  ;;  %vm1112_vm14 = vcmask 916480  }
 0x2b5   :  { %2513 = vrcp.f32 %v1357_v60  ;;  %v2477_v60 = vpack.c.bf16 %v107_v33, %v105_v59  ;;  %v1386_v33 = vld [vmem:[%s2958_s9] sm:$0xff]  ;;  %vm2017_vm15 = vcmask 64512  }
 0x2b6   :  { %v1365_v1 = vadd.f32 %v1363_v63, %v1361_v61  ;;  %v1394_v55 = vfloor.f32 %v1393_v48 }
 0x2b8   :  { %v2281_v4 = vadd.f32 -1.0, %v1365_v1 }
 0x2ba   :  { %v2512_v0 = vpop.eup %2511 }
 0x2bb   :  { %v1369_v2 = vmul.f32 %v2512_v0, %v2280_v62 }
 0x2bd   :  { %v1372_v3 = vsub.f32 %v2672_v42, %v1369_v2  ;;  %v1395_v2 = vmul.f32 2.0, %v1394_v55 }
 0x2bf   :  { %v1374_v5 = vmax.f32 %v1372_v3, 0.0  ;;  %v2514_v6 = vpop.eup %2513  ;;  %v1396_v3 = vsub.f32 %v2658_v32, %v1395_v2 }
 0x2c0   :  { %v1371_v8 = vmul.f32 %v2514_v6, %v2281_v4 }
 0x2c1   :  { %1408 = vxpose.xlu1.b32.start [1/2] (short) (narrow) %v1374_v5, 8  ;;  %v1398_v4 = vadd.f32 1.0, %v1396_v3  ;;  %v102_v5 = vld [vmem:[%s2951_s2] sm:$0xff]  ;;  %vm1397_vm8 = vcmp.lt.f32.partialorder %v1396_v3, %v1394_v55 }
 0x2c2   :  { %v1373_v10 = vsub.f32 %v2678_v46, %v1371_v8 }
 0x2c3   :  { %v1399_v6 = vsel %vm1397_vm8, %v1396_v3, %v1398_v4 }
 0x2c4   :  { %v1375_v11 = vmax.f32 %v1373_v10, 0.0  ;;  %v1404_v8 = vsub.f32 %v2667_v36, %v1399_v6  ;;  %v103_v10 = vld [vmem:[%s2951_s2 + $0x8] sm:$0x3]  ;;  %s101_s2 = sld [smem:[#allocation2]] }
 0x2c6   :  { %1409 = vxpose.xlu1.b32.end [2/2] (short) (narrow) %v1375_v11, 8  ;;  %v1405_v11 = vand.u32 2147483647, %v1404_v8 }
 0x2c8   :  { %vm1406_vm10 = vcmp.lt.f32.partialorder %v1405_v11, 0.5  ;;  %v1378_v11 = vld [vmem:[%s2957_s8] sm:$0x3f] }
 0x2c9   :  { %v1407_v32 = vsel %vm1406_vm10, 1.0, %v2548_v18 }
 0x342   :  { %v1424_v30 = vpop.trf.xlu1 }
 0x374   :  { %v2364_v13 = vpop.f32.mrb[0].mxu1 }
 0x375   :  { %v335_v14 = vpop.f32.mrb[1].mxu1 }
 0x378   :  { %v2369_v15 = vpop.f32.mrb[2].mxu1 }
 0x379   :  { %v416_v19 = vpop.f32.mrb[3].mxu1 }
 0x37a   :  { %2374 = vmatprep.mubr.msk.f32.mxu0 %vm185_vm4, %v416_v19 }
 0x37b   :  { %2375 = vmatmul.mubr.msk.f32.vlgmr.msra.gmra.mrb[2].mxu0 %vm185_vm4, %v2369_v15  ;;  %v106_v15 = vld [vmem:[%s2953_s4 + $0x10] sm:$0x3] }
 0x37c   :  { %2461 = vmatpush3.bf16.msra.mxu0 %v2740_v21  ;;  %2381 = vmatprep.mubr.msk.f32.mxu0 %vm185_vm4, %v335_v14  ;;  %v661_v42 = vpop.f32.mrb[4].mxu1  ;;  %v104_v14 = vld [vmem:[%s2953_s4] sm:$0xff] }
 0x37d   :  { %v2390_v20 = vpop.f32.mrb[5].mxu1  ;;  %2391 = vmatprep.subr.msk.mxu1 %vm265_vm9, %v661_v42  ;;  %2396 = vmatprep.subr.msk.mxu0 %vm265_vm9, %v661_v42  ;;  %v2480_v19 = vpack.c.bf16 %v106_v15, %v104_v14 }
 0x37e   :  { %2392 = vmatpush3.msk.msra.mxu1 %vm265_vm9, %v661_v42 }
 0x37f   :  { %2394 = vmatmul.mubr.msk.f32.vlgmr.msra.gmra.mrb[6].mxu1 %vm64_vm0, %v2694_v7  ;;  %2466 = vmatprep.subr.bf16.mxu1 %v2730_v17 }
 0x380   :  { %2468 = vmatpush3.bf16.msra.mxu1 %v2730_v17 }
 0x381   :  { %2470 = vmatprep.subr.bf16.mxu1 %v2740_v21 }
 0x383   :  { %2382 = vmatmul.mubr.msk.f32.vlgmr.msra.gmra.mrb[2].mxu0 %vm185_vm4, %v2364_v13  ;;  %v1385_v13 = vld [vmem:[%s2956_s7] sm:$0xff] }
 0x384   :  { %2397 = vmatpush3.msk.msra.mxu0 %vm265_vm9, %v661_v42  ;;  %2398 = vmatprep.mubr.msk.f32.mxu0 %vm64_vm0, %v2698_v9  ;;  %v1376_v9 = vld [vmem:[%s2955_s6] sm:$0xff] }
 0x385   :  { %2474 = vmatprep.subr.bf16.mxu0 %v2473_v39 }
 0x387   :  { %2399 = vmatmul.mubr.msk.f32.vlgmr.msra.gmra.mrb[4].mxu0 %vm64_vm0, %v2714_v12  ;;  %v1377_v12 = vld [vmem:[%s2955_s6 + $0x8] sm:$0xf]  ;;  %vm2550_vm0 = vmmov 1  }
 0x388   :  { %1103 = vmatprep.mubr.f32.mxu0 %v2548_v18  ;;  %v2484_v29 = vpack.c.bf16 %v1377_v12, %v1376_v9  ;;  %vm2485_vm3 = vmpackc.low %vm265_vm9, %vm2550_vm0  ;;  %2476 = vmatpush1.bf16.msra.mxu0 %v2475_v43 }
 0x389   :  { %1043 = vmatprep.subr.mxu0 %v97_v44  ;;  %vm2820_vm7 = vmpackc.low %vm1192_vm6, %vm2550_vm0  ;;  %v2248_v44 = vld [vmem:[%s2960_s11 + $0x1] ss:$8 sm:$0x3]  ;;  %vm1858_vm0 = vcmask 48128   ;;  %vm2238_vm6 = vcmask 60416  }
 0x38c   :  { %1044 = vmatpush1.msra.mxu0 %v96_v45 }
 0x38d   :  { %2479 = vmatprep.subr.msk.bf16.mxu0 %vm2820_vm7, %v2477_v60 }
 0x452   :  { %v2395_v46 = vpop.f32.mrb[6].mxu1 }
 0x453   :  { %v734_v7 = vpop.f32.mrb[7].mxu1 }
 0x456   :  { %v2383_v23 = vpop.f32.mrb[2].mxu0 }
 0x457   :  { %v578_v24 = vpop.f32.mrb[3].mxu0  ;;  %v592_v51 = vadd.f32 %v2383_v23, %v2769_v22 }
 0x458   :  { %v591_v25 = vadd.f32 %v2769_v22, %v578_v24  ;;  %v1387_v24 = vld [vmem:[%s2958_s9 + $0x8] sm:$0xff] }
 0x459   :  { %v594_v57 = vmax.f32 %v592_v51, 0.0 }
 0x45a   :  { %v593_v26 = vmax.f32 %v591_v25, 0.0  ;;  %v2400_v27 = vpop.f32.mrb[4].mxu0  ;;  %v2878_v25 = vsub.s32 1, %v2655_v31 }
 0x45b   :  { %v809_v28 = vpop.f32.mrb[5].mxu0 }
 0x45c   :  { %2405 = vmatprep.mubr.msk.f32.mxu1 %vm185_vm4, %v809_v28  ;;  %1003 = vxpose.xlu0.b32.start [1/3] (short) (narrow) %v593_v26, 8  ;;  %v1153_v51 = vrot.slane %v2248_v44, %v2878_v25 }
 0x45d   :  { %2406 = vmatmul.mubr.msk.f32.vlgmr.msra.gmra.mrb[8].mxu1 %vm185_vm4, %v2400_v27  ;;  %v2247_v27 = vld [vmem:[%s2960_s11 + $0x4] ss:$8 sm:$0x3] }
 0x45e   :  { %2472 = vmatpush3.bf16.msra.mxu1 %v2740_v21  ;;  %2412 = vmatprep.mubr.msk.f32.mxu1 %vm185_vm4, %v734_v7  ;;  %v1125_v37 = vrot.slane %v2247_v27, %v2878_v25 }
 0x45f   :  { %2483 = vmatprep.subr.bf16.mxu1 %v2546_v16 }
 0x465   :  { %2413 = vmatmul.mubr.msk.f32.vlgmr.msra.gmra.mrb[8].mxu1 %vm185_vm4, %v2395_v46 }
 0x466   :  { %2486 = vmatpush3.bf16.msk.msra.mxu1 %vm2485_vm3, %v2484_v29  ;;  %2419 = vmatprep.mubr.msk.f32.mxu1 %vm2547_vm1, %v2548_v18  ;;  %vm2126_vm3 = vcmask 7168  }
 0x467   :  { %2427 = vmatprep.subr.mxu1 %v2548_v18 }
 0x469   :  { %2420 = vmatmul.mubr.msk.f32.vlgmr.msra.gmra.mrb[10].mxu1 %vm1440_vm5, %v1424_v30  ;;  %vm2128_vm5 = vcmask 15360  }
 0x46a   :  { %2429 = vmatprep.mubr.msk.f32.mxu1 %vm2547_vm1, %v2548_v18 }
 0x538   :  { %v2414_v47 = vpop.f32.mrb[8].mxu1 }
 0x539   :  { %v981_v49 = vadd.f32 %v2414_v47, %v2769_v22  ;;  %v971_v50 = vpop.f32.mrb[9].mxu1 }
 0x53a   :  { %v980_v52 = vadd.f32 %v2769_v22, %v971_v50 }
 0x53b   :  { %v983_v53 = vmax.f32 %v981_v49, 0.0 }
 0x53c   :  { %v982_v54 = vmax.f32 %v980_v52, 0.0  ;;  %v1513_v62 = vpop.f32.mrb[10].mxu1  ;;  %v2249_v52 = vld [vmem:[%s2960_s11 + $0x5] ss:$8 sm:$0x3] }
 0x53d   :  { %v987_v56 = vrot.slane %v983_v53, 4  ;;  %v2421_v1 = vpop.f32.mrb[11].mxu1 }
 0x53e   :  { %v986_v58 = vrot.slane %v982_v54, 4 }
 0x540   :  { %v991_v63 = vsel %vm265_vm9, %v594_v57, %v986_v58  ;;  %v988_v0 = vsel %vm265_vm9, %v986_v58, %v987_v56  ;;  %vm1520_vm9 = vcmask 1042432   ;;  %v1284_v57 = vrot.slane %v2249_v52, %v2878_v25 }
 0x541   :  { %1004 = vxpose.xlu0.b32.cont [2/3] (short) (narrow) %v991_v63, 8  ;;  %2428 = vmatpush3.msk.msra.mxu1 %vm1520_vm9, %v1513_v62 }
 0x542   :  { %2490 = vmatprep.subr.bf16.mxu1 %v2546_v16  ;;  %2430 = vmatmul.mubr.msk.f32.vlgmr.msra.gmra.mrb[12].mxu1 %vm1306_vm2, %v1407_v32  ;;  %v2285_v32 = vld [vmem:[%s2960_s11 + $0x3] ss:$8 sm:$0x3] }
 0x543   :  { %2492 = vmatpush3.bf16.msra.mxu1 %v2740_v21  ;;  %2443 = vmatprep.mubr.msk.f32.mxu1 %vm2547_vm1, %v2548_v18  ;;  %v1400_v21 = vsub.f32 %v2667_v36, %v1394_v55 }
 0x544   :  { %2021 = vmatprep.subr.mxu1 %v1387_v24 }
 0x545   :  { %1005 = vxpose.xlu0.b32.end [3/3] (short) (narrow) %v988_v0, 8  ;;  %v1401_v20 = vand.u32 2147483647, %v1400_v21  ;;  %v1982_v21 = vrot.slane %v2285_v32, %v2878_v25 }
 0x547   :  { %vm1402_vm13 = vcmp.lt.f32.partialorder %v1401_v20, 0.5 }
 0x548   :  { %v1403_v7 = vsel %vm1402_vm13, 1.0, %v2548_v18 }
 0x549   :  { %1156 = vxpose.xlu0.b32.start [1/2] (short) (narrow) %v102_v5, 8 }
 0x54d   :  { %1157 = vxpose.xlu0.b32.end [2/2] (short) (narrow) %v103_v10, 8  ;;  %v1379_v10 = vld [vmem:[%s2957_s8 + $0x8] sm:$0x3f] }
 0x551   :  { %1985 = vxpose.xlu0.b32.start.end [1/1] (short) (narrow) %v1385_v13, 8 }
 0x5bd   :  { %v1019_v42 = vpop.trf.xlu0 }
 0x5be   :  { %2274 = vmatmul.mubr.msk.f32.vlgmr.msra.gmra.mrb[6].mxu0 %vm1035_vm11, %v1019_v42  ;;  %v2286_v42 = vld [vmem:[%s2960_s11 + $0x7] ss:$8 sm:$0x3] }
 0x5bf   :  { %2482 = vmatpush1.bf16.msk.msra.mxu0 %vm2820_vm7, %v2480_v19  ;;  %1263 = vmatprep.mubr.f32.mxu0 %v2548_v18 }
 0x5c0   :  { %2422 = vmatprep.subr.mxu0 %v2548_v18 }
 0x5c9   :  { %v1172_v46 = vpop.trf.xlu0 }
 0x5ca   :  { %2278 = vmatmul.mubr.msk.f32.vlgmr.msra.gmra.mrb[8].mxu0 %vm1188_vm12, %v1172_v46 }
 0x5cb   :  { %2423 = vmatpush3.msk.msra.mxu0 %vm1520_vm9, %v1513_v62  ;;  %2424 = vmatprep.mubr.msk.f32.mxu0 %vm2547_vm1, %v2548_v18 }
 0x5cc   :  { %2487 = vmatprep.subr.bf16.mxu0 %v2546_v16  ;;  %v2872_v16 = vsub.s32 0, %v2655_v31 }
 0x5ce   :  { %2425 = vmatmul.mubr.msk.f32.vlgmr.msra.gmra.mrb[10].mxu0 %vm1306_vm2, %v1403_v7  ;;  %v1121_v29 = vrot.slane %v2247_v27, %v2872_v16  ;;  %v1149_v49 = vrot.slane %v2248_v44, %v2872_v16  ;;  %v1280_v59 = vrot.slane %v2249_v52, %v2872_v16  ;;  %v1978_v19 = vrot.slane %v2285_v32, %v2872_v16 }
 0x5cf   :  { %2489 = vmatpush3.bf16.msra.mxu0 %v2730_v17  ;;  %2436 = vmatprep.mubr.msk.f32.mxu0 %vm2547_vm1, %v2548_v18  ;;  %v98_v17 = vld [vmem:[%s2960_s11] ss:$8 sm:$0x3] }
 0x5d0   :  { %v996_v26 = vrot.slane %v98_v17, %v2872_v16  ;;  %v1000_v28 = vrot.slane %v98_v17, %v2878_v25 }
 0x5d1   :  { %v2001_v0 = vpop.trf.xlu0 }
 0x615   :  { %v1663_v36 = vpop.f32.mrb[12].mxu1 }
 0x616   :  { %v2431_v23 = vpop.f32.mrb[13].mxu1  ;;  %2437 = vmatmul.mubr.msk.f32.vlgmr.msra.gmra.mrb[12].mxu0 %vm185_vm4, %v1663_v36  ;;  %v2102_v36 = vrot.slane %v2286_v42, %v2872_v16 }
 0x617   :  { %1933 = vmatprep.mubr.f32.mxu0 %v2548_v18 }
 0x691   :  { %v1105_v9 = vpop.f32.mrb[6].mxu0 }
 0x692   :  { %v1106_v12 = vadd.f32 %v1105_v9, %v996_v26  ;;  %v1107_v30 = vpop.f32.mrb[7].mxu0  ;;  %v2106_v26 = vrot.slane %v2286_v42, %v2878_v25 }
 0x693   :  { %v1108_v34 = vadd.f32 %v1107_v30, %v1000_v28 }
 0x694   :  { %v1110_v38 = vmax.f32 %v1106_v12, 0.0 }
 0x695   :  { %v1111_v39 = vmax.f32 %v1108_v34, 0.0  ;;  %v2282_v34 = vld [vmem:[%s2960_s11 + $0x2] ss:$8 sm:$0x3] }
 0x696   :  { %v1128_v40 = vmul.f32 %v1121_v29, %v1110_v38 }
 0x697   :  { %v1129_v43 = vmul.f32 %v1125_v37, %v1111_v39  ;;  %v1113_v45 = vsel %vm1112_vm14, %v1111_v39, 0.0  ;;  %v1819_v37 = vrot.slane %v2282_v34, %v2872_v16  ;;  %v2283_v39 = vld [vmem:[%s2960_s11 + $0x6] ss:$8 sm:$0x3]  ;;  %s2287_s11 = sld [smem:[#allocation2 + $0x3]] }
 0x698   :  { %v1114_v47 = vadd.f32 %v1113_v45, %v1110_v38  ;;  %v1823_v38 = vrot.slane %v2282_v34, %v2878_v25 }
 0x699   :  { %v1130_v48 = vsel %vm1112_vm14, %v1129_v43, 0.0 }
 0x69a   :  { %v1131_v50 = vadd.f32 %v1130_v48, %v1128_v40 }
 0x69d   :  { %v1265_v53 = vpop.f32.mrb[8].mxu0 }
 0x69e   :  { %v1266_v54 = vadd.f32 %v1265_v53, %v1149_v49  ;;  %v1267_v55 = vpop.f32.mrb[9].mxu0 }
 0x69f   :  { %v1268_v56 = vadd.f32 %v1267_v55, %v1153_v51 }
 0x6a0   :  { %v1270_v58 = vmax.f32 %v1266_v54, 0.0 }
 0x6a1   :  { %v1271_v60 = vmax.f32 %v1268_v56, 0.0  ;;  %v1590_v61 = vpop.f32.mrb[10].mxu0 }
 0x6a2   :  { %v2426_v62 = vpop.f32.mrb[11].mxu0  ;;  %2444 = vmatmul.mubr.msk.f32.vlgmr.msra.gmra.mrb[14].mxu1 %vm185_vm4, %v1590_v61  ;;  %v1287_v2 = vmul.f32 %v1280_v59, %v1270_v58  ;;  %vm1862_vm4 = vcmask 1045504   ;;  %v1293_v59 = vstv %s2250_s16  ;;  %v1134_v61 = vstv %s101_s2 }
 0x6a3   :  { %v1288_v63 = vmul.f32 %v1284_v57, %v1271_v60  ;;  %2022 = vmatpush1.msra.mxu1 %v1386_v33  ;;  %2085 = vmatprep.mubr.f32.mxu1 %v2548_v18  ;;  %v1272_v1 = vsel %vm1112_vm14, %v1271_v60, 0.0 }
 0x6a4   :  { %v1273_v3 = vadd.f32 %v1272_v1, %v1270_v58  ;;  %2296 = vmatprep.subr.msk.mxu0 %vm1862_vm4, %v1379_v10 }
 0x6a5   :  { %v1289_v4 = vsel %vm1112_vm14, %v1288_v63, 0.0  ;;  %2297 = vmatpush1.msk.msra.mxu0 %vm1862_vm4, %v1378_v11 }
 0x6a6   :  { %2300 = vmatmul.mubr.msk.f32.vlgmr.msra.gmra.mrb[16].mxu1 %vm2017_vm15, %v2001_v0  ;;  %v1290_v5 = vadd.f32 %v1289_v4, %v1287_v2  ;;  %2446 = vmatprep.subr.mxu0 %v2548_v18 }
 0x6e9   :  { %v1736_v6 = vpop.f32.mrb[12].mxu0 }
 0x6ea   :  { %v2438_v8 = vpop.f32.mrb[13].mxu0 }
 0x775   :  { %v1809_v13 = vpop.f32.mrb[14].mxu1 }
 0x776   :  { %v1810_v14 = vadd.f32 %v1809_v13, %v1736_v6  ;;  %v2445_v15 = vpop.f32.mrb[15].mxu1 }
 0x778   :  { %v1813_v20 = vadd.f32 %v2769_v22, %v1810_v14 }
 0x779   :  { %v2087_v46 = vpop.f32.mrb[16].mxu1 }
 0x77a   :  { %v2088_v7 = vadd.f32 %v2087_v46, %v1978_v19  ;;  %v2089_v23 = vpop.f32.mrb[17].mxu1  ;;  %v1814_v24 = vmax.f32 %v1813_v20, 0.0 }
 0x77b   :  { %v2090_v17 = vadd.f32 %v2089_v23, %v1982_v21 }
 0x77c   :  { %v2092_v27 = vmax.f32 %v2088_v7, 0.0  ;;  %1826 = vxpose.xlu0.b32.start.end [1/1] (short) (narrow) %v1814_v24, 8 }
 0x77d   :  { %v2093_v28 = vmax.f32 %v2090_v17, 0.0 }
 0x77e   :  { %v2109_v9 = vmul.f32 %v2102_v36, %v2092_v27 }
 0x77f   :  { %v2110_v12 = vmul.f32 %v2106_v26, %v2093_v28  ;;  %v2094_v56 = vsel %vm1112_vm14, %v2093_v28, 0.0 }
 0x780   :  { %v2095_v57 = vadd.f32 %v2094_v56, %v2092_v27 }
 0x781   :  { %v2111_v29 = vsel %vm1112_vm14, %v2110_v12, 0.0 }
 0x782   :  { %v2112_v30 = vadd.f32 %v2111_v29, %v2109_v9 }
 0x784   :  { %2113 = vadd.xlane.f32.xlu1 %v2112_v30 }
 0x788   :  { %1274 = vadd.xlane.f32.xlu1 %v1273_v3 }
 0x78c   :  { %1115 = vadd.xlane.f32.xlu1 %v1114_v47  ;;  %v1954_v47 = vrot.slane %v2283_v39, %v2878_v25  ;;  %v2115_v25 = vstv %s2287_s11 }
 0x7a9   :  { %1291 = vadd.xlane.f32.xlu0 %v1290_v5 }
 0x7ad   :  { %1132 = vadd.xlane.f32.xlu0 %v1131_v50 }
 0x7fc   :  { %v1842_v22 = vpop.trf.xlu0 }
 0x7fd   :  { %2298 = vmatmul.mubr.msk.f32.vlgmr.msra.gmra.mrb[14].mxu0 %vm1858_vm0, %v1842_v22 }
 0x7fe   :  { %2448 = vmatprep.mubr.msk.f32.mxu0 %vm2547_vm1, %v2548_v18  ;;  %v1950_v18 = vrot.slane %v2283_v39, %v2872_v16  ;;  %vm2131_vm1 = vcmp.eq.s32.totalorder %v2655_v31, %v2664_v35  ;;  %v1963_v31 = vstv %s2284_s17 }
 0x7ff   :  { %2447 = vmatpush3.msk.msra.mxu0 %vm2131_vm1, %v2549_v41 }
 0x811   :  { %v2114_v58 = vpop.xlane.xlu1 %2113 }
 0x812   :  { %v2116_v33 = vadd.f32 %v2115_v25, %v2114_v58 }
 0x814   :  { %v2301_v63 = vmul.f32 -1.442695, %v2116_v33 }
 0x815   :  { %v1275_v20 = vpop.xlane.xlu1 %1274 }
 0x816   :  { %2515 = vpow2.f32 %v2301_v63 }
 0x819   :  { %v1116_v24 = vpop.xlane.xlu1 %1115 }
 0x820   :  { %v2516_v35 = vpop.eup %2515 }
 0x821   :  { %v2120_v5 = vadd.f32 1.0, %v2516_v35 }
 0x836   :  { %v1292_v16 = vpop.xlane.xlu0 %1291 }
 0x837   :  { %v1294_v60 = vadd.f32 %v1293_v59, %v1292_v16 }
 0x839   :  { %v2279_v1 = vmul.f32 -1.442695, %v1294_v60 }
 0x83a   :  { %v1133_v62 = vpop.xlane.xlu0 %1132 }
 0x83b   :  { %v1135_v0 = vadd.f32 %v1134_v61, %v1133_v62  ;;  %2517 = vpow2.f32 %v2279_v1 }
 0x83d   :  { %v2275_v2 = vmul.f32 -1.442695, %v1135_v0 }
 0x83f   :  { %2519 = vpow2.f32 %v2275_v2 }
 0x845   :  { %v2518_v3 = vpop.eup %2517 }
 0x846   :  { %v1298_v10 = vadd.f32 1.0, %v2518_v3 }
 0x849   :  { %v2520_v8 = vpop.eup %2519 }
 0x84a   :  { %v1139_v11 = vadd.f32 1.0, %v2520_v8 }
 0x8d0   :  { %v1935_v40 = vpop.f32.mrb[14].mxu0 }
 0x8d1   :  { %v1936_v43 = vadd.f32 %v1935_v40, %v1819_v37  ;;  %v1937_v44 = vpop.f32.mrb[15].mxu0 }
 0x8d2   :  { %v1938_v45 = vadd.f32 %v1937_v44, %v1823_v38 }
 0x8d3   :  { %v1940_v48 = vmax.f32 %v1936_v43, 0.0 }
 0x8d4   :  { %v1941_v49 = vmax.f32 %v1938_v45, 0.0 }
 0x8d5   :  { %v1957_v52 = vmul.f32 %v1950_v18, %v1940_v48 }
 0x8d6   :  { %v1958_v50 = vmul.f32 %v1954_v47, %v1941_v49  ;;  %v1942_v51 = vsel %vm1112_vm14, %v1941_v49, 0.0 }
 0x8d7   :  { %v1943_v53 = vadd.f32 %v1942_v51, %v1940_v48 }
 0x8d8   :  { %v1959_v54 = vsel %vm1112_vm14, %v1958_v50, 0.0 }
 0x8d9   :  { %v1960_v55 = vadd.f32 %v1959_v54, %v1957_v52 }
 0x8db   :  { %1961 = vadd.xlane.f32.xlu0 %v1960_v55 }
 0x8df   :  { %2096 = vadd.xlane.f32.xlu0 %v2095_v57 }
 0x8e3   :  { %1944 = vadd.xlane.f32.xlu0 %v1943_v53 }
 0x968   :  { %v1962_v41 = vpop.xlane.xlu0 %1961 }
 0x969   :  { %v1964_v4 = vadd.f32 %v1963_v31, %v1962_v41 }
 0x96b   :  { %v2299_v6 = vmul.f32 -1.442695, %v1964_v4 }
 0x96c   :  { %v2097_v42 = vpop.xlane.xlu0 %2096 }
 0x96d   :  { %2521 = vpow2.f32 %v2299_v6 }
 0x96e   :  { %2523 = vrcp.f32 %v2120_v5 }
 0x96f   :  { %2525 = vrcp.f32 %v1298_v10 }
 0x970   :  { %2527 = vrcp.f32 %v1139_v11  ;;  %v1945_v12 = vpop.xlane.xlu0 %1944 }
 0x977   :  { %v2522_v32 = vpop.eup %2521 }
 0x978   :  { %v2524_v13 = vpop.eup %2523  ;;  %v1968_v14 = vadd.f32 1.0, %v2522_v32 }
 0x979   :  { %v2526_v15 = vpop.eup %2525  ;;  %v2123_v19 = vadd.f32 1.0, %v2524_v13 }
 0x97a   :  { %2529 = vrcp.f32 %v1968_v14  ;;  %v2528_v21 = vpop.eup %2527  ;;  %v1301_v46 = vadd.f32 1.0, %v2526_v15 }
 0x97b   :  { %v2124_v7 = vmul.f32 %v2123_v19, %v2097_v42  ;;  %v1142_v36 = vadd.f32 1.0, %v2528_v21 }
 0x97c   :  { %v1302_v23 = vmul.f32 %v1301_v46, %v1275_v20 }
 0x97d   :  { %v2125_v17 = vmul.f32 0.125, %v2124_v7  ;;  %v1143_v27 = vmul.f32 %v1142_v36, %v1116_v24 }
 0x97e   :  { %v1303_v28 = vmul.f32 0.125, %v1302_v23 }
 0x97f   :  { %v1144_v22 = vmul.f32 0.125, %v1143_v27 }
 0x980   :  { %v2127_v29 = vsel %vm2126_vm3, %v1303_v28, %v2125_v17 }
 0x981   :  { %v2129_v37 = vsel %vm2128_vm5, %v2127_v29, %v1144_v22 }
 0x984   :  { %v2530_v26 = vpop.eup %2529 }
 0x985   :  { %v1971_v9 = vadd.f32 1.0, %v2530_v26 }
 0x987   :  { %v1972_v30 = vmul.f32 %v1971_v9, %v1945_v12 }
 0x989   :  { %v1973_v34 = vmul.f32 0.125, %v1972_v30 }
 0x98b   :  { %v2130_v38 = vsel %vm1306_vm2, %v2129_v37, %v1973_v34 }
 0x98c   :  { %2133 = vxpose.xlu1.b32.start.end [1/1] (short) (narrow) %v2130_v38, 8 }
 0xa0c   :  { %v2149_v39 = vpop.trf.xlu1 }
 0xa0d   :  { %2449 = vmatmul.mubr.msk.f32.vlgmr.msra.gmra.mrb[16].mxu0 %vm2017_vm15, %v2149_v39 }
 0xae0   :  { %v2234_v40 = vpop.f32.mrb[16].mxu0 }
 0xae1   :  { %2239 = vst.msk [vmem:[%s2962_s13] sm:$0xf] %vm2238_vm6, %v2234_v40  ;;  %v2450_v43 = vpop.f32.mrb[17].mxu0 }
 0xae2   :  { %2244 = vsyncpa [#allocation3], 1 }

</bundles_post_ra>
